<compile_context>
chip_gen: v7x
topology: tpu7x:2x2x1
jax: 0.10.0
libtpu: 0.0.40
codegen_flags: <defaults>
</compile_context>

<pallas_src>
import functools

import jax
import jax.numpy as jnp
import numpy as np
from jax.experimental import pallas as pl
from jax.experimental.pallas import tpu as pltpu


_LN_EPS = 1e-6  # LayerNorm2d eps in the reference NAFNet implementation.

# Per-NAFBlock parameter order (kernel unpacking and wrapper flattening agree).
_BLOCK_KEYS = (
    "n1_w", "n1_b",          # LayerNorm2d #1 (per-channel affine)
    "w1", "b1",              # 1x1 conv  c -> 2c
    "w2", "b2",              # 3x3 depthwise conv on 2c channels
    "sca_w", "sca_b",        # simplified channel attention 1x1 conv c -> c
    "w3", "b3",              # 1x1 conv  c -> c
    "beta",                  # residual scale #1
    "n2_w", "n2_b",          # LayerNorm2d #2
    "w4", "b4",              # 1x1 conv  c -> 2c (FFN expand)
    "w5", "b5",              # 1x1 conv  c -> c
    "gamma",                 # residual scale #2
)


# ----------------------------------------------------------------------------
# In-kernel helpers (all operate on (C, H*W) lane-dense f32 values)
# ----------------------------------------------------------------------------
def _tap(xflat, dy, dx, H, W, yy, xx):
    """shifted[c, y*W + x] = xflat[c, (y+dy)*W + (x+dx)], zero outside image.

    Lane roll of the flattened activation + boundary mask.  pltpu.roll follows
    jnp.roll semantics (out[i] = in[(i - shift) mod N]); for valid positions
    the flat index (y+dy)*W + (x+dx) never wraps, and invalid ones are masked.
    """
    HW = H * W
    d = dy * W + dx
    rolled = xflat if d == 0 else pltpu.roll(xflat, shift=(-d) % HW, axis=1)
    mask = None
    if dy > 0:
        mask = yy < (H - dy)
    elif dy < 0:
        mask = yy >= (-dy)
    if dx > 0:
        m = xx < (W - dx)
        mask = m if mask is None else (mask & m)
    elif dx < 0:
        m = xx >= (-dx)
        mask = m if mask is None else (mask & m)
    if mask is None:
        return rolled
    return jnp.where(mask, rolled, 0.0)


def _conv3x3(xflat, w9, b, H, W, yy, xx):
    """Full 3x3 conv, padding=1.  xflat (Cin,HW), w9 (9,Cout,Cin), b (Cout,1)."""
    cout = w9.shape[1]
    acc = jnp.zeros((cout, H * W), jnp.float32)
    for k in range(9):
        dy, dx = k // 3 - 1, k % 3 - 1
        acc = acc + jnp.dot(w9[k], _tap(xflat, dy, dx, H, W, yy, xx),
                            preferred_element_type=jnp.float32)
    return acc + b


def _dwconv3x3(xflat, wdw, b, H, W, yy, xx):
    """Depthwise 3x3 conv, padding=1.  xflat (C,HW), wdw (C,9), b (C,1)."""
    acc = jnp.zeros_like(xflat)
    for k in range(9):
        dy, dx = k // 3 - 1, k % 3 - 1
        acc = acc + wdw[:, k:k + 1] * _tap(xflat, dy, dx, H, W, yy, xx)
    return acc + b


def _conv1x1(xflat, w, b):
    """1x1 conv as a lane-dense MXU matmul: (Cout,Cin) @ (Cin,HW) + b."""
    return jnp.dot(w, xflat, preferred_element_type=jnp.float32) + b


def _layernorm_c(xflat, w, b):
    """NAFNet LayerNorm2d: normalize over channels at each spatial position."""
    mu = jnp.mean(xflat, axis=0, keepdims=True)
    xc = xflat - mu
    var = jnp.mean(xc * xc, axis=0, keepdims=True)
    return xc * jax.lax.rsqrt(var + _LN_EPS) * w + b


def _nafblock(inp, p, H, W, yy, xx):
    """NAFBlock forward on a (c, H*W) activation (dropout rate 0 -> identity)."""
    c = inp.shape[0]
    x = _layernorm_c(inp, p["n1_w"], p["n1_b"])
    x = _conv1x1(x, p["w1"], p["b1"])                       # (2c, HW)
    x = _dwconv3x3(x, p["w2"], p["b2"], H, W, yy, xx)       # (2c, HW)
    x = x[:c] * x[c:]                                       # SimpleGate -> (c, HW)
    # Simplified channel attention.  pool-then-1x1 == 1x1-then-pool (linear),
    # so keep the matmul lane-dense on (c, HW) and reduce over lanes after.
    att = jnp.mean(jnp.dot(p["sca_w"], x, preferred_element_type=jnp.float32),
                   axis=1, keepdims=True) + p["sca_b"]      # (c, 1)
    x = x * att
    x = _conv1x1(x, p["w3"], p["b3"])
    y = inp + x * p["beta"]
    x = _layernorm_c(y, p["n2_w"], p["n2_b"])
    x = _conv1x1(x, p["w4"], p["b4"])                       # (2c, HW)
    x = x[:c] * x[c:]                                       # SimpleGate
    x = _conv1x1(x, p["w5"], p["b5"])
    return y + x * p["gamma"]


def _nafnet_kernel(*refs, H, W, n_blocks):
    x_ref, coords_ref, *param_refs, o_ref = refs
    it = iter(param_refs)
    nxt = lambda: next(it)[...]  # noqa: E731  (weights are tiny; load once)

    intro_w, intro_b = nxt(), nxt()
    blocks = [{k: nxt() for k in _BLOCK_KEYS} for _ in range(n_blocks)]
    end_w, end_b = nxt(), nxt()

    coords = coords_ref[...]            # (2, HW) int32, rows = [row_idx, col_idx]
    yy = coords[0:1, :]
    xx = coords[1:2, :]

    x = x_ref[0].astype(jnp.float32)                        # (in_chan, HW)
    x = _conv3x3(x, intro_w, intro_b, H, W, yy, xx)         # intro
    for p in blocks:
        x = _nafblock(x, p, H, W, yy, xx)                   # middle NAFBlocks
    x = _conv3x3(x, end_w, end_b, H, W, yy, xx)             # ending
    o_ref[0] = x.astype(o_ref.dtype)


# ----------------------------------------------------------------------------
# Wrapper: weight re-layout + single pallas_call
# ----------------------------------------------------------------------------
def _to_tap_major(w):
    """(Cout, Cin, 3, 3) -> (9, Cout, Cin), tap index k = ky*3 + kx."""
    cout, cin = w.shape[0], w.shape[1]
    return jnp.transpose(w, (2, 3, 0, 1)).reshape(9, cout, cin)


def _col(v):
    return v.reshape(-1, 1)


def _block_kernel_layout(b):
    out = []
    for name in _BLOCK_KEYS:
        v = b[name]
        if name == "w2":                                   # (2c,1,3,3) -> (2c,9)
            out.append(v.reshape(v.shape[0], 9))
        elif name in ("w1", "sca_w", "w3", "w4", "w5"):    # 1x1 -> (Cout,Cin)
            out.append(v.reshape(v.shape[0], v.shape[1]))
        else:                                              # per-channel vectors
            out.append(_col(v))
    return out


def nafnet_forward(x_nchw, params):
    """NAFNet forward, default config (no encoder/decoder stages).

    x_nchw: (N, in_chan, H, W) float32, NCHW like the PyTorch module.
    params: dict {"intro_w","intro_b","blocks":[...],"end_w","end_b"} in
            PyTorch layouts (see init_nafnet).
    """
    N, cin, H, W = x_nchw.shape
    HW = H * W
    cout = params["end_w"].shape[0]
    n_blocks = len(params["blocks"])

    # TODO(synk): encoder/decoder stages of the full U-Net config (stride-2
    # down convs, 1x1-conv+PixelShuffle ups, skip adds, mod-size padding) are
    # not implemented; the module's default config (enc_blk_nums=[],
    # dec_blk_nums=[], padder_size=1) has none, so forward semantics match.

    # Channels on sublanes, flattened H*W on the 128-lane axis (lane-dense).
    x = x_nchw.reshape(N, cin, HW)

    # (2, HW) int32 [row, col] coordinates -- constant under jit; used for the
    # conv boundary masks inside the kernel (no in-kernel div/mod needed).
    ry, cx = jnp.meshgrid(jnp.arange(H, dtype=jnp.int32),
                          jnp.arange(W, dtype=jnp.int32), indexing="ij")
    coords = jnp.stack([ry.reshape(-1), cx.reshape(-1)], axis=0)

    flat = [_to_tap_major(params["intro_w"]), _col(params["intro_b"])]
    for b in params["blocks"]:
        flat += _block_kernel_layout(b)
    flat += [_to_tap_major(params["end_w"]), _col(params["end_b"])]

    in_specs = [
        pl.BlockSpec((1, cin, HW), lambda n: (n, 0, 0)),
        pl.BlockSpec((2, HW), lambda n: (0, 0)),
    ]
    for a in flat:
        # Full (tiny) weight blocks with constant index maps: DMA'd once and
        # VMEM-resident across all grid steps.
        in_specs.append(pl.BlockSpec(a.shape, lambda n, _r=a.ndim: (0,) * _r))

    kernel = functools.partial(_nafnet_kernel, H=H, W=W, n_blocks=n_blocks)
    out = pl.pallas_call(
        kernel,
        out_shape=jax.ShapeDtypeStruct((N, cout, HW), x_nchw.dtype),
        grid=(N,),  # batch axis is parallel -> >=2 blocks keeps both v7x TCs busy
        in_specs=in_specs,
        out_specs=pl.BlockSpec((1, cout, HW), lambda n: (n, 0, 0)),
        compiler_params=pltpu.CompilerParams(dimension_semantics=("parallel",)),
    )(x, coords, *flat)
    # TODO(synk): for large images, tile H*W spatially with a 1-pixel halo so
    # per-step blocks fit v7x's 64 MiB VMEM; whole-image blocks are fine here.
    return out.reshape(N, cout, H, W)


# ----------------------------------------------------------------------------
# Deterministic parameter init (PyTorch layouts)
# ----------------------------------------------------------------------------
def _conv_init(key, cout, cin, k):
    fan_in = cin * k * k
    kw, kb = jax.random.split(key)
    w = jax.random.normal(kw, (cout, cin, k, k), jnp.float32) * (2.0 / fan_in) ** 0.5
    b = 0.05 * jax.random.normal(kb, (cout,), jnp.float32)
    return w, b


def _init_nafblock(key, c):
    dw, ffn = 2 * c, 2 * c
    ks = jax.random.split(key, 8)
    w1, b1 = _conv_init(ks[0], dw, c, 1)
    w2, b2 = _conv_init(ks[1], dw, 1, 3)           # depthwise (groups = dw)
    sca_w, sca_b = _conv_init(ks[2], c, c, 1)      # on dw//2 == c channels
    w3, b3 = _conv_init(ks[3], c, c, 1)
    w4, b4 = _conv_init(ks[4], ffn, c, 1)
    w5, b5 = _conv_init(ks[5], c, c, 1)            # ffn//2 == c -> c
    ones, zeros = jnp.ones((c,), jnp.float32), jnp.zeros((c,), jnp.float32)
    # PyTorch initializes beta/gamma to zeros (block == identity at init);
    # small random values here so the whole datapath is exercised numerically.
    beta = 0.1 * jax.random.normal(ks[6], (c,), jnp.float32)
    gamma = 0.1 * jax.random.normal(ks[7], (c,), jnp.float32)
    return dict(n1_w=ones, n1_b=zeros, w1=w1, b1=b1, w2=w2, b2=b2,
                sca_w=sca_w, sca_b=sca_b, w3=w3, b3=b3, beta=beta,
                n2_w=ones, n2_b=zeros, w4=w4, b4=b4, w5=w5, b5=b5, gamma=gamma)


def init_nafnet(key, in_chan=3, out_chan=3, width=16, middle_blk_num=1):
    ks = jax.random.split(key, 2 + middle_blk_num)
    intro_w, intro_b = _conv_init(ks[0], width, in_chan, 3)
    end_w, end_b = _conv_init(ks[1], out_chan, width, 3)
    blocks = [_init_nafblock(ks[2 + i], width) for i in range(middle_blk_num)]
    return dict(intro_w=intro_w, intro_b=intro_b, blocks=blocks,
                end_w=end_w, end_b=end_b)


# ----------------------------------------------------------------------------
# Pure-JAX reference (mirrors the PyTorch module op-for-op) for self-checking
# ----------------------------------------------------------------------------
def _ref_conv(x, w, b, *, padding, groups=1):
    out = jax.lax.conv_general_dilated(
        x, w, window_strides=(1, 1), padding=padding,
        dimension_numbers=("NCHW", "OIHW", "NCHW"),
        feature_group_count=groups, precision=jax.lax.Precision.HIGHEST)
    return out + b[None, :, None, None]


def _ref_layernorm2d(x, w, b):
    mu = jnp.mean(x, axis=1, keepdims=True)
    var = jnp.mean((x - mu) ** 2, axis=1, keepdims=True)
    y = (x - mu) * jax.lax.rsqrt(var + _LN_EPS)
    return y * w[None, :, None, None] + b[None, :, None, None]


def _ref_nafblock(inp, p):
    c = inp.shape[1]
    x = _ref_layernorm2d(inp, p["n1_w"], p["n1_b"])
    x = _ref_conv(x, p["w1"], p["b1"], padding="VALID")
    x = _ref_conv(x, p["w2"], p["b2"], padding=((1, 1), (1, 1)), groups=2 * c)
    a, g = jnp.split(x, 2, axis=1)
    x = a * g                                              # SimpleGate
    pooled = jnp.mean(x, axis=(2, 3), keepdims=True)       # AdaptiveAvgPool2d(1)
    att = _ref_conv(pooled, p["sca_w"], p["sca_b"], padding="VALID")
    x = x * att
    x = _ref_conv(x, p["w3"], p["b3"], padding="VALID")
    y = inp + x * p["beta"][None, :, None, None]
    x = _ref_layernorm2d(y, p["n2_w"], p["n2_b"])
    x = _ref_conv(x, p["w4"], p["b4"], padding="VALID")
    a, g = jnp.split(x, 2, axis=1)
    x = a * g
    x = _ref_conv(x, p["w5"], p["b5"], padding="VALID")
    return y + x * p["gamma"][None, :, None, None]


def ref_nafnet_forward(x, params):
    h = _ref_conv(x, params["intro_w"], params["intro_b"], padding=((1, 1), (1, 1)))
    for b in params["blocks"]:
        h = _ref_nafblock(h, b)
    return _ref_conv(h, params["end_w"], params["end_b"], padding=((1, 1), (1, 1)))


if __name__ == "__main__":
    key = jax.random.PRNGKey(0)
    kx, kp = jax.random.split(key)

    N, H, W = 2, 16, 16
    in_chan, out_chan, width, middle_blk_num = 3, 3, 16, 1

    x = jax.random.normal(kx, (N, in_chan, H, W), jnp.float32)   # NCHW
    params = init_nafnet(kp, in_chan, out_chan, width, middle_blk_num)

    fwd = jax.jit(nafnet_forward)
    out = fwd(x, params)
    jax.block_until_ready(out)

    assert out.shape == (N, out_chan, H, W), out.shape
    assert out.dtype == jnp.float32
    assert bool(jnp.all(jnp.isfinite(out)))

    # Cross-check against the pure-JAX reference.  Tolerance is loose enough
    # for MXU/XLA precision-mode differences, tight enough to catch any
    # layout / roll-shift / boundary-mask error (those give O(1) mismatches).
    ref = ref_nafnet_forward(x, params)
    np.testing.assert_allclose(np.asarray(out), np.asarray(ref),
                               rtol=2e-2, atol=2e-2)

    print("KERNEL_OK")
</pallas_src>

<mosaic_0001>
module attributes {stable_mosaic.version = 11 : i64} {
  func.func @_nafnet_kernel(%arg0: i32, %arg1: memref<1x3x256xf32, #tpu.memory_space<vmem>>, %arg2: memref<2x256xi32, #tpu.memory_space<vmem>>, %arg3: memref<9x16x3xf32, #tpu.memory_space<vmem>>, %arg4: memref<16x1xf32, #tpu.memory_space<vmem>>, %arg5: memref<16x1xf32, #tpu.memory_space<vmem>>, %arg6: memref<16x1xf32, #tpu.memory_space<vmem>>, %arg7: memref<32x16xf32, #tpu.memory_space<vmem>>, %arg8: memref<32x1xf32, #tpu.memory_space<vmem>>, %arg9: memref<32x9xf32, #tpu.memory_space<vmem>>, %arg10: memref<32x1xf32, #tpu.memory_space<vmem>>, %arg11: memref<16x16xf32, #tpu.memory_space<vmem>>, %arg12: memref<16x1xf32, #tpu.memory_space<vmem>>, %arg13: memref<16x16xf32, #tpu.memory_space<vmem>>, %arg14: memref<16x1xf32, #tpu.memory_space<vmem>>, %arg15: memref<16x1xf32, #tpu.memory_space<vmem>>, %arg16: memref<16x1xf32, #tpu.memory_space<vmem>>, %arg17: memref<16x1xf32, #tpu.memory_space<vmem>>, %arg18: memref<32x16xf32, #tpu.memory_space<vmem>>, %arg19: memref<32x1xf32, #tpu.memory_space<vmem>>, %arg20: memref<16x16xf32, #tpu.memory_space<vmem>>, %arg21: memref<16x1xf32, #tpu.memory_space<vmem>>, %arg22: memref<16x1xf32, #tpu.memory_space<vmem>>, %arg23: memref<9x3x16xf32, #tpu.memory_space<vmem>>, %arg24: memref<3x1xf32, #tpu.memory_space<vmem>>, %arg25: memref<1x3x256xf32, #tpu.memory_space<vmem>>) attributes {dimension_semantics = [#tpu.dimension_semantics<parallel>], iteration_bounds = array<i64: 2>, scalar_prefetch = 0 : i64, scratch_operands = 0 : i64, tpu.core_type = #tpu.core_type<tc>, window_params = [{transform_indices = @transform_0, window_bounds = array<i64: 1, 3, 256>}, {pipeline_mode = #tpu.pipeline_mode<synchronous>, transform_indices = @transform_1, window_bounds = array<i64: 2, 256>}, {pipeline_mode = #tpu.pipeline_mode<synchronous>, transform_indices = @transform_2, window_bounds = array<i64: 9, 16, 3>}, {pipeline_mode = #tpu.pipeline_mode<synchronous>, transform_indices = @transform_3, window_bounds = array<i64: 16, 1>}, {pipeline_mode = #tpu.pipeline_mode<synchronous>, transform_indices = @transform_4, window_bounds = array<i64: 16, 1>}, {pipeline_mode = #tpu.pipeline_mode<synchronous>, transform_indices = @transform_5, window_bounds = array<i64: 16, 1>}, {pipeline_mode = #tpu.pipeline_mode<synchronous>, transform_indices = @transform_6, window_bounds = array<i64: 32, 16>}, {pipeline_mode = #tpu.pipeline_mode<synchronous>, transform_indices = @transform_7, window_bounds = array<i64: 32, 1>}, {pipeline_mode = #tpu.pipeline_mode<synchronous>, transform_indices = @transform_8, window_bounds = array<i64: 32, 9>}, {pipeline_mode = #tpu.pipeline_mode<synchronous>, transform_indices = @transform_9, window_bounds = array<i64: 32, 1>}, {pipeline_mode = #tpu.pipeline_mode<synchronous>, transform_indices = @transform_10, window_bounds = array<i64: 16, 16>}, {pipeline_mode = #tpu.pipeline_mode<synchronous>, transform_indices = @transform_11, window_bounds = array<i64: 16, 1>}, {pipeline_mode = #tpu.pipeline_mode<synchronous>, transform_indices = @transform_12, window_bounds = array<i64: 16, 16>}, {pipeline_mode = #tpu.pipeline_mode<synchronous>, transform_indices = @transform_13, window_bounds = array<i64: 16, 1>}, {pipeline_mode = #tpu.pipeline_mode<synchronous>, transform_indices = @transform_14, window_bounds = array<i64: 16, 1>}, {pipeline_mode = #tpu.pipeline_mode<synchronous>, transform_indices = @transform_15, window_bounds = array<i64: 16, 1>}, {pipeline_mode = #tpu.pipeline_mode<synchronous>, transform_indices = @transform_16, window_bounds = array<i64: 16, 1>}, {pipeline_mode = #tpu.pipeline_mode<synchronous>, transform_indices = @transform_17, window_bounds = array<i64: 32, 16>}, {pipeline_mode = #tpu.pipeline_mode<synchronous>, transform_indices = @transform_18, window_bounds = array<i64: 32, 1>}, {pipeline_mode = #tpu.pipeline_mode<synchronous>, transform_indices = @transform_19, window_bounds = array<i64: 16, 16>}, {pipeline_mode = #tpu.pipeline_mode<synchronous>, transform_indices = @transform_20, window_bounds = array<i64: 16, 1>}, {pipeline_mode = #tpu.pipeline_mode<synchronous>, transform_indices = @transform_21, window_bounds = array<i64: 16, 1>}, {pipeline_mode = #tpu.pipeline_mode<synchronous>, transform_indices = @transform_22, window_bounds = array<i64: 9, 3, 16>}, {pipeline_mode = #tpu.pipeline_mode<synchronous>, transform_indices = @transform_23, window_bounds = array<i64: 3, 1>}, {transform_indices = @transform_24, window_bounds = array<i64: 1, 3, 256>}]} {
    %c0 = arith.constant 0 : index
    %c0_0 = arith.constant 0 : index
    %c0_1 = arith.constant 0 : index
    %0 = vector.load %arg3[%c0, %c0_0, %c0_1] : memref<9x16x3xf32, #tpu.memory_space<vmem>>, vector<9x16x3xf32>
    %c0_2 = arith.constant 0 : index
    %c0_3 = arith.constant 0 : index
    %1 = vector.load %arg4[%c0_2, %c0_3] : memref<16x1xf32, #tpu.memory_space<vmem>>, vector<16x1xf32>
    %c0_4 = arith.constant 0 : index
    %c0_5 = arith.constant 0 : index
    %2 = vector.load %arg5[%c0_4, %c0_5] : memref<16x1xf32, #tpu.memory_space<vmem>>, vector<16x1xf32>
    %c0_6 = arith.constant 0 : index
    %c0_7 = arith.constant 0 : index
    %3 = vector.load %arg6[%c0_6, %c0_7] : memref<16x1xf32, #tpu.memory_space<vmem>>, vector<16x1xf32>
    %c0_8 = arith.constant 0 : index
    %c0_9 = arith.constant 0 : index
    %4 = vector.load %arg7[%c0_8, %c0_9] : memref<32x16xf32, #tpu.memory_space<vmem>>, vector<32x16xf32>
    %c0_10 = arith.constant 0 : index
    %c0_11 = arith.constant 0 : index
    %5 = vector.load %arg8[%c0_10, %c0_11] : memref<32x1xf32, #tpu.memory_space<vmem>>, vector<32x1xf32>
    %c0_12 = arith.constant 0 : index
    %c0_13 = arith.constant 0 : index
    %6 = vector.load %arg9[%c0_12, %c0_13] : memref<32x9xf32, #tpu.memory_space<vmem>>, vector<32x9xf32>
    %c0_14 = arith.constant 0 : index
    %c0_15 = arith.constant 0 : index
    %7 = vector.load %arg10[%c0_14, %c0_15] : memref<32x1xf32, #tpu.memory_space<vmem>>, vector<32x1xf32>
    %c0_16 = arith.constant 0 : index
    %c0_17 = arith.constant 0 : index
    %8 = vector.load %arg11[%c0_16, %c0_17] : memref<16x16xf32, #tpu.memory_space<vmem>>, vector<16x16xf32>
    %c0_18 = arith.constant 0 : index
    %c0_19 = arith.constant 0 : index
    %9 = vector.load %arg12[%c0_18, %c0_19] : memref<16x1xf32, #tpu.memory_space<vmem>>, vector<16x1xf32>
    %c0_20 = arith.constant 0 : index
    %c0_21 = arith.constant 0 : index
    %10 = vector.load %arg13[%c0_20, %c0_21] : memref<16x16xf32, #tpu.memory_space<vmem>>, vector<16x16xf32>
    %c0_22 = arith.constant 0 : index
    %c0_23 = arith.constant 0 : index
    %11 = vector.load %arg14[%c0_22, %c0_23] : memref<16x1xf32, #tpu.memory_space<vmem>>, vector<16x1xf32>
    %c0_24 = arith.constant 0 : index
    %c0_25 = arith.constant 0 : index
    %12 = vector.load %arg15[%c0_24, %c0_25] : memref<16x1xf32, #tpu.memory_space<vmem>>, vector<16x1xf32>
    %c0_26 = arith.constant 0 : index
    %c0_27 = arith.constant 0 : index
    %13 = vector.load %arg16[%c0_26, %c0_27] : memref<16x1xf32, #tpu.memory_space<vmem>>, vector<16x1xf32>
    %c0_28 = arith.constant 0 : index
    %c0_29 = arith.constant 0 : index
    %14 = vector.load %arg17[%c0_28, %c0_29] : memref<16x1xf32, #tpu.memory_space<vmem>>, vector<16x1xf32>
    %c0_30 = arith.constant 0 : index
    %c0_31 = arith.constant 0 : index
    %15 = vector.load %arg18[%c0_30, %c0_31] : memref<32x16xf32, #tpu.memory_space<vmem>>, vector<32x16xf32>
    %c0_32 = arith.constant 0 : index
    %c0_33 = arith.constant 0 : index
    %16 = vector.load %arg19[%c0_32, %c0_33] : memref<32x1xf32, #tpu.memory_space<vmem>>, vector<32x1xf32>
    %c0_34 = arith.constant 0 : index
    %c0_35 = arith.constant 0 : index
    %17 = vector.load %arg20[%c0_34, %c0_35] : memref<16x16xf32, #tpu.memory_space<vmem>>, vector<16x16xf32>
    %c0_36 = arith.constant 0 : index
    %c0_37 = arith.constant 0 : index
    %18 = vector.load %arg21[%c0_36, %c0_37] : memref<16x1xf32, #tpu.memory_space<vmem>>, vector<16x1xf32>
    %c0_38 = arith.constant 0 : index
    %c0_39 = arith.constant 0 : index
    %19 = vector.load %arg22[%c0_38, %c0_39] : memref<16x1xf32, #tpu.memory_space<vmem>>, vector<16x1xf32>
    %c0_40 = arith.constant 0 : index
    %c0_41 = arith.constant 0 : index
    %c0_42 = arith.constant 0 : index
    %20 = vector.load %arg23[%c0_40, %c0_41, %c0_42] : memref<9x3x16xf32, #tpu.memory_space<vmem>>, vector<9x3x16xf32>
    %c0_43 = arith.constant 0 : index
    %c0_44 = arith.constant 0 : index
    %21 = vector.load %arg24[%c0_43, %c0_44] : memref<3x1xf32, #tpu.memory_space<vmem>>, vector<3x1xf32>
    %c0_45 = arith.constant 0 : index
    %c0_46 = arith.constant 0 : index
    %22 = vector.load %arg2[%c0_45, %c0_46] : memref<2x256xi32, #tpu.memory_space<vmem>>, vector<2x256xi32>
    %23 = vector.extract_strided_slice %22 {offsets = [0, 0], sizes = [1, 256], strides = [1, 1]} : vector<2x256xi32> to vector<1x256xi32>
    %24 = vector.extract_strided_slice %22 {offsets = [1, 0], sizes = [1, 256], strides = [1, 1]} : vector<2x256xi32> to vector<1x256xi32>
    %c0_47 = arith.constant 0 : index
    %c0_48 = arith.constant 0 : index
    %c0_49 = arith.constant 0 : index
    %25 = vector.load %arg1[%c0_47, %c0_48, %c0_49] : memref<1x3x256xf32, #tpu.memory_space<vmem>>, vector<1x3x256xf32>
    %26 = vector.shape_cast %25 : vector<1x3x256xf32> to vector<3x256xf32>
    %cst = arith.constant 0.000000e+00 : f32
    %27 = vector.broadcast %cst : f32 to vector<16x256xf32>
    %28 = vector.extract_strided_slice %0 {offsets = [0, 0, 0], sizes = [1, 16, 3], strides = [1, 1, 1]} : vector<9x16x3xf32> to vector<1x16x3xf32>
    %29 = vector.shape_cast %28 : vector<1x16x3xf32> to vector<16x3xf32>
    %c17_i32 = arith.constant 17 : i32
    %30 = tpu.dynamic_rotate %26 by %c17_i32 dim 1 : vector<3x256xf32>, i32 -> vector<3x256xf32>
    %c1_i32 = arith.constant 1 : i32
    %31 = vector.broadcast %c1_i32 : i32 to vector<1x256xi32>
    %32 = arith.cmpi sge, %23, %31 : vector<1x256xi32>
    %c1_i32_50 = arith.constant 1 : i32
    %33 = vector.broadcast %c1_i32_50 : i32 to vector<1x256xi32>
    %34 = arith.cmpi sge, %24, %33 : vector<1x256xi32>
    %35 = arith.andi %32, %34 : vector<1x256xi1>
    %cst_51 = arith.constant 0.000000e+00 : f32
    %36 = vector.shape_cast %35 : vector<1x256xi1> to vector<1x256xi1>
    %37 = vector.broadcast %36 : vector<1x256xi1> to vector<3x256xi1>
    %38 = vector.broadcast %cst_51 : f32 to vector<3x256xf32>
    %39 = arith.select %37, %30, %38 : vector<3x256xi1>, vector<3x256xf32>
    %cst_52 = arith.constant dense<0.000000e+00> : vector<16x256xf32>
    %40 = tpu.matmul %29, %39, %cst_52 {dimension_numbers = #tpu.dot_dimension_numbers<[1], [0], [0], [1], [0, 0, 1, 1], [], []>} : vector<16x3xf32>, vector<3x256xf32>, vector<16x256xf32> -> vector<16x256xf32>
    %41 = arith.addf %27, %40 : vector<16x256xf32>
    %42 = vector.extract_strided_slice %0 {offsets = [1, 0, 0], sizes = [1, 16, 3], strides = [1, 1, 1]} : vector<9x16x3xf32> to vector<1x16x3xf32>
    %43 = vector.shape_cast %42 : vector<1x16x3xf32> to vector<16x3xf32>
    %c16_i32 = arith.constant 16 : i32
    %44 = tpu.dynamic_rotate %26 by %c16_i32 dim 1 : vector<3x256xf32>, i32 -> vector<3x256xf32>
    %c1_i32_53 = arith.constant 1 : i32
    %45 = vector.broadcast %c1_i32_53 : i32 to vector<1x256xi32>
    %46 = arith.cmpi sge, %23, %45 : vector<1x256xi32>
    %cst_54 = arith.constant 0.000000e+00 : f32
    %47 = vector.shape_cast %46 : vector<1x256xi1> to vector<1x256xi1>
    %48 = vector.broadcast %47 : vector<1x256xi1> to vector<3x256xi1>
    %49 = vector.broadcast %cst_54 : f32 to vector<3x256xf32>
    %50 = arith.select %48, %44, %49 : vector<3x256xi1>, vector<3x256xf32>
    %cst_55 = arith.constant dense<0.000000e+00> : vector<16x256xf32>
    %51 = tpu.matmul %43, %50, %cst_55 {dimension_numbers = #tpu.dot_dimension_numbers<[1], [0], [0], [1], [0, 0, 1, 1], [], []>} : vector<16x3xf32>, vector<3x256xf32>, vector<16x256xf32> -> vector<16x256xf32>
    %52 = arith.addf %41, %51 : vector<16x256xf32>
    %53 = vector.extract_strided_slice %0 {offsets = [2, 0, 0], sizes = [1, 16, 3], strides = [1, 1, 1]} : vector<9x16x3xf32> to vector<1x16x3xf32>
    %54 = vector.shape_cast %53 : vector<1x16x3xf32> to vector<16x3xf32>
    %c15_i32 = arith.constant 15 : i32
    %55 = tpu.dynamic_rotate %26 by %c15_i32 dim 1 : vector<3x256xf32>, i32 -> vector<3x256xf32>
    %c1_i32_56 = arith.constant 1 : i32
    %56 = vector.broadcast %c1_i32_56 : i32 to vector<1x256xi32>
    %57 = arith.cmpi sge, %23, %56 : vector<1x256xi32>
    %c15_i32_57 = arith.constant 15 : i32
    %58 = vector.broadcast %c15_i32_57 : i32 to vector<1x256xi32>
    %59 = arith.cmpi slt, %24, %58 : vector<1x256xi32>
    %60 = arith.andi %57, %59 : vector<1x256xi1>
    %cst_58 = arith.constant 0.000000e+00 : f32
    %61 = vector.shape_cast %60 : vector<1x256xi1> to vector<1x256xi1>
    %62 = vector.broadcast %61 : vector<1x256xi1> to vector<3x256xi1>
    %63 = vector.broadcast %cst_58 : f32 to vector<3x256xf32>
    %64 = arith.select %62, %55, %63 : vector<3x256xi1>, vector<3x256xf32>
    %cst_59 = arith.constant dense<0.000000e+00> : vector<16x256xf32>
    %65 = tpu.matmul %54, %64, %cst_59 {dimension_numbers = #tpu.dot_dimension_numbers<[1], [0], [0], [1], [0, 0, 1, 1], [], []>} : vector<16x3xf32>, vector<3x256xf32>, vector<16x256xf32> -> vector<16x256xf32>
    %66 = arith.addf %52, %65 : vector<16x256xf32>
    %67 = vector.extract_strided_slice %0 {offsets = [3, 0, 0], sizes = [1, 16, 3], strides = [1, 1, 1]} : vector<9x16x3xf32> to vector<1x16x3xf32>
    %68 = vector.shape_cast %67 : vector<1x16x3xf32> to vector<16x3xf32>
    %c1_i32_60 = arith.constant 1 : i32
    %69 = tpu.dynamic_rotate %26 by %c1_i32_60 dim 1 : vector<3x256xf32>, i32 -> vector<3x256xf32>
    %c1_i32_61 = arith.constant 1 : i32
    %70 = vector.broadcast %c1_i32_61 : i32 to vector<1x256xi32>
    %71 = arith.cmpi sge, %24, %70 : vector<1x256xi32>
    %cst_62 = arith.constant 0.000000e+00 : f32
    %72 = vector.shape_cast %71 : vector<1x256xi1> to vector<1x256xi1>
    %73 = vector.broadcast %72 : vector<1x256xi1> to vector<3x256xi1>
    %74 = vector.broadcast %cst_62 : f32 to vector<3x256xf32>
    %75 = arith.select %73, %69, %74 : vector<3x256xi1>, vector<3x256xf32>
    %cst_63 = arith.constant dense<0.000000e+00> : vector<16x256xf32>
    %76 = tpu.matmul %68, %75, %cst_63 {dimension_numbers = #tpu.dot_dimension_numbers<[1], [0], [0], [1], [0, 0, 1, 1], [], []>} : vector<16x3xf32>, vector<3x256xf32>, vector<16x256xf32> -> vector<16x256xf32>
    %77 = arith.addf %66, %76 : vector<16x256xf32>
    %78 = vector.extract_strided_slice %0 {offsets = [4, 0, 0], sizes = [1, 16, 3], strides = [1, 1, 1]} : vector<9x16x3xf32> to vector<1x16x3xf32>
    %79 = vector.shape_cast %78 : vector<1x16x3xf32> to vector<16x3xf32>
    %cst_64 = arith.constant dense<0.000000e+00> : vector<16x256xf32>
    %80 = tpu.matmul %79, %26, %cst_64 {dimension_numbers = #tpu.dot_dimension_numbers<[1], [0], [0], [1], [0, 0, 1, 1], [], []>} : vector<16x3xf32>, vector<3x256xf32>, vector<16x256xf32> -> vector<16x256xf32>
    %81 = arith.addf %77, %80 : vector<16x256xf32>
    %82 = vector.extract_strided_slice %0 {offsets = [5, 0, 0], sizes = [1, 16, 3], strides = [1, 1, 1]} : vector<9x16x3xf32> to vector<1x16x3xf32>
    %83 = vector.shape_cast %82 : vector<1x16x3xf32> to vector<16x3xf32>
    %c255_i32 = arith.constant 255 : i32
    %84 = tpu.dynamic_rotate %26 by %c255_i32 dim 1 : vector<3x256xf32>, i32 -> vector<3x256xf32>
    %c15_i32_65 = arith.constant 15 : i32
    %85 = vector.broadcast %c15_i32_65 : i32 to vector<1x256xi32>
    %86 = arith.cmpi slt, %24, %85 : vector<1x256xi32>
    %cst_66 = arith.constant 0.000000e+00 : f32
    %87 = vector.shape_cast %86 : vector<1x256xi1> to vector<1x256xi1>
    %88 = vector.broadcast %87 : vector<1x256xi1> to vector<3x256xi1>
    %89 = vector.broadcast %cst_66 : f32 to vector<3x256xf32>
    %90 = arith.select %88, %84, %89 : vector<3x256xi1>, vector<3x256xf32>
    %cst_67 = arith.constant dense<0.000000e+00> : vector<16x256xf32>
    %91 = tpu.matmul %83, %90, %cst_67 {dimension_numbers = #tpu.dot_dimension_numbers<[1], [0], [0], [1], [0, 0, 1, 1], [], []>} : vector<16x3xf32>, vector<3x256xf32>, vector<16x256xf32> -> vector<16x256xf32>
    %92 = arith.addf %81, %91 : vector<16x256xf32>
    %93 = vector.extract_strided_slice %0 {offsets = [6, 0, 0], sizes = [1, 16, 3], strides = [1, 1, 1]} : vector<9x16x3xf32> to vector<1x16x3xf32>
    %94 = vector.shape_cast %93 : vector<1x16x3xf32> to vector<16x3xf32>
    %c241_i32 = arith.constant 241 : i32
    %95 = tpu.dynamic_rotate %26 by %c241_i32 dim 1 : vector<3x256xf32>, i32 -> vector<3x256xf32>
    %c15_i32_68 = arith.constant 15 : i32
    %96 = vector.broadcast %c15_i32_68 : i32 to vector<1x256xi32>
    %97 = arith.cmpi slt, %23, %96 : vector<1x256xi32>
    %c1_i32_69 = arith.constant 1 : i32
    %98 = vector.broadcast %c1_i32_69 : i32 to vector<1x256xi32>
    %99 = arith.cmpi sge, %24, %98 : vector<1x256xi32>
    %100 = arith.andi %97, %99 : vector<1x256xi1>
    %cst_70 = arith.constant 0.000000e+00 : f32
    %101 = vector.shape_cast %100 : vector<1x256xi1> to vector<1x256xi1>
    %102 = vector.broadcast %101 : vector<1x256xi1> to vector<3x256xi1>
    %103 = vector.broadcast %cst_70 : f32 to vector<3x256xf32>
    %104 = arith.select %102, %95, %103 : vector<3x256xi1>, vector<3x256xf32>
    %cst_71 = arith.constant dense<0.000000e+00> : vector<16x256xf32>
    %105 = tpu.matmul %94, %104, %cst_71 {dimension_numbers = #tpu.dot_dimension_numbers<[1], [0], [0], [1], [0, 0, 1, 1], [], []>} : vector<16x3xf32>, vector<3x256xf32>, vector<16x256xf32> -> vector<16x256xf32>
    %106 = arith.addf %92, %105 : vector<16x256xf32>
    %107 = vector.extract_strided_slice %0 {offsets = [7, 0, 0], sizes = [1, 16, 3], strides = [1, 1, 1]} : vector<9x16x3xf32> to vector<1x16x3xf32>
    %108 = vector.shape_cast %107 : vector<1x16x3xf32> to vector<16x3xf32>
    %c240_i32 = arith.constant 240 : i32
    %109 = tpu.dynamic_rotate %26 by %c240_i32 dim 1 : vector<3x256xf32>, i32 -> vector<3x256xf32>
    %c15_i32_72 = arith.constant 15 : i32
    %110 = vector.broadcast %c15_i32_72 : i32 to vector<1x256xi32>
    %111 = arith.cmpi slt, %23, %110 : vector<1x256xi32>
    %cst_73 = arith.constant 0.000000e+00 : f32
    %112 = vector.shape_cast %111 : vector<1x256xi1> to vector<1x256xi1>
    %113 = vector.broadcast %112 : vector<1x256xi1> to vector<3x256xi1>
    %114 = vector.broadcast %cst_73 : f32 to vector<3x256xf32>
    %115 = arith.select %113, %109, %114 : vector<3x256xi1>, vector<3x256xf32>
    %cst_74 = arith.constant dense<0.000000e+00> : vector<16x256xf32>
    %116 = tpu.matmul %108, %115, %cst_74 {dimension_numbers = #tpu.dot_dimension_numbers<[1], [0], [0], [1], [0, 0, 1, 1], [], []>} : vector<16x3xf32>, vector<3x256xf32>, vector<16x256xf32> -> vector<16x256xf32>
    %117 = arith.addf %106, %116 : vector<16x256xf32>
    %118 = vector.extract_strided_slice %0 {offsets = [8, 0, 0], sizes = [1, 16, 3], strides = [1, 1, 1]} : vector<9x16x3xf32> to vector<1x16x3xf32>
    %119 = vector.shape_cast %118 : vector<1x16x3xf32> to vector<16x3xf32>
    %c239_i32 = arith.constant 239 : i32
    %120 = tpu.dynamic_rotate %26 by %c239_i32 dim 1 : vector<3x256xf32>, i32 -> vector<3x256xf32>
    %c15_i32_75 = arith.constant 15 : i32
    %121 = vector.broadcast %c15_i32_75 : i32 to vector<1x256xi32>
    %122 = arith.cmpi slt, %23, %121 : vector<1x256xi32>
    %c15_i32_76 = arith.constant 15 : i32
    %123 = vector.broadcast %c15_i32_76 : i32 to vector<1x256xi32>
    %124 = arith.cmpi slt, %24, %123 : vector<1x256xi32>
    %125 = arith.andi %122, %124 : vector<1x256xi1>
    %cst_77 = arith.constant 0.000000e+00 : f32
    %126 = vector.shape_cast %125 : vector<1x256xi1> to vector<1x256xi1>
    %127 = vector.broadcast %126 : vector<1x256xi1> to vector<3x256xi1>
    %128 = vector.broadcast %cst_77 : f32 to vector<3x256xf32>
    %129 = arith.select %127, %120, %128 : vector<3x256xi1>, vector<3x256xf32>
    %cst_78 = arith.constant dense<0.000000e+00> : vector<16x256xf32>
    %130 = tpu.matmul %119, %129, %cst_78 {dimension_numbers = #tpu.dot_dimension_numbers<[1], [0], [0], [1], [0, 0, 1, 1], [], []>} : vector<16x3xf32>, vector<3x256xf32>, vector<16x256xf32> -> vector<16x256xf32>
    %131 = arith.addf %117, %130 : vector<16x256xf32>
    %132 = vector.broadcast %1 : vector<16x1xf32> to vector<16x256xf32>
    %133 = arith.addf %131, %132 : vector<16x256xf32>
    %cst_79 = arith.constant dense<0.000000e+00> : vector<256xf32>
    %134 = vector.multi_reduction <add>, %133, %cst_79 [0] : vector<16x256xf32> to vector<256xf32>
    %135 = vector.shape_cast %134 : vector<256xf32> to vector<1x256xf32>
    %cst_80 = arith.constant 1.600000e+01 : f32
    %136 = vector.broadcast %cst_80 : f32 to vector<1x256xf32>
    %137 = arith.divf %135, %136 : vector<1x256xf32>
    %138 = vector.broadcast %137 : vector<1x256xf32> to vector<16x256xf32>
    %139 = arith.subf %133, %138 : vector<16x256xf32>
    %140 = arith.mulf %139, %139 : vector<16x256xf32>
    %cst_81 = arith.constant dense<0.000000e+00> : vector<256xf32>
    %141 = vector.multi_reduction <add>, %140, %cst_81 [0] : vector<16x256xf32> to vector<256xf32>
    %142 = vector.shape_cast %141 : vector<256xf32> to vector<1x256xf32>
    %cst_82 = arith.constant 1.600000e+01 : f32
    %143 = vector.broadcast %cst_82 : f32 to vector<1x256xf32>
    %144 = arith.divf %142, %143 : vector<1x256xf32>
    %cst_83 = arith.constant 9.99999997E-7 : f32
    %145 = vector.broadcast %cst_83 : f32 to vector<1x256xf32>
    %146 = arith.addf %144, %145 : vector<1x256xf32>
    %147 = math.rsqrt %146 : vector<1x256xf32>
    %148 = vector.broadcast %147 : vector<1x256xf32> to vector<16x256xf32>
    %149 = arith.mulf %139, %148 : vector<16x256xf32>
    %150 = vector.broadcast %2 : vector<16x1xf32> to vector<16x256xf32>
    %151 = arith.mulf %149, %150 : vector<16x256xf32>
    %152 = vector.broadcast %3 : vector<16x1xf32> to vector<16x256xf32>
    %153 = arith.addf %151, %152 : vector<16x256xf32>
    %cst_84 = arith.constant dense<0.000000e+00> : vector<32x256xf32>
    %154 = tpu.matmul %4, %153, %cst_84 {dimension_numbers = #tpu.dot_dimension_numbers<[1], [0], [0], [1], [0, 0, 1, 1], [], []>} : vector<32x16xf32>, vector<16x256xf32>, vector<32x256xf32> -> vector<32x256xf32>
    %155 = vector.broadcast %5 : vector<32x1xf32> to vector<32x256xf32>
    %156 = arith.addf %154, %155 : vector<32x256xf32>
    %cst_85 = arith.constant 0.000000e+00 : f32
    %157 = vector.broadcast %cst_85 : f32 to vector<32x256xf32>
    %158 = vector.extract_strided_slice %6 {offsets = [0, 0], sizes = [32, 1], strides = [1, 1]} : vector<32x9xf32> to vector<32x1xf32>
    %c17_i32_86 = arith.constant 17 : i32
    %159 = tpu.dynamic_rotate %156 by %c17_i32_86 dim 1 : vector<32x256xf32>, i32 -> vector<32x256xf32>
    %c1_i32_87 = arith.constant 1 : i32
    %160 = vector.broadcast %c1_i32_87 : i32 to vector<1x256xi32>
    %161 = arith.cmpi sge, %23, %160 : vector<1x256xi32>
    %c1_i32_88 = arith.constant 1 : i32
    %162 = vector.broadcast %c1_i32_88 : i32 to vector<1x256xi32>
    %163 = arith.cmpi sge, %24, %162 : vector<1x256xi32>
    %164 = arith.andi %161, %163 : vector<1x256xi1>
    %cst_89 = arith.constant 0.000000e+00 : f32
    %165 = vector.shape_cast %164 : vector<1x256xi1> to vector<1x256xi1>
    %166 = vector.broadcast %165 : vector<1x256xi1> to vector<32x256xi1>
    %167 = vector.broadcast %cst_89 : f32 to vector<32x256xf32>
    %168 = arith.select %166, %159, %167 : vector<32x256xi1>, vector<32x256xf32>
    %169 = vector.broadcast %158 : vector<32x1xf32> to vector<32x256xf32>
    %170 = arith.mulf %169, %168 : vector<32x256xf32>
    %171 = arith.addf %157, %170 : vector<32x256xf32>
    %172 = vector.extract_strided_slice %6 {offsets = [0, 1], sizes = [32, 1], strides = [1, 1]} : vector<32x9xf32> to vector<32x1xf32>
    %c16_i32_90 = arith.constant 16 : i32
    %173 = tpu.dynamic_rotate %156 by %c16_i32_90 dim 1 : vector<32x256xf32>, i32 -> vector<32x256xf32>
    %c1_i32_91 = arith.constant 1 : i32
    %174 = vector.broadcast %c1_i32_91 : i32 to vector<1x256xi32>
    %175 = arith.cmpi sge, %23, %174 : vector<1x256xi32>
    %cst_92 = arith.constant 0.000000e+00 : f32
    %176 = vector.shape_cast %175 : vector<1x256xi1> to vector<1x256xi1>
    %177 = vector.broadcast %176 : vector<1x256xi1> to vector<32x256xi1>
    %178 = vector.broadcast %cst_92 : f32 to vector<32x256xf32>
    %179 = arith.select %177, %173, %178 : vector<32x256xi1>, vector<32x256xf32>
    %180 = vector.broadcast %172 : vector<32x1xf32> to vector<32x256xf32>
    %181 = arith.mulf %180, %179 : vector<32x256xf32>
    %182 = arith.addf %171, %181 : vector<32x256xf32>
    %183 = vector.extract_strided_slice %6 {offsets = [0, 2], sizes = [32, 1], strides = [1, 1]} : vector<32x9xf32> to vector<32x1xf32>
    %c15_i32_93 = arith.constant 15 : i32
    %184 = tpu.dynamic_rotate %156 by %c15_i32_93 dim 1 : vector<32x256xf32>, i32 -> vector<32x256xf32>
    %c1_i32_94 = arith.constant 1 : i32
    %185 = vector.broadcast %c1_i32_94 : i32 to vector<1x256xi32>
    %186 = arith.cmpi sge, %23, %185 : vector<1x256xi32>
    %c15_i32_95 = arith.constant 15 : i32
    %187 = vector.broadcast %c15_i32_95 : i32 to vector<1x256xi32>
    %188 = arith.cmpi slt, %24, %187 : vector<1x256xi32>
    %189 = arith.andi %186, %188 : vector<1x256xi1>
    %cst_96 = arith.constant 0.000000e+00 : f32
    %190 = vector.shape_cast %189 : vector<1x256xi1> to vector<1x256xi1>
    %191 = vector.broadcast %190 : vector<1x256xi1> to vector<32x256xi1>
    %192 = vector.broadcast %cst_96 : f32 to vector<32x256xf32>
    %193 = arith.select %191, %184, %192 : vector<32x256xi1>, vector<32x256xf32>
    %194 = vector.broadcast %183 : vector<32x1xf32> to vector<32x256xf32>
    %195 = arith.mulf %194, %193 : vector<32x256xf32>
    %196 = arith.addf %182, %195 : vector<32x256xf32>
    %197 = vector.extract_strided_slice %6 {offsets = [0, 3], sizes = [32, 1], strides = [1, 1]} : vector<32x9xf32> to vector<32x1xf32>
    %c1_i32_97 = arith.constant 1 : i32
    %198 = tpu.dynamic_rotate %156 by %c1_i32_97 dim 1 : vector<32x256xf32>, i32 -> vector<32x256xf32>
    %c1_i32_98 = arith.constant 1 : i32
    %199 = vector.broadcast %c1_i32_98 : i32 to vector<1x256xi32>
    %200 = arith.cmpi sge, %24, %199 : vector<1x256xi32>
    %cst_99 = arith.constant 0.000000e+00 : f32
    %201 = vector.shape_cast %200 : vector<1x256xi1> to vector<1x256xi1>
    %202 = vector.broadcast %201 : vector<1x256xi1> to vector<32x256xi1>
    %203 = vector.broadcast %cst_99 : f32 to vector<32x256xf32>
    %204 = arith.select %202, %198, %203 : vector<32x256xi1>, vector<32x256xf32>
    %205 = vector.broadcast %197 : vector<32x1xf32> to vector<32x256xf32>
    %206 = arith.mulf %205, %204 : vector<32x256xf32>
    %207 = arith.addf %196, %206 : vector<32x256xf32>
    %208 = vector.extract_strided_slice %6 {offsets = [0, 4], sizes = [32, 1], strides = [1, 1]} : vector<32x9xf32> to vector<32x1xf32>
    %209 = vector.broadcast %208 : vector<32x1xf32> to vector<32x256xf32>
    %210 = arith.mulf %209, %156 : vector<32x256xf32>
    %211 = arith.addf %207, %210 : vector<32x256xf32>
    %212 = vector.extract_strided_slice %6 {offsets = [0, 5], sizes = [32, 1], strides = [1, 1]} : vector<32x9xf32> to vector<32x1xf32>
    %c255_i32_100 = arith.constant 255 : i32
    %213 = tpu.dynamic_rotate %156 by %c255_i32_100 dim 1 : vector<32x256xf32>, i32 -> vector<32x256xf32>
    %c15_i32_101 = arith.constant 15 : i32
    %214 = vector.broadcast %c15_i32_101 : i32 to vector<1x256xi32>
    %215 = arith.cmpi slt, %24, %214 : vector<1x256xi32>
    %cst_102 = arith.constant 0.000000e+00 : f32
    %216 = vector.shape_cast %215 : vector<1x256xi1> to vector<1x256xi1>
    %217 = vector.broadcast %216 : vector<1x256xi1> to vector<32x256xi1>
    %218 = vector.broadcast %cst_102 : f32 to vector<32x256xf32>
    %219 = arith.select %217, %213, %218 : vector<32x256xi1>, vector<32x256xf32>
    %220 = vector.broadcast %212 : vector<32x1xf32> to vector<32x256xf32>
    %221 = arith.mulf %220, %219 : vector<32x256xf32>
    %222 = arith.addf %211, %221 : vector<32x256xf32>
    %223 = vector.extract_strided_slice %6 {offsets = [0, 6], sizes = [32, 1], strides = [1, 1]} : vector<32x9xf32> to vector<32x1xf32>
    %c241_i32_103 = arith.constant 241 : i32
    %224 = tpu.dynamic_rotate %156 by %c241_i32_103 dim 1 : vector<32x256xf32>, i32 -> vector<32x256xf32>
    %c15_i32_104 = arith.constant 15 : i32
    %225 = vector.broadcast %c15_i32_104 : i32 to vector<1x256xi32>
    %226 = arith.cmpi slt, %23, %225 : vector<1x256xi32>
    %c1_i32_105 = arith.constant 1 : i32
    %227 = vector.broadcast %c1_i32_105 : i32 to vector<1x256xi32>
    %228 = arith.cmpi sge, %24, %227 : vector<1x256xi32>
    %229 = arith.andi %226, %228 : vector<1x256xi1>
    %cst_106 = arith.constant 0.000000e+00 : f32
    %230 = vector.shape_cast %229 : vector<1x256xi1> to vector<1x256xi1>
    %231 = vector.broadcast %230 : vector<1x256xi1> to vector<32x256xi1>
    %232 = vector.broadcast %cst_106 : f32 to vector<32x256xf32>
    %233 = arith.select %231, %224, %232 : vector<32x256xi1>, vector<32x256xf32>
    %234 = vector.broadcast %223 : vector<32x1xf32> to vector<32x256xf32>
    %235 = arith.mulf %234, %233 : vector<32x256xf32>
    %236 = arith.addf %222, %235 : vector<32x256xf32>
    %237 = vector.extract_strided_slice %6 {offsets = [0, 7], sizes = [32, 1], strides = [1, 1]} : vector<32x9xf32> to vector<32x1xf32>
    %c240_i32_107 = arith.constant 240 : i32
    %238 = tpu.dynamic_rotate %156 by %c240_i32_107 dim 1 : vector<32x256xf32>, i32 -> vector<32x256xf32>
    %c15_i32_108 = arith.constant 15 : i32
    %239 = vector.broadcast %c15_i32_108 : i32 to vector<1x256xi32>
    %240 = arith.cmpi slt, %23, %239 : vector<1x256xi32>
    %cst_109 = arith.constant 0.000000e+00 : f32
    %241 = vector.shape_cast %240 : vector<1x256xi1> to vector<1x256xi1>
    %242 = vector.broadcast %241 : vector<1x256xi1> to vector<32x256xi1>
    %243 = vector.broadcast %cst_109 : f32 to vector<32x256xf32>
    %244 = arith.select %242, %238, %243 : vector<32x256xi1>, vector<32x256xf32>
    %245 = vector.broadcast %237 : vector<32x1xf32> to vector<32x256xf32>
    %246 = arith.mulf %245, %244 : vector<32x256xf32>
    %247 = arith.addf %236, %246 : vector<32x256xf32>
    %248 = vector.extract_strided_slice %6 {offsets = [0, 8], sizes = [32, 1], strides = [1, 1]} : vector<32x9xf32> to vector<32x1xf32>
    %c239_i32_110 = arith.constant 239 : i32
    %249 = tpu.dynamic_rotate %156 by %c239_i32_110 dim 1 : vector<32x256xf32>, i32 -> vector<32x256xf32>
    %c15_i32_111 = arith.constant 15 : i32
    %250 = vector.broadcast %c15_i32_111 : i32 to vector<1x256xi32>
    %251 = arith.cmpi slt, %23, %250 : vector<1x256xi32>
    %c15_i32_112 = arith.constant 15 : i32
    %252 = vector.broadcast %c15_i32_112 : i32 to vector<1x256xi32>
    %253 = arith.cmpi slt, %24, %252 : vector<1x256xi32>
    %254 = arith.andi %251, %253 : vector<1x256xi1>
    %cst_113 = arith.constant 0.000000e+00 : f32
    %255 = vector.shape_cast %254 : vector<1x256xi1> to vector<1x256xi1>
    %256 = vector.broadcast %255 : vector<1x256xi1> to vector<32x256xi1>
    %257 = vector.broadcast %cst_113 : f32 to vector<32x256xf32>
    %258 = arith.select %256, %249, %257 : vector<32x256xi1>, vector<32x256xf32>
    %259 = vector.broadcast %248 : vector<32x1xf32> to vector<32x256xf32>
    %260 = arith.mulf %259, %258 : vector<32x256xf32>
    %261 = arith.addf %247, %260 : vector<32x256xf32>
    %262 = vector.broadcast %7 : vector<32x1xf32> to vector<32x256xf32>
    %263 = arith.addf %261, %262 : vector<32x256xf32>
    %264 = vector.extract_strided_slice %263 {offsets = [0, 0], sizes = [16, 256], strides = [1, 1]} : vector<32x256xf32> to vector<16x256xf32>
    %265 = vector.extract_strided_slice %263 {offsets = [16, 0], sizes = [16, 256], strides = [1, 1]} : vector<32x256xf32> to vector<16x256xf32>
    %266 = arith.mulf %264, %265 : vector<16x256xf32>
    %cst_114 = arith.constant dense<0.000000e+00> : vector<16x256xf32>
    %267 = tpu.matmul %8, %266, %cst_114 {dimension_numbers = #tpu.dot_dimension_numbers<[1], [0], [0], [1], [0, 0, 1, 1], [], []>} : vector<16x16xf32>, vector<16x256xf32>, vector<16x256xf32> -> vector<16x256xf32>
    %cst_115 = arith.constant dense<0.000000e+00> : vector<16xf32>
    %268 = vector.multi_reduction <add>, %267, %cst_115 [1] : vector<16x256xf32> to vector<16xf32>
    %269 = vector.shape_cast %268 : vector<16xf32> to vector<16x1xf32>
    %cst_116 = arith.constant 2.560000e+02 : f32
    %270 = vector.broadcast %cst_116 : f32 to vector<16x1xf32>
    %271 = arith.divf %269, %270 : vector<16x1xf32>
    %272 = arith.addf %271, %9 : vector<16x1xf32>
    %273 = vector.broadcast %272 : vector<16x1xf32> to vector<16x256xf32>
    %274 = arith.mulf %266, %273 : vector<16x256xf32>
    %cst_117 = arith.constant dense<0.000000e+00> : vector<16x256xf32>
    %275 = tpu.matmul %10, %274, %cst_117 {dimension_numbers = #tpu.dot_dimension_numbers<[1], [0], [0], [1], [0, 0, 1, 1], [], []>} : vector<16x16xf32>, vector<16x256xf32>, vector<16x256xf32> -> vector<16x256xf32>
    %276 = vector.broadcast %11 : vector<16x1xf32> to vector<16x256xf32>
    %277 = arith.addf %275, %276 : vector<16x256xf32>
    %278 = vector.broadcast %12 : vector<16x1xf32> to vector<16x256xf32>
    %279 = arith.mulf %277, %278 : vector<16x256xf32>
    %280 = arith.addf %133, %279 : vector<16x256xf32>
    %cst_118 = arith.constant dense<0.000000e+00> : vector<256xf32>
    %281 = vector.multi_reduction <add>, %280, %cst_118 [0] : vector<16x256xf32> to vector<256xf32>
    %282 = vector.shape_cast %281 : vector<256xf32> to vector<1x256xf32>
    %cst_119 = arith.constant 1.600000e+01 : f32
    %283 = vector.broadcast %cst_119 : f32 to vector<1x256xf32>
    %284 = arith.divf %282, %283 : vector<1x256xf32>
    %285 = vector.broadcast %284 : vector<1x256xf32> to vector<16x256xf32>
    %286 = arith.subf %280, %285 : vector<16x256xf32>
    %287 = arith.mulf %286, %286 : vector<16x256xf32>
    %cst_120 = arith.constant dense<0.000000e+00> : vector<256xf32>
    %288 = vector.multi_reduction <add>, %287, %cst_120 [0] : vector<16x256xf32> to vector<256xf32>
    %289 = vector.shape_cast %288 : vector<256xf32> to vector<1x256xf32>
    %cst_121 = arith.constant 1.600000e+01 : f32
    %290 = vector.broadcast %cst_121 : f32 to vector<1x256xf32>
    %291 = arith.divf %289, %290 : vector<1x256xf32>
    %cst_122 = arith.constant 9.99999997E-7 : f32
    %292 = vector.broadcast %cst_122 : f32 to vector<1x256xf32>
    %293 = arith.addf %291, %292 : vector<1x256xf32>
    %294 = math.rsqrt %293 : vector<1x256xf32>
    %295 = vector.broadcast %294 : vector<1x256xf32> to vector<16x256xf32>
    %296 = arith.mulf %286, %295 : vector<16x256xf32>
    %297 = vector.broadcast %13 : vector<16x1xf32> to vector<16x256xf32>
    %298 = arith.mulf %296, %297 : vector<16x256xf32>
    %299 = vector.broadcast %14 : vector<16x1xf32> to vector<16x256xf32>
    %300 = arith.addf %298, %299 : vector<16x256xf32>
    %cst_123 = arith.constant dense<0.000000e+00> : vector<32x256xf32>
    %301 = tpu.matmul %15, %300, %cst_123 {dimension_numbers = #tpu.dot_dimension_numbers<[1], [0], [0], [1], [0, 0, 1, 1], [], []>} : vector<32x16xf32>, vector<16x256xf32>, vector<32x256xf32> -> vector<32x256xf32>
    %302 = vector.broadcast %16 : vector<32x1xf32> to vector<32x256xf32>
    %303 = arith.addf %301, %302 : vector<32x256xf32>
    %304 = vector.extract_strided_slice %303 {offsets = [0, 0], sizes = [16, 256], strides = [1, 1]} : vector<32x256xf32> to vector<16x256xf32>
    %305 = vector.extract_strided_slice %303 {offsets = [16, 0], sizes = [16, 256], strides = [1, 1]} : vector<32x256xf32> to vector<16x256xf32>
    %306 = arith.mulf %304, %305 : vector<16x256xf32>
    %cst_124 = arith.constant dense<0.000000e+00> : vector<16x256xf32>
    %307 = tpu.matmul %17, %306, %cst_124 {dimension_numbers = #tpu.dot_dimension_numbers<[1], [0], [0], [1], [0, 0, 1, 1], [], []>} : vector<16x16xf32>, vector<16x256xf32>, vector<16x256xf32> -> vector<16x256xf32>
    %308 = vector.broadcast %18 : vector<16x1xf32> to vector<16x256xf32>
    %309 = arith.addf %307, %308 : vector<16x256xf32>
    %310 = vector.broadcast %19 : vector<16x1xf32> to vector<16x256xf32>
    %311 = arith.mulf %309, %310 : vector<16x256xf32>
    %312 = arith.addf %280, %311 : vector<16x256xf32>
    %cst_125 = arith.constant 0.000000e+00 : f32
    %313 = vector.broadcast %cst_125 : f32 to vector<3x256xf32>
    %314 = vector.extract_strided_slice %20 {offsets = [0, 0, 0], sizes = [1, 3, 16], strides = [1, 1, 1]} : vector<9x3x16xf32> to vector<1x3x16xf32>
    %315 = vector.shape_cast %314 : vector<1x3x16xf32> to vector<3x16xf32>
    %c17_i32_126 = arith.constant 17 : i32
    %316 = tpu.dynamic_rotate %312 by %c17_i32_126 dim 1 : vector<16x256xf32>, i32 -> vector<16x256xf32>
    %c1_i32_127 = arith.constant 1 : i32
    %317 = vector.broadcast %c1_i32_127 : i32 to vector<1x256xi32>
    %318 = arith.cmpi sge, %23, %317 : vector<1x256xi32>
    %c1_i32_128 = arith.constant 1 : i32
    %319 = vector.broadcast %c1_i32_128 : i32 to vector<1x256xi32>
    %320 = arith.cmpi sge, %24, %319 : vector<1x256xi32>
    %321 = arith.andi %318, %320 : vector<1x256xi1>
    %cst_129 = arith.constant 0.000000e+00 : f32
    %322 = vector.shape_cast %321 : vector<1x256xi1> to vector<1x256xi1>
    %323 = vector.broadcast %322 : vector<1x256xi1> to vector<16x256xi1>
    %324 = vector.broadcast %cst_129 : f32 to vector<16x256xf32>
    %325 = arith.select %323, %316, %324 : vector<16x256xi1>, vector<16x256xf32>
    %cst_130 = arith.constant dense<0.000000e+00> : vector<3x256xf32>
    %326 = tpu.matmul %315, %325, %cst_130 {dimension_numbers = #tpu.dot_dimension_numbers<[1], [0], [0], [1], [0, 0, 1, 1], [], []>} : vector<3x16xf32>, vector<16x256xf32>, vector<3x256xf32> -> vector<3x256xf32>
    %327 = arith.addf %313, %326 : vector<3x256xf32>
    %328 = vector.extract_strided_slice %20 {offsets = [1, 0, 0], sizes = [1, 3, 16], strides = [1, 1, 1]} : vector<9x3x16xf32> to vector<1x3x16xf32>
    %329 = vector.shape_cast %328 : vector<1x3x16xf32> to vector<3x16xf32>
    %c16_i32_131 = arith.constant 16 : i32
    %330 = tpu.dynamic_rotate %312 by %c16_i32_131 dim 1 : vector<16x256xf32>, i32 -> vector<16x256xf32>
    %c1_i32_132 = arith.constant 1 : i32
    %331 = vector.broadcast %c1_i32_132 : i32 to vector<1x256xi32>
    %332 = arith.cmpi sge, %23, %331 : vector<1x256xi32>
    %cst_133 = arith.constant 0.000000e+00 : f32
    %333 = vector.shape_cast %332 : vector<1x256xi1> to vector<1x256xi1>
    %334 = vector.broadcast %333 : vector<1x256xi1> to vector<16x256xi1>
    %335 = vector.broadcast %cst_133 : f32 to vector<16x256xf32>
    %336 = arith.select %334, %330, %335 : vector<16x256xi1>, vector<16x256xf32>
    %cst_134 = arith.constant dense<0.000000e+00> : vector<3x256xf32>
    %337 = tpu.matmul %329, %336, %cst_134 {dimension_numbers = #tpu.dot_dimension_numbers<[1], [0], [0], [1], [0, 0, 1, 1], [], []>} : vector<3x16xf32>, vector<16x256xf32>, vector<3x256xf32> -> vector<3x256xf32>
    %338 = arith.addf %327, %337 : vector<3x256xf32>
    %339 = vector.extract_strided_slice %20 {offsets = [2, 0, 0], sizes = [1, 3, 16], strides = [1, 1, 1]} : vector<9x3x16xf32> to vector<1x3x16xf32>
    %340 = vector.shape_cast %339 : vector<1x3x16xf32> to vector<3x16xf32>
    %c15_i32_135 = arith.constant 15 : i32
    %341 = tpu.dynamic_rotate %312 by %c15_i32_135 dim 1 : vector<16x256xf32>, i32 -> vector<16x256xf32>
    %c1_i32_136 = arith.constant 1 : i32
    %342 = vector.broadcast %c1_i32_136 : i32 to vector<1x256xi32>
    %343 = arith.cmpi sge, %23, %342 : vector<1x256xi32>
    %c15_i32_137 = arith.constant 15 : i32
    %344 = vector.broadcast %c15_i32_137 : i32 to vector<1x256xi32>
    %345 = arith.cmpi slt, %24, %344 : vector<1x256xi32>
    %346 = arith.andi %343, %345 : vector<1x256xi1>
    %cst_138 = arith.constant 0.000000e+00 : f32
    %347 = vector.shape_cast %346 : vector<1x256xi1> to vector<1x256xi1>
    %348 = vector.broadcast %347 : vector<1x256xi1> to vector<16x256xi1>
    %349 = vector.broadcast %cst_138 : f32 to vector<16x256xf32>
    %350 = arith.select %348, %341, %349 : vector<16x256xi1>, vector<16x256xf32>
    %cst_139 = arith.constant dense<0.000000e+00> : vector<3x256xf32>
    %351 = tpu.matmul %340, %350, %cst_139 {dimension_numbers = #tpu.dot_dimension_numbers<[1], [0], [0], [1], [0, 0, 1, 1], [], []>} : vector<3x16xf32>, vector<16x256xf32>, vector<3x256xf32> -> vector<3x256xf32>
    %352 = arith.addf %338, %351 : vector<3x256xf32>
    %353 = vector.extract_strided_slice %20 {offsets = [3, 0, 0], sizes = [1, 3, 16], strides = [1, 1, 1]} : vector<9x3x16xf32> to vector<1x3x16xf32>
    %354 = vector.shape_cast %353 : vector<1x3x16xf32> to vector<3x16xf32>
    %c1_i32_140 = arith.constant 1 : i32
    %355 = tpu.dynamic_rotate %312 by %c1_i32_140 dim 1 : vector<16x256xf32>, i32 -> vector<16x256xf32>
    %c1_i32_141 = arith.constant 1 : i32
    %356 = vector.broadcast %c1_i32_141 : i32 to vector<1x256xi32>
    %357 = arith.cmpi sge, %24, %356 : vector<1x256xi32>
    %cst_142 = arith.constant 0.000000e+00 : f32
    %358 = vector.shape_cast %357 : vector<1x256xi1> to vector<1x256xi1>
    %359 = vector.broadcast %358 : vector<1x256xi1> to vector<16x256xi1>
    %360 = vector.broadcast %cst_142 : f32 to vector<16x256xf32>
    %361 = arith.select %359, %355, %360 : vector<16x256xi1>, vector<16x256xf32>
    %cst_143 = arith.constant dense<0.000000e+00> : vector<3x256xf32>
    %362 = tpu.matmul %354, %361, %cst_143 {dimension_numbers = #tpu.dot_dimension_numbers<[1], [0], [0], [1], [0, 0, 1, 1], [], []>} : vector<3x16xf32>, vector<16x256xf32>, vector<3x256xf32> -> vector<3x256xf32>
    %363 = arith.addf %352, %362 : vector<3x256xf32>
    %364 = vector.extract_strided_slice %20 {offsets = [4, 0, 0], sizes = [1, 3, 16], strides = [1, 1, 1]} : vector<9x3x16xf32> to vector<1x3x16xf32>
    %365 = vector.shape_cast %364 : vector<1x3x16xf32> to vector<3x16xf32>
    %cst_144 = arith.constant dense<0.000000e+00> : vector<3x256xf32>
    %366 = tpu.matmul %365, %312, %cst_144 {dimension_numbers = #tpu.dot_dimension_numbers<[1], [0], [0], [1], [0, 0, 1, 1], [], []>} : vector<3x16xf32>, vector<16x256xf32>, vector<3x256xf32> -> vector<3x256xf32>
    %367 = arith.addf %363, %366 : vector<3x256xf32>
    %368 = vector.extract_strided_slice %20 {offsets = [5, 0, 0], sizes = [1, 3, 16], strides = [1, 1, 1]} : vector<9x3x16xf32> to vector<1x3x16xf32>
    %369 = vector.shape_cast %368 : vector<1x3x16xf32> to vector<3x16xf32>
    %c255_i32_145 = arith.constant 255 : i32
    %370 = tpu.dynamic_rotate %312 by %c255_i32_145 dim 1 : vector<16x256xf32>, i32 -> vector<16x256xf32>
    %c15_i32_146 = arith.constant 15 : i32
    %371 = vector.broadcast %c15_i32_146 : i32 to vector<1x256xi32>
    %372 = arith.cmpi slt, %24, %371 : vector<1x256xi32>
    %cst_147 = arith.constant 0.000000e+00 : f32
    %373 = vector.shape_cast %372 : vector<1x256xi1> to vector<1x256xi1>
    %374 = vector.broadcast %373 : vector<1x256xi1> to vector<16x256xi1>
    %375 = vector.broadcast %cst_147 : f32 to vector<16x256xf32>
    %376 = arith.select %374, %370, %375 : vector<16x256xi1>, vector<16x256xf32>
    %cst_148 = arith.constant dense<0.000000e+00> : vector<3x256xf32>
    %377 = tpu.matmul %369, %376, %cst_148 {dimension_numbers = #tpu.dot_dimension_numbers<[1], [0], [0], [1], [0, 0, 1, 1], [], []>} : vector<3x16xf32>, vector<16x256xf32>, vector<3x256xf32> -> vector<3x256xf32>
    %378 = arith.addf %367, %377 : vector<3x256xf32>
    %379 = vector.extract_strided_slice %20 {offsets = [6, 0, 0], sizes = [1, 3, 16], strides = [1, 1, 1]} : vector<9x3x16xf32> to vector<1x3x16xf32>
    %380 = vector.shape_cast %379 : vector<1x3x16xf32> to vector<3x16xf32>
    %c241_i32_149 = arith.constant 241 : i32
    %381 = tpu.dynamic_rotate %312 by %c241_i32_149 dim 1 : vector<16x256xf32>, i32 -> vector<16x256xf32>
    %c15_i32_150 = arith.constant 15 : i32
    %382 = vector.broadcast %c15_i32_150 : i32 to vector<1x256xi32>
    %383 = arith.cmpi slt, %23, %382 : vector<1x256xi32>
    %c1_i32_151 = arith.constant 1 : i32
    %384 = vector.broadcast %c1_i32_151 : i32 to vector<1x256xi32>
    %385 = arith.cmpi sge, %24, %384 : vector<1x256xi32>
    %386 = arith.andi %383, %385 : vector<1x256xi1>
    %cst_152 = arith.constant 0.000000e+00 : f32
    %387 = vector.shape_cast %386 : vector<1x256xi1> to vector<1x256xi1>
    %388 = vector.broadcast %387 : vector<1x256xi1> to vector<16x256xi1>
    %389 = vector.broadcast %cst_152 : f32 to vector<16x256xf32>
    %390 = arith.select %388, %381, %389 : vector<16x256xi1>, vector<16x256xf32>
    %cst_153 = arith.constant dense<0.000000e+00> : vector<3x256xf32>
    %391 = tpu.matmul %380, %390, %cst_153 {dimension_numbers = #tpu.dot_dimension_numbers<[1], [0], [0], [1], [0, 0, 1, 1], [], []>} : vector<3x16xf32>, vector<16x256xf32>, vector<3x256xf32> -> vector<3x256xf32>
    %392 = arith.addf %378, %391 : vector<3x256xf32>
    %393 = vector.extract_strided_slice %20 {offsets = [7, 0, 0], sizes = [1, 3, 16], strides = [1, 1, 1]} : vector<9x3x16xf32> to vector<1x3x16xf32>
    %394 = vector.shape_cast %393 : vector<1x3x16xf32> to vector<3x16xf32>
    %c240_i32_154 = arith.constant 240 : i32
    %395 = tpu.dynamic_rotate %312 by %c240_i32_154 dim 1 : vector<16x256xf32>, i32 -> vector<16x256xf32>
    %c15_i32_155 = arith.constant 15 : i32
    %396 = vector.broadcast %c15_i32_155 : i32 to vector<1x256xi32>
    %397 = arith.cmpi slt, %23, %396 : vector<1x256xi32>
    %cst_156 = arith.constant 0.000000e+00 : f32
    %398 = vector.shape_cast %397 : vector<1x256xi1> to vector<1x256xi1>
    %399 = vector.broadcast %398 : vector<1x256xi1> to vector<16x256xi1>
    %400 = vector.broadcast %cst_156 : f32 to vector<16x256xf32>
    %401 = arith.select %399, %395, %400 : vector<16x256xi1>, vector<16x256xf32>
    %cst_157 = arith.constant dense<0.000000e+00> : vector<3x256xf32>
    %402 = tpu.matmul %394, %401, %cst_157 {dimension_numbers = #tpu.dot_dimension_numbers<[1], [0], [0], [1], [0, 0, 1, 1], [], []>} : vector<3x16xf32>, vector<16x256xf32>, vector<3x256xf32> -> vector<3x256xf32>
    %403 = arith.addf %392, %402 : vector<3x256xf32>
    %404 = vector.extract_strided_slice %20 {offsets = [8, 0, 0], sizes = [1, 3, 16], strides = [1, 1, 1]} : vector<9x3x16xf32> to vector<1x3x16xf32>
    %405 = vector.shape_cast %404 : vector<1x3x16xf32> to vector<3x16xf32>
    %c239_i32_158 = arith.constant 239 : i32
    %406 = tpu.dynamic_rotate %312 by %c239_i32_158 dim 1 : vector<16x256xf32>, i32 -> vector<16x256xf32>
    %c15_i32_159 = arith.constant 15 : i32
    %407 = vector.broadcast %c15_i32_159 : i32 to vector<1x256xi32>
    %408 = arith.cmpi slt, %23, %407 : vector<1x256xi32>
    %c15_i32_160 = arith.constant 15 : i32
    %409 = vector.broadcast %c15_i32_160 : i32 to vector<1x256xi32>
    %410 = arith.cmpi slt, %24, %409 : vector<1x256xi32>
    %411 = arith.andi %408, %410 : vector<1x256xi1>
    %cst_161 = arith.constant 0.000000e+00 : f32
    %412 = vector.shape_cast %411 : vector<1x256xi1> to vector<1x256xi1>
    %413 = vector.broadcast %412 : vector<1x256xi1> to vector<16x256xi1>
    %414 = vector.broadcast %cst_161 : f32 to vector<16x256xf32>
    %415 = arith.select %413, %406, %414 : vector<16x256xi1>, vector<16x256xf32>
    %cst_162 = arith.constant dense<0.000000e+00> : vector<3x256xf32>
    %416 = tpu.matmul %405, %415, %cst_162 {dimension_numbers = #tpu.dot_dimension_numbers<[1], [0], [0], [1], [0, 0, 1, 1], [], []>} : vector<3x16xf32>, vector<16x256xf32>, vector<3x256xf32> -> vector<3x256xf32>
    %417 = arith.addf %403, %416 : vector<3x256xf32>
    %418 = vector.broadcast %21 : vector<3x1xf32> to vector<3x256xf32>
    %419 = arith.addf %417, %418 : vector<3x256xf32>
    %c0_163 = arith.constant 0 : index
    %c0_164 = arith.constant 0 : index
    %c0_165 = arith.constant 0 : index
    %420 = vector.load %arg25[%c0_163, %c0_164, %c0_165] : memref<1x3x256xf32, #tpu.memory_space<vmem>>, vector<1x3x256xf32>
    %421 = vector.shape_cast %420 : vector<1x3x256xf32> to vector<3x256xf32>
    %422 = vector.shape_cast %419 : vector<3x256xf32> to vector<1x3x256xf32>
    tpu.vector_store %arg25[%c0_163, %c0_164, %c0_165], %422 {strides = array<i32>} : memref<1x3x256xf32, #tpu.memory_space<vmem>>, vector<1x3x256xf32>,
    return
  }
  func.func @transform_0(%arg0: i32) -> (i32, i32, i32) {
    %c0_i32 = arith.constant 0 : i32
    %c0_i32_0 = arith.constant 0 : i32
    %c0_i32_1 = arith.constant 0 : i32
    return %arg0, %c0_i32, %c0_i32_0 : i32, i32, i32
  }
  func.func @transform_1(%arg0: i32) -> (i32, i32) {
    %c0_i32 = arith.constant 0 : i32
    %c0_i32_0 = arith.constant 0 : i32
    %c0_i32_1 = arith.constant 0 : i32
    return %c0_i32, %c0_i32_0 : i32, i32
  }
  func.func @transform_2(%arg0: i32) -> (i32, i32, i32) {
    %c0_i32 = arith.constant 0 : i32
    %c0_i32_0 = arith.constant 0 : i32
    %c0_i32_1 = arith.constant 0 : i32
    %c0_i32_2 = arith.constant 0 : i32
    return %c0_i32, %c0_i32_0, %c0_i32_1 : i32, i32, i32
  }
  func.func @transform_3(%arg0: i32) -> (i32, i32) {
    %c0_i32 = arith.constant 0 : i32
    %c0_i32_0 = arith.constant 0 : i32
    %c0_i32_1 = arith.constant 0 : i32
    return %c0_i32, %c0_i32_0 : i32, i32
  }
  func.func @transform_4(%arg0: i32) -> (i32, i32) {
    %c0_i32 = arith.constant 0 : i32
    %c0_i32_0 = arith.constant 0 : i32
    %c0_i32_1 = arith.constant 0 : i32
    return %c0_i32, %c0_i32_0 : i32, i32
  }
  func.func @transform_5(%arg0: i32) -> (i32, i32) {
    %c0_i32 = arith.constant 0 : i32
    %c0_i32_0 = arith.constant 0 : i32
    %c0_i32_1 = arith.constant 0 : i32
    return %c0_i32, %c0_i32_0 : i32, i32
  }
  func.func @transform_6(%arg0: i32) -> (i32, i32) {
    %c0_i32 = arith.constant 0 : i32
    %c0_i32_0 = arith.constant 0 : i32
    %c0_i32_1 = arith.constant 0 : i32
    return %c0_i32, %c0_i32_0 : i32, i32
  }
  func.func @transform_7(%arg0: i32) -> (i32, i32) {
    %c0_i32 = arith.constant 0 : i32
    %c0_i32_0 = arith.constant 0 : i32
    %c0_i32_1 = arith.constant 0 : i32
    return %c0_i32, %c0_i32_0 : i32, i32
  }
  func.func @transform_8(%arg0: i32) -> (i32, i32) {
    %c0_i32 = arith.constant 0 : i32
    %c0_i32_0 = arith.constant 0 : i32
    %c0_i32_1 = arith.constant 0 : i32
    return %c0_i32, %c0_i32_0 : i32, i32
  }
  func.func @transform_9(%arg0: i32) -> (i32, i32) {
    %c0_i32 = arith.constant 0 : i32
    %c0_i32_0 = arith.constant 0 : i32
    %c0_i32_1 = arith.constant 0 : i32
    return %c0_i32, %c0_i32_0 : i32, i32
  }
  func.func @transform_10(%arg0: i32) -> (i32, i32) {
    %c0_i32 = arith.constant 0 : i32
    %c0_i32_0 = arith.constant 0 : i32
    %c0_i32_1 = arith.constant 0 : i32
    return %c0_i32, %c0_i32_0 : i32, i32
  }
  func.func @transform_11(%arg0: i32) -> (i32, i32) {
    %c0_i32 = arith.constant 0 : i32
    %c0_i32_0 = arith.constant 0 : i32
    %c0_i32_1 = arith.constant 0 : i32
    return %c0_i32, %c0_i32_0 : i32, i32
  }
  func.func @transform_12(%arg0: i32) -> (i32, i32) {
    %c0_i32 = arith.constant 0 : i32
    %c0_i32_0 = arith.constant 0 : i32
    %c0_i32_1 = arith.constant 0 : i32
    return %c0_i32, %c0_i32_0 : i32, i32
  }
  func.func @transform_13(%arg0: i32) -> (i32, i32) {
    %c0_i32 = arith.constant 0 : i32
    %c0_i32_0 = arith.constant 0 : i32
    %c0_i32_1 = arith.constant 0 : i32
    return %c0_i32, %c0_i32_0 : i32, i32
  }
  func.func @transform_14(%arg0: i32) -> (i32, i32) {
    %c0_i32 = arith.constant 0 : i32
    %c0_i32_0 = arith.constant 0 : i32
    %c0_i32_1 = arith.constant 0 : i32
    return %c0_i32, %c0_i32_0 : i32, i32
  }
  func.func @transform_15(%arg0: i32) -> (i32, i32) {
    %c0_i32 = arith.constant 0 : i32
    %c0_i32_0 = arith.constant 0 : i32
    %c0_i32_1 = arith.constant 0 : i32
    return %c0_i32, %c0_i32_0 : i32, i32
  }
  func.func @transform_16(%arg0: i32) -> (i32, i32) {
    %c0_i32 = arith.constant 0 : i32
    %c0_i32_0 = arith.constant 0 : i32
    %c0_i32_1 = arith.constant 0 : i32
    return %c0_i32, %c0_i32_0 : i32, i32
  }
  func.func @transform_17(%arg0: i32) -> (i32, i32) {
    %c0_i32 = arith.constant 0 : i32
    %c0_i32_0 = arith.constant 0 : i32
    %c0_i32_1 = arith.constant 0 : i32
    return %c0_i32, %c0_i32_0 : i32, i32
  }
  func.func @transform_18(%arg0: i32) -> (i32, i32) {
    %c0_i32 = arith.constant 0 : i32
    %c0_i32_0 = arith.constant 0 : i32
    %c0_i32_1 = arith.constant 0 : i32
    return %c0_i32, %c0_i32_0 : i32, i32
  }
  func.func @transform_19(%arg0: i32) -> (i32, i32) {
    %c0_i32 = arith.constant 0 : i32
    %c0_i32_0 = arith.constant 0 : i32
    %c0_i32_1 = arith.constant 0 : i32
    return %c0_i32, %c0_i32_0 : i32, i32
  }
  func.func @transform_20(%arg0: i32) -> (i32, i32) {
    %c0_i32 = arith.constant 0 : i32
    %c0_i32_0 = arith.constant 0 : i32
    %c0_i32_1 = arith.constant 0 : i32
    return %c0_i32, %c0_i32_0 : i32, i32
  }
  func.func @transform_21(%arg0: i32) -> (i32, i32) {
    %c0_i32 = arith.constant 0 : i32
    %c0_i32_0 = arith.constant 0 : i32
    %c0_i32_1 = arith.constant 0 : i32
    return %c0_i32, %c0_i32_0 : i32, i32
  }
  func.func @transform_22(%arg0: i32) -> (i32, i32, i32) {
    %c0_i32 = arith.constant 0 : i32
    %c0_i32_0 = arith.constant 0 : i32
    %c0_i32_1 = arith.constant 0 : i32
    %c0_i32_2 = arith.constant 0 : i32
    return %c0_i32, %c0_i32_0, %c0_i32_1 : i32, i32, i32
  }
  func.func @transform_23(%arg0: i32) -> (i32, i32) {
    %c0_i32 = arith.constant 0 : i32
    %c0_i32_0 = arith.constant 0 : i32
    %c0_i32_1 = arith.constant 0 : i32
    return %c0_i32, %c0_i32_0 : i32, i32
  }
  func.func @transform_24(%arg0: i32) -> (i32, i32, i32) {
    %c0_i32 = arith.constant 0 : i32
    %c0_i32_0 = arith.constant 0 : i32
    %c0_i32_1 = arith.constant 0 : i32
    return %arg0, %c0_i32, %c0_i32_0 : i32, i32, i32
  }
}

</mosaic_0001>

<bundles_post_ra>
// kernel: nafnet_forward.1
= control target key start
LH: loop header
LB: loop body
LE: loop exit
PB: predicated region body
PF: predicated region fallthrough
CT: control target
= control target key end

     0   :  { %s6117_s0 = inlined_call_operand.vmem [shape: f32[2,3,256], index: 0, kind: input, shape index: {}]   ;;  %s6118_s1 = inlined_call_operand.vmem [shape: s32[2,256], index: 1, kind: input, shape index: {}]   ;;  %s6119_s2 = inlined_call_operand.vmem [shape: f32[9,16,3], index: 2, kind: input, shape index: {}]   ;;  %s6120_s3 = inlined_call_operand.vmem [shape: f32[16,1], index: 3, kind: input, shape index: {}]   ;;  %s6121_s4 = inlined_call_operand.vmem [shape: f32[16,1], index: 4, kind: input, shape index: {}]   ;;  %s6122_s5 = inlined_call_operand.vmem [shape: f32[16,1], index: 5, kind: input, shape index: {}]   ;;  %s6123_s6 = inlined_call_operand.vmem [shape: f32[32,16], index: 6, kind: input, shape index: {}]   ;;  %s6124_s7 = inlined_call_operand.vmem [shape: f32[32,1], index: 7, kind: input, shape index: {}]   ;;  %s6125_s8 = inlined_call_operand.vmem [shape: f32[32,9], index: 8, kind: input, shape index: {}]   ;;  %s6126_s9 = inlined_call_operand.vmem [shape: f32[32,1], index: 9, kind: input, shape index: {}]   ;;  %s6127_s10 = inlined_call_operand.vmem [shape: f32[16,16], index: 10, kind: input, shape index: {}]   ;;  %s6128_s11 = inlined_call_operand.vmem [shape: f32[16,1], index: 11, kind: input, shape index: {}]   ;;  %s6129_s12 = inlined_call_operand.vmem [shape: f32[16,16], index: 12, kind: input, shape index: {}]   ;;  %s6130_s13 = inlined_call_operand.vmem [shape: f32[16,1], index: 13, kind: input, shape index: {}]   ;;  %s6131_s14 = inlined_call_operand.vmem [shape: f32[16,1], index: 14, kind: input, shape index: {}]   ;;  %s6132_s15 = inlined_call_operand.vmem [shape: f32[16,1], index: 15, kind: input, shape index: {}]   ;;  %s6133_s16 = inlined_call_operand.vmem [shape: f32[16,1], index: 16, kind: input, shape index: {}]   ;;  %s6134_s17 = inlined_call_operand.vmem [shape: f32[32,16], index: 17, kind: input, shape index: {}]   ;;  %s6135_s18 = inlined_call_operand.vmem [shape: f32[32,1], index: 18, kind: input, shape index: {}]   ;;  %s6136_s19 = inlined_call_operand.vmem [shape: f32[16,16], index: 19, kind: input, shape index: {}]   ;;  %s6137_s20 = inlined_call_operand.vmem [shape: f32[16,1], index: 20, kind: input, shape index: {}]   ;;  %s6138_s21 = inlined_call_operand.vmem [shape: f32[16,1], index: 21, kind: input, shape index: {}]   ;;  %s6139_s22 = inlined_call_operand.vmem [shape: f32[9,3,16], index: 22, kind: input, shape index: {}]   ;;  %s6140_s23 = inlined_call_operand.vmem [shape: f32[3,1], index: 23, kind: input, shape index: {}]   ;;  %s6141_s24 = inlined_call_operand.vmem [shape: f32[2,3,256], index: 24, kind: output, shape index: {}]  }
   0x1   :  { %6228 = sst [smem:[#allocation37_spill]] %s6117_s0 }
   0x2   :  { %6229 = sst [smem:[#allocation38_spill]] %s6118_s1 }
   0x3   :  { %6230 = sst [smem:[#allocation39_spill]] %s6119_s2 }
   0x4   :  { %6231 = sst [smem:[#allocation40_spill]] %s6120_s3 }
   0x5   :  { %6232 = sst [smem:[#allocation41_spill]] %s6121_s4 }
   0x6   :  { %6233 = sst [smem:[#allocation42_spill]] %s6122_s5  ;;  %s4599_s5 = smov 0  }
   0x7   :  { %6234 = sst [smem:[#allocation43_spill]] %s6123_s6 }
   0x8   :  { %6235 = sst [smem:[#allocation44_spill]] %s6124_s7 }
   0x9   :  { %6236 = sst [smem:[#allocation45_spill]] %s6125_s8 }
   0xa   :  { %6237 = sst [smem:[#allocation46_spill]] %s6126_s9 }
   0xb   :  { %6238 = sst [smem:[#allocation47_spill]] %s6127_s10 }
   0xc   :  { %6239 = sst [smem:[#allocation48_spill]] %s6128_s11 }
   0xd   :  { %6240 = sst [smem:[#allocation49_spill]] %s6141_s24 }
   0xe LB: > { %6241 = sst [smem:[#allocation2_spill]] %s4454_s5  ;;  %s4085_s26 = sadd.s32 4294967295, %s4454_s5   ;;  %s4454_s5 = sphi %s4599_s5, %s34_s5  }
   0xf   : > { %p4089_p0 = scmp.ge.s32.totalorder %s4454_s5, 1  ;;  %p662_p1 = scmp.lt.s32.totalorder %s4454_s5, 3 }
  0x11   : > { %p663_p2 = pnand %p4089_p0, %p662_p1 }
  0x13   : > { %666 = sbr.rel (%p663_p2) target bundleno = 2628 (0xa44), region = 116 }
  0x1a   : > { %p728_p3 = scmp.lt.s32.totalorder %s4085_s26, 1  ;;  %v4456_v0 = vmov 0   ;;  %v6178_v1 = vmov 0.0   ;;  %s6242_s2 = sld [smem:[#allocation37_spill]]  ;;  %v825_v17 = vlaneseq  ;;  %vm891_vm8 = vcmask 1042432  }
  0x1b   : > { %4340 = vset.pattern.permute.xlu1 %v4456_v0  ;;  %4339 = vset.pattern.permute.xlu0 %v4456_v0  ;;  %s6162_s0 = smov 16   ;;  %s6164_s7 = smov 17   ;;  %vm884_vm9 = vcmask 23552  }
  0x1c   : > { %s6460_s26 = smov (!%p728_p3, %s4085_s26), 1  ;;  %962 = vmatprep.mubr.f32.mxu0 %v6178_v1  ;;  %2092 = vmatprep.mubr.f32.mxu1 %v6178_v1  ;;  %s6158_s30 = smov 15   ;;  %v4714_v21 = vshrl.u32 %v825_v17, 7  ;;  %v4738_v31 = vand.u32 127, %v825_v17 }
  0x1d   : > { %s6149_s27 = sshll.u32 %s6460_s26, 3  ;;  %s6154_s3 = smov 1  }
  0x1e   : > { %s6152_s25 = smov 127   ;;  %s6150_s8 = smov 113   ;;  %v4723_v23 = vsub.s32 0, %v4714_v21  ;;  %v4726_v24 = vsub.s32 2, %v4714_v21  ;;  %v1204_v39 = vsub.s32 3, %v4714_v21  ;;  %vm827_vm6 = vcmp.lt.s32.totalorder %v4738_v31, 17 }
  0x1f   : > { %s6156_s4 = smov 112   ;;  %s6160_s1 = smov 111   ;;  %vm861_vm7 = vcmp.lt.s32.totalorder %v4738_v31, 16  ;;  %v4765_v44 = vsub.s32 1, %v4714_v21  ;;  %vm6171_vm14 = vcmp.lt.s32.totalorder %v4738_v31, 15 }
  0x20   : > { %s732_s29 = scalar_lea.vmem %s6242_s2, %s6149_s27  ;;  %s6243_s2 = sld [smem:[#allocation40_spill]] }
  0x21   : > { %v4619_v2 = vld [vmem:[%s732_s29] sm:$0x77]  ;;  %s6264_s9 = sld [smem:[#allocation46_spill]]  ;;  %s6265_s27 = sld [smem:[#allocation43_spill]] }
  0x22   : > { %857 = vrot.lane.b32.xlu0 %v4619_v2, %s6162_s0  ;;  %821 = vrot.lane.b32.xlu1 %v4619_v2, %s6164_s7  ;;  %v4627_v3 = vcombine.high %v4619_v2, %v4619_v2  ;;  %s6273_s6 = smov 17   ;;  %s6275_s29 = smov 16  }
  0x23   : > { %s6282_s28 = smov 112   ;;  %s6404_s10 = sld [smem:[#allocation47_spill]] }
  0x24   : > { %s6408_s11 = sld [smem:[#allocation48_spill]] }
  0x26   : > { %859 = vrot.lane.b32.xlu0 %v4627_v3, %s6162_s0  ;;  %823 = vrot.lane.b32.xlu1 %v4627_v3, %s6164_s7  ;;  %v757_v4 = vld [vmem:[%s6243_s2 + $0x8] sm:$0xff]  ;;  %v756_v5 = vld [vmem:[%s6243_s2] sm:$0xff]  ;;  %s6245_s7 = sld [smem:[#allocation42_spill]]  ;;  %s6248_s2 = sld [smem:[#allocation38_spill]] }
  0x27   : > { %s6281_s0 = smov 113  }
  0x2a   : > { %1066 = vrot.lane.b32.xlu1 %v4627_v3, %s6158_s30  ;;  %1064 = vrot.lane.b32.xlu0 %v4619_v2, %s6158_s30  ;;  %s6253_s30 = sld [smem:[#allocation39_spill]] }
  0x2c   : > { %v760_v8 = vld [vmem:[%s6245_s7] sm:$0xff]  ;;  %v761_v9 = vld [vmem:[%s6245_s7 + $0x8] sm:$0xff] }
  0x2d   : > { %v4695_v14 = vld [vmem:[%s6248_s2] sm:$0xf]  ;;  %s6277_s2 = smov 15  }
  0x2e   : > { %1193 = vrot.lane.b32.xlu1 %v4627_v3, %s6154_s3  ;;  %1191 = vrot.lane.b32.xlu0 %v4619_v2, %s6154_s3  ;;  %s6244_s3 = sld [smem:[#allocation41_spill]]  ;;  %vm830_vm0 = vcmp.ge.s32.totalorder %v4695_v14, 1  ;;  %vm1071_vm1 = vcmp.lt.s32.totalorder %v4695_v14, 15 }
  0x2f   : > { %v4700_v15 = vsel %vm830_vm0, 1, %v4456_v0  ;;  %v4707_v18 = vsel %vm1071_vm1, 1, %v4456_v0 }
  0x30   : > { %v4094_v16 = vrot.slane %v4700_v15, 9  ;;  %v4103_v20 = vrot.slane %v4707_v18, 9  ;;  %v871_v26 = vrot.slane %v4700_v15, %v4726_v24  ;;  %v867_v27 = vrot.slane %v4700_v15, %v4723_v23  ;;  %v740_v52 = vld [vmem:[%s6253_s30 + $0x10] sm:$0xff]  ;;  %v741_v60 = vld [vmem:[%s6253_s30 + $0x18] sm:$0xff]  ;;  %v747_v22 = vld [vmem:[%s6253_s30 + $0x48] sm:$0xff] }
  0x31   : > { %v1205_v45 = vrot.slane %v4700_v15, %v1204_v39  ;;  %v1416_v17 = vrot.slane %v4707_v18, %v1204_v39 }
  0x32   : > { %1404 = vrot.lane.b32.xlu1 %v4627_v3, %s6152_s25  ;;  %1402 = vrot.lane.b32.xlu0 %v4619_v2, %s6152_s25  ;;  %s6246_s25 = sld [smem:[#allocation44_spill]]  ;;  %vm4709_vm2 = vcmp.ne.s32.totalorder %v4094_v16, 0  ;;  %vm4718_vm4 = vcmp.ne.s32.totalorder %v4103_v20, 0  ;;  %v4741_v32 = vrot.slane %v871_v26, %v4723_v23  ;;  %v4744_v33 = vrot.slane %v867_v27, %v4723_v23  ;;  %v742_v20 = vld [vmem:[%s6253_s30 + $0x20] sm:$0xff]  ;;  %v743_v26 = vld [vmem:[%s6253_s30 + $0x28] sm:$0xff] }
  0x33   : > { %vm835_vm3 = vmand %vm830_vm0, %vm4709_vm2  ;;  %v1213_v59 = vrot.slane %v1205_v45, %v4765_v44 }
  0x34   : > { %v758_v6 = vld [vmem:[%s6244_s3] sm:$0xff]  ;;  %v759_v7 = vld [vmem:[%s6244_s3 + $0x8] sm:$0xff]  ;;  %v836_v25 = vsel %vm835_vm3, 1, %v4456_v0  ;;  %vm1076_vm5 = vmand %vm830_vm0, %vm4718_vm4  ;;  %vm881_vm10 = vcmp.eq.s32.totalorder %v4741_v32, 1  ;;  %vm880_vm11 = vcmp.eq.s32.totalorder %v4744_v33, 1  ;;  %vm6170_vm0 = vcmp.lt.s32.totalorder %v4738_v31, 1 }
  0x35   : > { %v844_v28 = vrot.slane %v836_v25, %v4726_v24  ;;  %v840_v29 = vrot.slane %v836_v25, %v4723_v23  ;;  %v1077_v30 = vsel %vm1076_vm5, 1, %v4456_v0  ;;  %vm4816_vm5 = vcmp.eq.s32.totalorder %v1213_v59, 1  ;;  %v807_v33 = vld [vmem:[%s6139_s22 + $0x4] sm:$0x7] }
  0x36   : > { %1524 = vrot.lane.b32.xlu1 %v4627_v3, %s6150_s8  ;;  %1522 = vrot.lane.b32.xlu0 %v4619_v2, %s6150_s8  ;;  %v1085_v35 = vrot.slane %v1077_v30, %v4726_v24  ;;  %v1081_v43 = vrot.slane %v1077_v30, %v4723_v23  ;;  %v1424_v25 = vrot.slane %v1416_v17, %v4765_v44  ;;  %s6278_s8 = smov 1  }
  0x37   : > { %v4747_v34 = vrot.slane %v844_v28, %v4723_v23  ;;  %v4751_v38 = vrot.slane %v840_v29, %v4723_v23  ;;  %v1412_v29 = vrot.slane %v4707_v18, %v4765_v44 }
  0x38   : > { %v766_v10 = vld [vmem:[%s6246_s25] sm:$0xff]  ;;  %v768_v11 = vld [vmem:[%s6246_s25 + $0x10] sm:$0xff]  ;;  %v4760_v40 = vrot.slane %v1085_v35, %v4723_v23  ;;  %v4792_v56 = vrot.slane %v1081_v43, %v4723_v23 }
  0x39   : > { %vm6220_vm12 = vcmp.eq.s32.totalorder %v4747_v34, 1  ;;  %vm6221_vm13 = vcmp.eq.s32.totalorder %v4751_v38, 1 }
  0x3a   : > { %1646 = vrot.lane.b32.xlu1 %v4627_v3, %s6156_s4  ;;  %1644 = vrot.lane.b32.xlu0 %v4619_v2, %s6156_s4  ;;  %vm6167_vm15 = vcmp.eq.s32.totalorder %v4760_v40, 1  ;;  %vm6168_vm3 = vcmp.eq.s32.totalorder %v4792_v56, 1  ;;  %s6279_s4 = smov 127  }
  0x3e   : > { %1766 = vrot.lane.b32.xlu1 %v4627_v3, %s6160_s1  ;;  %1764 = vrot.lane.b32.xlu0 %v4619_v2, %s6160_s1  ;;  %s6247_s1 = sld [smem:[#allocation45_spill]] }
  0x42   : > { %1893 = vperm.xlu1 %4340, %v757_v4   ;;  %1888 = vperm.xlu0 %4339, %v756_v5   ;;  %v1201_v4 = vrot.slane %v4700_v15, %v4765_v44  ;;  %v739_v15 = vld [vmem:[%s6253_s30 + $0x8] sm:$0xff] }
  0x44   : > { %v4684_v12 = vld [vmem:[%s6247_s1] sm:$0xff]  ;;  %v4690_v13 = vld [vmem:[%s6247_s1 + $0x10] sm:$0xff] }
  0x46   : > { %1951 = vperm.xlu1 %4340, %v758_v6   ;;  %1956 = vperm.xlu0 %4339, %v759_v7  }
  0x4a   : > { %1965 = vperm.xlu1 %4340, %v760_v8   ;;  %1970 = vperm.xlu0 %4339, %v761_v9   ;;  %v738_v8 = vld [vmem:[%s6253_s30] sm:$0xff] }
  0x4e   : > { %1979 = vperm.xlu1 %4340, %v766_v10   ;;  %v4827_v10 = vrot.slane %v1201_v4, %v4765_v44 }
  0x52   : > { %1989 = vperm.xlu1 %4340, %v768_v11  }
  0x56   : > { %2133 = vperm.xlu1 %4340, %v4684_v12  }
  0x5a   : > { %2143 = vperm.xlu1 %4340, %v4690_v13  }
  0x94   : > { %v858_v36 = vpop.permute.xlu0 %857  ;;  %v822_v37 = vpop.permute.xlu1 %821 }
  0x98   : > { %v860_v41 = vpop.permute.xlu0 %859  ;;  %v824_v42 = vpop.permute.xlu1 %823 }
  0x99   : > { %v828_v46 = vsel %vm827_vm6, %v822_v37, %v824_v42  ;;  %v829_v47 = vsel %vm827_vm6, %v824_v42, %v822_v37  ;;  %v862_v48 = vsel %vm861_vm7, %v858_v36, %v860_v41  ;;  %v863_v49 = vsel %vm861_vm7, %v860_v41, %v858_v36  ;;  %v745_v42 = vld [vmem:[%s6253_s30 + $0x38] sm:$0xff] }
  0x9a   : > { %v883_v50 = vsel %vm881_vm10, %v862_v48, 0.0  ;;  %v882_v51 = vsel %vm880_vm11, %v863_v49, 0.0  ;;  %v856_v53 = vsel %vm6220_vm12, %v828_v46, 0.0  ;;  %v855_v54 = vsel %vm6221_vm13, %v829_v47, 0.0  ;;  %v746_v48 = vld [vmem:[%s6253_s30 + $0x40] sm:$0xff] }
  0x9b   : > { %4095 = vmatprep.subr.msk.mxu0 %vm891_vm8, %v883_v50  ;;  %v4879_v37 = vrot.slane %v1412_v29, %v4765_v44  ;;  %v5021_v29 = vld [vmem:[%s6247_s1 + $0x8] sm:$0xff] }
  0x9c   : > { %4096 = vmatpush1.msk.msra.mxu0 %vm891_vm8, %v882_v51  ;;  %v1067_v55 = vpop.permute.xlu1 %1066  ;;  %v1065_v57 = vpop.permute.xlu0 %1064 }
  0x9d   : > { %4097 = vmatmul.mubr.msk.f32.vlgmr.msra.gmra.mrb[0].mxu0 %vm884_vm9, %v740_v52  ;;  %4099 = vmatprep.subr.msk.mxu0 %vm891_vm8, %v856_v53  ;;  %v1069_v58 = vsel %vm6171_vm14, %v1065_v57, %v1067_v55  ;;  %v1070_v62 = vsel %vm6171_vm14, %v1067_v55, %v1065_v57  ;;  %v1654_v57 = vrot.slane %v4707_v18, %v4723_v23 }
  0x9e   : > { %4100 = vmatpush1.msk.msra.mxu0 %vm891_vm8, %v855_v54  ;;  %968 = vmatprep.mubr.f32.mxu0 %v6178_v1  ;;  %v1097_v61 = vsel %vm6167_vm15, %v1069_v58, 0.0  ;;  %v1096_v9 = vsel %vm6168_vm3, %v1070_v62, 0.0  ;;  %vm6169_vm15 = vcmp.eq.s32.totalorder %v4827_v10, 1  ;;  %vm1529_vm3 = vmand %vm1071_vm1, %vm4709_vm2  ;;  %vm4869_vm2 = vcmp.eq.s32.totalorder %v1424_v25, 1 }
  0x9f   : > { %4104 = vmatprep.subr.msk.mxu0 %vm891_vm8, %v1097_v61  ;;  %v1530_v19 = vsel %vm1529_vm3, 1, %v4456_v0  ;;  %vm1526_vm3 = vcmp.lt.s32.totalorder %v4738_v31, 113 }
  0xa0   : > { %v1194_v63 = vpop.permute.xlu1 %1193  ;;  %v1192_v5 = vpop.permute.xlu0 %1191  ;;  %v1538_v36 = vrot.slane %v1530_v19, %v4726_v24  ;;  %v1534_v46 = vrot.slane %v1530_v19, %v4723_v23  ;;  %v4466_v19 = vmov 1  }
  0xa1   : > { %4098 = vmatmul.mubr.msk.f32.gmra.mrb[2].mxu0 %vm884_vm9, %v741_v60  ;;  %v1196_v6 = vsel %vm6170_vm0, %v1192_v5, %v1194_v63  ;;  %v1197_v16 = vsel %vm6170_vm0, %v1194_v63, %v1192_v5  ;;  %vm1425_vm0 = vcmp.eq.s32.totalorder %v4879_v37, 1  ;;  %v748_v60 = vld [vmem:[%s6253_s30 + $0x50] sm:$0xff]  ;;  %4342 = vset.pattern.permute.xlu0 %v4466_v19 }
  0xa2   : > { %1051 = vmatprep.mubr.f32.mxu0 %v6178_v1  ;;  %v1217_v11 = vsel %vm4816_vm5, %v1196_v6, 0.0  ;;  %v1216_v21 = vsel %vm6169_vm15, %v1197_v16, 0.0  ;;  %vm6172_vm15 = vcmp.lt.s32.totalorder %v4738_v31, 127  ;;  %v4885_v41 = vrot.slane %v1538_v36, %v4723_v23  ;;  %4341 = vset.pattern.permute.xlu1 %v4466_v19  ;;  %v5030_v36 = vld [vmem:[%s6247_s1 + $0x18] sm:$0xff]  ;;  %s6283_s1 = smov 111  }
  0xa3   : > { %v4916_v50 = vrot.slane %v1534_v46, %v4723_v23  ;;  %2204 = vperm.xlu0 %4342, %v5021_v29   ;;  %2200 = vperm.xlu1 %4341, %v4684_v12  }
  0xa4   : > { %v1405_v27 = vpop.permute.xlu1 %1404  ;;  %v1403_v28 = vpop.permute.xlu0 %1402  ;;  %vm6173_vm14 = vcmp.eq.s32.totalorder %v4885_v41, 1 }
  0xa5   : > { %4101 = vmatmul.mubr.msk.f32.vlgmr.msra.gmra.mrb[0].mxu0 %vm884_vm9, %v738_v8  ;;  %v1408_v30 = vsel %vm6172_vm15, %v1405_v27, %v1403_v28  ;;  %v1407_v45 = vsel %vm6172_vm15, %v1403_v28, %v1405_v27  ;;  %vm1771_vm15 = vmand %vm1071_vm1, %vm4718_vm4  ;;  %vm1648_vm1 = vcmp.lt.s32.totalorder %v4738_v31, 112  ;;  %vm6175_vm4 = vcmp.eq.s32.totalorder %v4916_v50, 1  ;;  %v754_v27 = vld [vmem:[%s6253_s30 + $0x80] sm:$0xff]  ;;  %v755_v28 = vld [vmem:[%s6253_s30 + $0x88] sm:$0xff] }
  0xa6   : > { %1057 = vmatprep.mubr.f32.mxu0 %v6178_v1  ;;  %4105 = vmatpush1.msk.msra.mxu0 %vm891_vm8, %v1096_v9  ;;  %v1428_v39 = vsel %vm4869_vm2, %v1408_v30, 0.0  ;;  %v1427_v49 = vsel %vm1425_vm0, %v1407_v45, 0.0  ;;  %v1772_v54 = vsel %vm1771_vm15, 1, %v4456_v0  ;;  %vm6219_vm15 = vcmp.lt.s32.totalorder %v4738_v31, 111 }
  0xa7   : > { %4108 = vmatprep.subr.msk.mxu0 %vm891_vm8, %v1217_v11  ;;  %v1780_v59 = vrot.slane %v1772_v54, %v4726_v24  ;;  %v1776_v8 = vrot.slane %v1772_v54, %v4723_v23  ;;  %v750_v11 = vld [vmem:[%s6253_s30 + $0x60] sm:$0xff]  ;;  %v4467_v30 = vmov 2   ;;  %2208 = vperm.xlu1 %4341, %v4690_v13   ;;  %v4473_v45 = vmov 8  }
  0xa8   : > { %v1525_v43 = vpop.permute.xlu1 %1524  ;;  %v1523_v44 = vpop.permute.xlu0 %1522  ;;  %4343 = vset.pattern.permute.xlu0 %v4467_v30 }
  0xa9   : > { %4102 = vmatmul.mubr.msk.f32.gmra.mrb[2].mxu0 %vm884_vm9, %v739_v15  ;;  %v1528_v47 = vsel %vm1526_vm3, %v1525_v43, %v1523_v44  ;;  %v1527_v55 = vsel %vm1526_vm3, %v1523_v44, %v1525_v43  ;;  %v4955_v63 = vrot.slane %v1780_v59, %v4723_v23  ;;  %v4979_v16 = vrot.slane %v1776_v8, %v4723_v23 }
  0xaa   : > { %1174 = vmatprep.mubr.f32.mxu0 %v6178_v1  ;;  %v1550_v51 = vsel %vm6173_vm14, %v1528_v47, 0.0  ;;  %v1549_v61 = vsel %vm6175_vm4, %v1527_v55, 0.0  ;;  %2264 = vperm.xlu0 %4343, %v4684_v12   ;;  %v4471_v43 = vmov 6   ;;  %v4472_v44 = vmov 7   ;;  %v767_v47 = vld [vmem:[%s6246_s25 + $0x8] sm:$0xff] }
  0xab   : > { %6258 = vst [vmem:[#allocation3_spill] sm:$0xff] %v4955_v63  ;;  %vm6217_vm4 = vcmp.eq.s32.totalorder %v4955_v63, 1  ;;  %6259 = vst [vmem:[#allocation4_spill] sm:$0xff] %v4979_v16  ;;  %2212 = vperm.xlu1 %4341, %v5030_v36  }
  0xac   : > { %v1647_v14 = vpop.permute.xlu1 %1646  ;;  %v1645_v53 = vpop.permute.xlu0 %1644 }
  0xad   : > { %4106 = vmatmul.mubr.msk.f32.vlgmr.msra.gmra.mrb[0].mxu0 %vm884_vm9, %v742_v20  ;;  %v1650_v58 = vsel %vm1648_vm1, %v1647_v14, %v1645_v53  ;;  %v1649_v6 = vsel %vm1648_vm1, %v1645_v53, %v1647_v14  ;;  %v751_v20 = vld [vmem:[%s6253_s30 + $0x68] sm:$0xff] }
  0xae   : > { %1180 = vmatprep.mubr.f32.mxu0 %v6178_v1  ;;  %4109 = vmatpush1.msk.msra.mxu0 %vm891_vm8, %v1216_v21  ;;  %v752_v21 = vld [vmem:[%s6253_s30 + $0x70] sm:$0xff] }
  0xaf   : > { %4112 = vmatprep.subr.msk.mxu0 %vm891_vm8, %v4627_v3  ;;  %v744_v3 = vld [vmem:[%s6253_s30 + $0x30] sm:$0xff]  ;;  %2276 = vperm.xlu0 %4343, %v5030_v36  }
  0xb0   : > { %v1767_v4 = vpop.permute.xlu1 %1766  ;;  %v1765_v5 = vpop.permute.xlu0 %1764  ;;  %4344 = vset.pattern.permute.xlu1 %v4467_v30 }
  0xb1   : > { %4107 = vmatmul.mubr.msk.f32.gmra.mrb[2].mxu0 %vm884_vm9, %v743_v26  ;;  %v1770_v9 = vsel %vm6219_vm15, %v1767_v4, %v1765_v5  ;;  %v753_v26 = vld [vmem:[%s6253_s30 + $0x78] sm:$0xff]  ;;  %2268 = vperm.xlu1 %4344, %v5021_v29  }
  0xb2   : > { %1294 = vmatprep.mubr.f32.mxu0 %v6178_v1  ;;  %v1792_v17 = vsel %vm6217_vm4, %v1770_v9, 0.0  ;;  %v775_v9 = vld [vmem:[%s6264_s9 + $0x8] sm:$0xff] }
  0xb5   : > { %4110 = vmatmul.mubr.msk.f32.vlgmr.msra.gmra.mrb[0].mxu0 %vm884_vm9, %v744_v3  ;;  %v4468_v3 = vmov 3   ;;  %2272 = vperm.xlu1 %4344, %v4690_v13  }
  0xb6   : > { %1300 = vmatprep.mubr.f32.mxu0 %v6178_v1  ;;  %4113 = vmatpush1.msk.msra.mxu0 %vm891_vm8, %v4619_v2  ;;  %v1658_v2 = vrot.slane %v4707_v18, %v4726_v24  ;;  %v4949_v18 = vrot.slane %v1654_v57, %v4723_v23  ;;  %v749_v24 = vld [vmem:[%s6253_s30 + $0x58] sm:$0xff] }
  0xb7   : > { %4116 = vmatprep.subr.msk.mxu0 %vm891_vm8, %v1428_v39  ;;  %4346 = vset.pattern.permute.xlu0 %v4468_v3  ;;  %v4469_v39 = vmov 4  }
  0xb8   : > { %v4922_v52 = vrot.slane %v1658_v2, %v4723_v23  ;;  %v1769_v23 = vsel %vm6219_vm15, %v1765_v5, %v1767_v4  ;;  %2332 = vperm.xlu0 %4346, %v5021_v29   ;;  %vm6306_vm15 = vcmp.eq.s32.totalorder %v4792_v56, 1 }
  0xb9   : > { %4111 = vmatmul.mubr.msk.f32.gmra.mrb[2].mxu0 %vm884_vm9, %v745_v42  ;;  %4345 = vset.pattern.permute.xlu1 %v4468_v3  ;;  %v4470_v42 = vmov 5  }
  0xba   : > { %1385 = vmatprep.mubr.f32.mxu0 %v6178_v1  ;;  %vm6174_vm14 = vcmp.eq.s32.totalorder %v4922_v52, 1  ;;  %2328 = vperm.xlu1 %4345, %v4684_v12  }
  0xbb   : > { %v1670_v62 = vsel %vm6174_vm14, %v1650_v58, 0.0  ;;  %vm6176_vm14 = vcmp.eq.s32.totalorder %v4949_v18, 1 }
  0xbc   : > { %v1669_v15 = vsel %vm6176_vm14, %v1649_v6, 0.0  ;;  %vm6218_vm14 = vcmp.eq.s32.totalorder %v4979_v16, 1  ;;  %4347 = vset.pattern.permute.xlu0 %v4469_v39 }
  0xbd   : > { %4114 = vmatmul.mubr.msk.f32.vlgmr.msra.gmra.mrb[0].mxu0 %vm884_vm9, %v746_v48  ;;  %v1791_v25 = vsel %vm6218_vm14, %v1769_v23, 0.0  ;;  %2360 = vperm.xlu0 %4347, %v4684_v12  }
  0xbe   : > { %1391 = vmatprep.mubr.f32.mxu0 %v6178_v1  ;;  %4117 = vmatpush1.msk.msra.mxu0 %vm891_vm8, %v1427_v49 }
  0xbf   : > { %4120 = vmatprep.subr.msk.mxu0 %vm891_vm8, %v1550_v51  ;;  %2336 = vperm.xlu1 %4345, %v4690_v13  }
  0xc1   : > { %4115 = vmatmul.mubr.msk.f32.gmra.mrb[2].mxu0 %vm884_vm9, %v747_v22  ;;  %2372 = vperm.xlu0 %4347, %v5030_v36   ;;  %v1894_v48 = vpop.permute.xlu1 %1893  ;;  %v1889_v49 = vpop.permute.xlu0 %1888  ;;  %v769_v22 = vld [vmem:[%s6246_s25 + $0x18] sm:$0xff] }
  0xc2   : > { %1505 = vmatprep.mubr.f32.mxu0 %v6178_v1 }
  0xc3   : > { %2340 = vperm.xlu1 %4345, %v5030_v36  }
  0xc5   : > { %4118 = vmatmul.mubr.msk.f32.vlgmr.msra.gmra.mrb[0].mxu0 %vm884_vm9, %v748_v60  ;;  %4350 = vset.pattern.permute.xlu0 %v4470_v42 }
  0xc6   : > { %1511 = vmatprep.mubr.f32.mxu0 %v6178_v1  ;;  %4121 = vmatpush1.msk.msra.mxu0 %vm891_vm8, %v1549_v61 }
  0xc7   : > { %4124 = vmatprep.subr.msk.mxu0 %vm891_vm8, %v1670_v62  ;;  %2428 = vperm.xlu0 %4350, %v5021_v29  }
  0xc8   : > { %4348 = vset.pattern.permute.xlu1 %v4469_v39 }
  0xc9   : > { %4119 = vmatmul.mubr.msk.f32.gmra.mrb[2].mxu0 %vm884_vm9, %v749_v24  ;;  %2364 = vperm.xlu1 %4348, %v5021_v29  }
  0xca   : > { %1627 = vmatprep.mubr.f32.mxu0 %v6178_v1 }
  0xcb   : > { %4351 = vset.pattern.permute.xlu0 %v4471_v43 }
  0xcc   : > { %2488 = vperm.xlu0 %4351, %v4684_v12  }
  0xcd   : > { %4122 = vmatmul.mubr.msk.f32.vlgmr.msra.gmra.mrb[0].mxu0 %vm884_vm9, %v750_v11  ;;  %2368 = vperm.xlu1 %4348, %v4690_v13  }
  0xce   : > { %1633 = vmatprep.mubr.f32.mxu0 %v6178_v1  ;;  %4125 = vmatpush1.msk.msra.mxu0 %vm891_vm8, %v1669_v15 }
  0xcf   : > { %4128 = vmatprep.subr.msk.mxu0 %vm891_vm8, %v1792_v17 }
  0xd0   : > { %2500 = vperm.xlu0 %4351, %v5030_v36  }
  0xd1   : > { %4123 = vmatmul.mubr.msk.f32.gmra.mrb[2].mxu0 %vm884_vm9, %v751_v20  ;;  %4349 = vset.pattern.permute.xlu1 %v4470_v42 }
  0xd2   : > { %1747 = vmatprep.mubr.f32.mxu0 %v6178_v1  ;;  %2424 = vperm.xlu1 %4349, %v4684_v12  }
  0xd4   : > { %4354 = vset.pattern.permute.xlu0 %v4472_v44 }
  0xd5   : > { %4126 = vmatmul.mubr.msk.f32.vlgmr.msra.gmra.mrb[0].mxu0 %vm884_vm9, %v752_v21  ;;  %2556 = vperm.xlu0 %4354, %v5021_v29  }
  0xd6   : > { %1753 = vmatprep.mubr.f32.mxu0 %v6178_v1  ;;  %4129 = vmatpush1.msk.msra.mxu0 %vm891_vm8, %v1791_v25  ;;  %vm6216_vm8 = vcmask 130048  }
  0xd7   : > { %2432 = vperm.xlu1 %4349, %v4690_v13  }
  0xd9   : > { %4127 = vmatmul.mubr.msk.f32.gmra.mrb[2].mxu0 %vm884_vm9, %v753_v26  ;;  %4355 = vset.pattern.permute.xlu0 %v4473_v45 }
  0xda   : > { %1869 = vmatprep.mubr.f32.mxu0 %v6178_v1  ;;  %2616 = vperm.xlu0 %4355, %v4684_v12  }
  0xdb   : > { %2436 = vperm.xlu1 %4349, %v5030_v36  }
  0xdd   : > { %4130 = vmatmul.mubr.msk.f32.vlgmr.msra.gmra.mrb[0].mxu0 %vm884_vm9, %v754_v27 }
  0xde   : > { %1875 = vmatprep.mubr.f32.mxu0 %v6178_v1  ;;  %2628 = vperm.xlu0 %4355, %v5030_v36  }
  0xdf   : > { %4352 = vset.pattern.permute.xlu1 %v4471_v43 }
  0xe0   : > { %2492 = vperm.xlu1 %4352, %v5021_v29  }
  0xe1   : > { %4131 = vmatmul.mubr.msk.f32.gmra.mrb[2].mxu0 %vm884_vm9, %v755_v28  ;;  %vm6302_vm9 = vcmp.lt.s32.totalorder %v4738_v31, 15 }
  0xe2   : > { %2074 = vmatprep.mubr.f32.mxu0 %v6178_v1  ;;  %4357 = vset.pattern.permute.xlu0 %v4456_v0 }
  0xe3   : > { %1984 = vperm.xlu0 %4357, %v767_v47   ;;  %v774_v47 = vld [vmem:[%s6264_s9] sm:$0xff] }
  0xe4   : > { %2496 = vperm.xlu1 %4352, %v4690_v13  }
  0xe7   : > { %1994 = vperm.xlu0 %4357, %v769_v22  }
  0xe8   : > { %4353 = vset.pattern.permute.xlu1 %v4472_v44 }
  0xe9   : > { %2552 = vperm.xlu1 %4353, %v4684_v12  }
  0xeb   : > { %2138 = vperm.xlu0 %4357, %v5021_v29  }
  0xed   : > { %2560 = vperm.xlu1 %4353, %v4690_v13  }
  0xef   : > { %2148 = vperm.xlu0 %4357, %v5030_v36  }
  0xf1   : > { %2564 = vperm.xlu1 %4353, %v5030_v36  }
  0xf3   : > { %2654 = vperm.xlu0 %4357, %v775_v9  }
  0xf5   : > { %4356 = vset.pattern.permute.xlu1 %v4473_v45 }
  0xf6   : > { %2620 = vperm.xlu1 %4356, %v5021_v29   ;;  %v776_v29 = vld [vmem:[%s6264_s9 + $0x10] sm:$0xff] }
  0xfa   : > { %2624 = vperm.xlu1 %4356, %v4690_v13  }
  0xfe   : > { %4358 = vset.pattern.permute.xlu1 %v4456_v0 }
  0xff   : > { %2649 = vperm.xlu1 %4358, %v774_v47  }
 0x103   : > { %2659 = vperm.xlu1 %4358, %v776_v29  }
 0x1b0   : > { %v1871_v46 = vpop.f32.mrb[0].mxu0 }
 0x1b1   : > { %v1873_v2 = vpop.f32.mrb[1].mxu0  ;;  %v5061_v14 = vadd.f32 %v1889_v49, %v1871_v46 }
 0x1b2   : > { %v5065_v55 = vadd.f32 %v1889_v49, %v1873_v2 }
 0x1b3   : > { %6260 = vst [vmem:[#allocation5_spill] sm:$0xff] %v5061_v14 }
 0x1b4   : > { %v1877_v51 = vpop.f32.mrb[2].mxu0  ;;  %6262 = vst [vmem:[#allocation7_spill] sm:$0xff] %v5065_v55 }
 0x1b5   : > { %v5063_v53 = vadd.f32 %v1894_v48, %v1877_v51  ;;  %v1879_v54 = vpop.f32.mrb[3].mxu0 }
 0x1b6   : > { %v5067_v57 = vadd.f32 %v1894_v48, %v1879_v54 }
 0x1b7   : > { %6261 = vst [vmem:[#allocation6_spill] sm:$0xff] %v5063_v53  ;;  %v1900_v58 = vadd.f32 %v5063_v53, %v5061_v14 }
 0x1b8   : > { %6263 = vst [vmem:[#allocation8_spill] sm:$0xff] %v5067_v57  ;;  %v1907_v59 = vadd.f32 %v5067_v57, %v5065_v55 }
 0x1b9   : > { %v1901_v60 = vrot.slane %v1900_v58, 4 }
 0x1ba   : > { %v1908_v61 = vrot.slane %v1907_v59, 4 }
 0x1bb   : > { %v1902_v62 = vadd.f32 %v1901_v60, %v1900_v58  ;;  %v777_v58 = vld [vmem:[%s6264_s9 + $0x18] sm:$0xff] }
 0x1bc   : > { %v1909_v24 = vadd.f32 %v1908_v61, %v1907_v59  ;;  %2664 = vperm.xlu1 %4358, %v777_v58  }
 0x1bd   : > { %v1903_v4 = vrot.slane %v1902_v62, 2 }
 0x1be   : > { %v1910_v5 = vrot.slane %v1909_v24, 2 }
 0x1bf   : > { %v1904_v6 = vadd.f32 %v1903_v4, %v1902_v62  ;;  %v1952_v62 = vpop.permute.xlu1 %1951 }
 0x1c0   : > { %v1911_v8 = vadd.f32 %v1910_v5, %v1909_v24  ;;  %v1957_v24 = vpop.permute.xlu0 %1956 }
 0x1c1   : > { %v1905_v11 = vrot.slane %v1904_v6, 1 }
 0x1c2   : > { %v1912_v15 = vrot.slane %v1911_v8, 1 }
 0x1c3   : > { %v1906_v17 = vadd.f32 %v1905_v11, %v1904_v6 }
 0x1c4   : > { %v1913_v20 = vadd.f32 %v1912_v15, %v1911_v8 }
 0x1c5   : > { %v1915_v23 = vmul.f32 0.0625, %v1906_v17 }
 0x1c6   : > { %v1916_v12 = vmul.f32 0.0625, %v1913_v20  ;;  %v1966_v20 = vpop.permute.xlu1 %1965 }
 0x1c7   : > { %v1917_v21 = vsub.f32 %v5061_v14, %v1915_v23  ;;  %v1919_v25 = vsub.f32 %v5063_v53, %v1915_v23 }
 0x1c8   : > { %v1918_v26 = vsub.f32 %v5065_v55, %v1916_v12  ;;  %v1920_v27 = vsub.f32 %v5067_v57, %v1916_v12  ;;  %v1971_v12 = vpop.permute.xlu0 %1970 }
 0x1c9   : > { %v1921_v28 = vmul.f32 %v1917_v21, %v1917_v21  ;;  %v1923_v19 = vmul.f32 %v1919_v25, %v1919_v25 }
 0x1ca   : > { %v1922_v30 = vmul.f32 %v1918_v26, %v1918_v26  ;;  %v1924_v3 = vmul.f32 %v1920_v27, %v1920_v27  ;;  %v1980_v29 = vpop.permute.xlu1 %1979 }
 0x1cb   : > { %v1925_v39 = vadd.f32 %v1923_v19, %v1921_v28 }
 0x1cc   : > { %v1932_v42 = vadd.f32 %v1924_v3, %v1922_v30 }
 0x1cd   : > { %v1926_v43 = vrot.slane %v1925_v39, 4 }
 0x1ce   : > { %v1933_v36 = vrot.slane %v1932_v42, 4 }
 0x1cf   : > { %v1927_v44 = vadd.f32 %v1926_v43, %v1925_v39 }
 0x1d0   : > { %v1934_v46 = vadd.f32 %v1933_v36, %v1932_v42  ;;  %v5117_v36 = vpop.permute.xlu0 %2204 }
 0x1d1   : > { %v1928_v2 = vrot.slane %v1927_v44, 2 }
 0x1d2   : > { %v1935_v48 = vrot.slane %v1934_v46, 2 }
 0x1d3   : > { %v1929_v45 = vadd.f32 %v1928_v2, %v1927_v44 }
 0x1d4   : > { %v1936_v49 = vadd.f32 %v1935_v48, %v1934_v46  ;;  %v5119_v44 = vpop.permute.xlu0 %2264 }
 0x1d5   : > { %v1930_v51 = vrot.slane %v1929_v45, 1 }
 0x1d6   : > { %v1937_v22 = vrot.slane %v1936_v49, 1 }
 0x1d7   : > { %v1931_v13 = vadd.f32 %v1930_v51, %v1929_v45 }
 0x1d8   : > { %v1938_v54 = vadd.f32 %v1937_v22, %v1936_v49  ;;  %v5121_v46 = vpop.permute.xlu0 %2276  ;;  %v5135_v22 = vpop.permute.xlu1 %1989 }
 0x1d9   : > { %v1939_v59 = vmul.f32 0.0625, %v1931_v13 }
 0x1da   : > { %v1940_v60 = vmul.f32 0.0625, %v1938_v54 }
 0x1db   : > { %v1941_v61 = vadd.f32 1e-06, %v1939_v59 }
 0x1dc   : > { %v1942_v0 = vadd.f32 1e-06, %v1940_v60  ;;  %v5123_v47 = vpop.permute.xlu0 %2332  ;;  %v5139_v54 = vpop.permute.xlu1 %2133 }
 0x1dd   : > { %4440 = vrsqrt.f32 %v1941_v61  ;;  %6266 = vst [vmem:[#allocation9_spill] sm:$0xff] %v5123_v47 }
 0x1de   : > { %4442 = vrsqrt.f32 %v1942_v0 }
 0x1e0   : > { %v5125_v2 = vpop.permute.xlu0 %2360  ;;  %v5143_v59 = vpop.permute.xlu1 %2143 }
 0x1e1   : > { %6270 = vst [vmem:[#allocation13_spill] sm:$0xff] %v5143_v59 }
 0x1e4   : > { %v5127_v48 = vpop.permute.xlu0 %2372  ;;  %v5145_v60 = vpop.permute.xlu1 %2200 }
 0x1e7   : > { %v4441_v4 = vpop.eup %4440 }
 0x1e8   : > { %v4443_v5 = vpop.eup %4442  ;;  %v1945_v6 = vmul.f32 %v4441_v4, %v1917_v21  ;;  %v1947_v8 = vmul.f32 %v4441_v4, %v1919_v25  ;;  %v762_v21 = vld [vmem:[%s6265_s27] sm:$0xff]  ;;  %v765_v25 = vld [vmem:[%s6265_s27 + $0x18] sm:$0xff]  ;;  %v5129_v45 = vpop.permute.xlu0 %2428 }
 0x1e9   : > { %v1948_v9 = vmul.f32 %v4443_v5, %v1920_v27  ;;  %v1946_v11 = vmul.f32 %v4443_v5, %v1918_v26  ;;  %v763_v26 = vld [vmem:[%s6265_s27 + $0x8] sm:$0xff]  ;;  %v764_v27 = vld [vmem:[%s6265_s27 + $0x10] sm:$0xff]  ;;  %6267 = vst [vmem:[#allocation10_spill] sm:$0xff] %v5129_v45  ;;  %v5149_v0 = vpop.permute.xlu1 %2208 }
 0x1ea   : > { %v1959_v15 = vmul.f32 %v1952_v62, %v1945_v6  ;;  %v1961_v17 = vmul.f32 %v1957_v24, %v1947_v8  ;;  %6272 = vst [vmem:[#allocation15_spill] sm:$0xff] %v5149_v0 }
 0x1eb   : > { %v1962_v23 = vmul.f32 %v1957_v24, %v1948_v9  ;;  %v1960_v28 = vmul.f32 %v1952_v62, %v1946_v11 }
 0x1ec   : > { %v1973_v19 = vadd.f32 %v1966_v20, %v1959_v15  ;;  %v1975_v30 = vadd.f32 %v1971_v12, %v1961_v17  ;;  %v5131_v49 = vpop.permute.xlu0 %2488 }
 0x1ed   : > { %v1976_v3 = vadd.f32 %v1971_v12, %v1962_v23  ;;  %v1974_v39 = vadd.f32 %v1966_v20, %v1960_v28  ;;  %v5153_v24 = vpop.permute.xlu1 %2212 }
 0x1ee   : > { %v4193_v43 = vpack.c.bf16 %v1975_v30, %v1973_v19 }
 0x1ef   : > { %v4191_v42 = vpack.c.bf16 %v1976_v3, %v1974_v39 }
 0x1f0   : > { %v5133_v51 = vpop.permute.xlu0 %2500 }
 0x1f1   : > { %4192 = vmatprep.subr.bf16.mxu0 %v4191_v42  ;;  %4263 = vmatprep.subr.bf16.mxu1 %v4191_v42  ;;  %v5163_v20 = vpop.permute.xlu1 %2268 }
 0x1f2   : > { %4194 = vmatpush1.bf16.msra.mxu0 %v4193_v43  ;;  %4264 = vmatpush1.bf16.msra.mxu1 %v4193_v43  ;;  %6274 = vst [vmem:[#allocation16_spill] sm:$0xff] %v5163_v20 }
 0x1f4   : > { %v5137_v13 = vpop.permute.xlu0 %2556 }
 0x1f5   : > { %4132 = vmatmul.mubr.msk.f32.vlgmr.msra.gmra.mrb[4].mxu0 %vm6216_vm8, %v762_v21  ;;  %4135 = vmatmul.mubr.msk.f32.vlgmr.msra.gmra.mrb[0].mxu1 %vm6216_vm8, %v765_v25  ;;  %6268 = vst [vmem:[#allocation11_spill] sm:$0xff] %v5137_v13  ;;  %v5171_v19 = vpop.permute.xlu1 %2272 }
 0x1f6   : > { %2080 = vmatprep.mubr.f32.mxu0 %v6178_v1  ;;  %2749 = vmatprep.mubr.f32.mxu1 %v6178_v1  ;;  %6276 = vst [vmem:[#allocation17_spill] sm:$0xff] %v5171_v19 }
 0x1f8   : > { %v5141_v58 = vpop.permute.xlu0 %2616 }
 0x1f9   : > { %4133 = vmatmul.mubr.msk.f32.gmra.mrb[6].mxu0 %vm6216_vm8, %v763_v26  ;;  %6269 = vst [vmem:[#allocation12_spill] sm:$0xff] %v5141_v58  ;;  %v5181_v30 = vpop.permute.xlu1 %2328 }
 0x1fa   : > { %2086 = vmatprep.mubr.f32.mxu0 %v6178_v1 }
 0x1fc   : > { %v5147_v61 = vpop.permute.xlu0 %2628 }
 0x1fd   : > { %4134 = vmatmul.mubr.msk.f32.gmra.mrb[8].mxu0 %vm6216_vm8, %v764_v27  ;;  %6271 = vst [vmem:[#allocation14_spill] sm:$0xff] %v5147_v61  ;;  %v5187_v3 = vpop.permute.xlu1 %2336  ;;  %vm6303_vm8 = vmmov %vm6302_vm9 }
 0x1fe   : > { %6280 = vst [vmem:[#allocation18_spill] sm:$0xff] %v5187_v3  ;;  %vm6304_vm4 = vmmov %vm6303_vm8 }
 0x1ff   : > { %vm6305_vm14 = vmmov %vm6304_vm4 }
 0x200   : > { %v5151_v62 = vpop.permute.xlu0 %1984 }
 0x201   : > { %v5197_v39 = vpop.permute.xlu1 %2340 }
 0x204   : > { %v1995_v4 = vpop.permute.xlu0 %1994 }
 0x205   : > { %v5207_v21 = vpop.permute.xlu1 %2364 }
 0x206   : > { %6284 = vst [vmem:[#allocation19_spill] sm:$0xff] %v5207_v21 }
 0x209   : > { %v5217_v25 = vpop.permute.xlu1 %2368 }
 0x20a   : > { %6285 = vst [vmem:[#allocation20_spill] sm:$0xff] %v5217_v25 }
 0x20d   : > { %v5223_v26 = vpop.permute.xlu1 %2424 }
 0x211   : > { %v5233_v27 = vpop.permute.xlu1 %2432 }
 0x212   : > { %6286 = vst [vmem:[#allocation21_spill] sm:$0xff] %v5233_v27 }
 0x2c8   : > { %v2076_v5 = vpop.f32.mrb[4].mxu0  ;;  %v2094_v6 = vpop.f32.mrb[0].mxu1 }
 0x2c9   : > { %v5155_v8 = vadd.f32 %v2076_v5, %v1980_v29  ;;  %v5157_v9 = vadd.f32 %v2094_v6, %v1995_v4  ;;  %v2078_v11 = vpop.f32.mrb[5].mxu0  ;;  %v2096_v15 = vpop.f32.mrb[1].mxu1 }
 0x2ca   : > { %v5203_v42 = vadd.f32 %v2078_v11, %v1980_v29  ;;  %v5205_v43 = vadd.f32 %v2096_v15, %v1995_v4  ;;  %v5239_v29 = vpop.permute.xlu1 %2436 }
 0x2cb   : > { %2099 = vrot.lane.b32.xlu0 %v5155_v8, %s6273_s6  ;;  %2105 = vrot.lane.b32.xlu1 %v5157_v9, %s6273_s6 }
 0x2cc   : > { %v2082_v17 = vpop.f32.mrb[6].mxu0 }
 0x2cd   : > { %v2084_v23 = vpop.f32.mrb[7].mxu0  ;;  %v5246_v4 = vadd.f32 %v2082_v17, %v5151_v62 }
 0x2ce   : > { %v5248_v5 = vpop.permute.xlu1 %2492  ;;  %v5265_v11 = vadd.f32 %v2084_v23, %v5151_v62 }
 0x2cf   : > { %2167 = vrot.lane.b32.xlu0 %v5155_v8, %s6275_s29  ;;  %2173 = vrot.lane.b32.xlu1 %v5157_v9, %s6275_s29  ;;  %6287 = vst [vmem:[#allocation22_spill] sm:$0xff] %v5246_v4  ;;  %6288 = vst [vmem:[#allocation23_spill] sm:$0xff] %v5248_v5 }
 0x2d0   : > { %v2088_v12 = vpop.f32.mrb[8].mxu0  ;;  %6290 = vst [vmem:[#allocation25_spill] sm:$0xff] %v5265_v11 }
 0x2d1   : > { %v5169_v28 = vpop.f32.mrb[9].mxu0  ;;  %v5284_v62 = vadd.f32 %v2088_v12, %v5135_v22  ;;  %v5308_v12 = vpop.permute.xlu0 %2138 }
 0x2d2   : > { %v5258_v6 = vpop.permute.xlu1 %2496  ;;  %v5318_v53 = vadd.f32 %v5169_v28, %v5135_v22 }
 0x2d3   : > { %2237 = vrot.lane.b32.xlu0 %v5157_v9, %s6277_s2  ;;  %2231 = vrot.lane.b32.xlu1 %v5155_v8, %s6277_s2  ;;  %6289 = vst [vmem:[#allocation24_spill] sm:$0xff] %v5258_v6  ;;  %6292 = vst [vmem:[#allocation27_spill] sm:$0xff] %v5284_v62 }
 0x2d4   : > { %6296 = vst [vmem:[#allocation31_spill] sm:$0xff] %v5318_v53 }
 0x2d5   : > { %v2149_v14 = vpop.permute.xlu0 %2148 }
 0x2d6   : > { %v5267_v15 = vpop.permute.xlu1 %2552 }
 0x2d7   : > { %2295 = vrot.lane.b32.xlu0 %v5155_v8, %s6278_s8  ;;  %2301 = vrot.lane.b32.xlu1 %v5157_v9, %s6278_s8 }
 0x2da   : > { %v5273_v17 = vpop.permute.xlu1 %2560 }
 0x2db   : > { %2391 = vrot.lane.b32.xlu0 %v5155_v8, %s6279_s4  ;;  %2397 = vrot.lane.b32.xlu1 %v5157_v9, %s6279_s4  ;;  %6291 = vst [vmem:[#allocation26_spill] sm:$0xff] %v5273_v17 }
 0x2de   : > { %v5286_v23 = vpop.permute.xlu1 %2564 }
 0x2df   : > { %2461 = vrot.lane.b32.xlu0 %v5157_v9, %s6281_s0  ;;  %2455 = vrot.lane.b32.xlu1 %v5155_v8, %s6281_s0 }
 0x2e2   : > { %v5292_v1 = vpop.permute.xlu1 %2620 }
 0x2e3   : > { %2525 = vrot.lane.b32.xlu0 %v5157_v9, %s6282_s28  ;;  %2519 = vrot.lane.b32.xlu1 %v5155_v8, %s6282_s28  ;;  %6293 = vst [vmem:[#allocation28_spill] sm:$0xff] %v5292_v1 }
 0x2e6   : > { %v5298_v57 = vpop.permute.xlu1 %2624 }
 0x2e7   : > { %2583 = vrot.lane.b32.xlu0 %v5155_v8, %s6283_s1  ;;  %2589 = vrot.lane.b32.xlu1 %v5157_v9, %s6283_s1  ;;  %6294 = vst [vmem:[#allocation29_spill] sm:$0xff] %v5298_v57 }
 0x2ea   : > { %v5310_v55 = vpop.permute.xlu1 %2649 }
 0x2eb   : > { %2107 = vrot.lane.b32.xlu0 %v5203_v42, %s6273_s6  ;;  %2113 = vrot.lane.b32.xlu1 %v5205_v43, %s6273_s6  ;;  %6295 = vst [vmem:[#allocation30_spill] sm:$0xff] %v5310_v55  ;;  %v5330_v55 = vpop.permute.xlu0 %2654 }
 0x2ec   : > { %6298 = vst [vmem:[#allocation33_spill] sm:$0xff] %v5330_v55 }
 0x2ee   : > { %v5320_v57 = vpop.permute.xlu1 %2659 }
 0x2ef   : > { %2175 = vrot.lane.b32.xlu0 %v5203_v42, %s6275_s29  ;;  %2181 = vrot.lane.b32.xlu1 %v5205_v43, %s6275_s29  ;;  %6297 = vst [vmem:[#allocation32_spill] sm:$0xff] %v5320_v57 }
 0x2f2   : > { %v5332_v61 = vpop.permute.xlu1 %2664 }
 0x2f3   : > { %2245 = vrot.lane.b32.xlu0 %v5205_v43, %s6277_s2  ;;  %2239 = vrot.lane.b32.xlu1 %v5203_v42, %s6277_s2  ;;  %6299 = vst [vmem:[#allocation34_spill] sm:$0xff] %v5332_v61 }
 0x2f7   : > { %2303 = vrot.lane.b32.xlu0 %v5203_v42, %s6278_s8  ;;  %2309 = vrot.lane.b32.xlu1 %v5205_v43, %s6278_s8 }
 0x2fb   : > { %2399 = vrot.lane.b32.xlu0 %v5203_v42, %s6279_s4  ;;  %2405 = vrot.lane.b32.xlu1 %v5205_v43, %s6279_s4 }
 0x2ff   : > { %2469 = vrot.lane.b32.xlu0 %v5205_v43, %s6281_s0  ;;  %2463 = vrot.lane.b32.xlu1 %v5203_v42, %s6281_s0 }
 0x303   : > { %2533 = vrot.lane.b32.xlu0 %v5205_v43, %s6282_s28  ;;  %2527 = vrot.lane.b32.xlu1 %v5203_v42, %s6282_s28 }
 0x307   : > { %2233 = vrot.lane.b32.xlu0 %v5246_v4, %s6277_s2  ;;  %2101 = vrot.lane.b32.xlu1 %v5246_v4, %s6273_s6 }
 0x30b   : > { %2457 = vrot.lane.b32.xlu0 %v5246_v4, %s6281_s0  ;;  %2169 = vrot.lane.b32.xlu1 %v5246_v4, %s6275_s29 }
 0x30f   : > { %2521 = vrot.lane.b32.xlu0 %v5246_v4, %s6282_s28  ;;  %2297 = vrot.lane.b32.xlu1 %v5246_v4, %s6278_s8 }
 0x313   : > { %2241 = vrot.lane.b32.xlu0 %v5265_v11, %s6277_s2  ;;  %2393 = vrot.lane.b32.xlu1 %v5246_v4, %s6279_s4 }
 0x317   : > { %2465 = vrot.lane.b32.xlu0 %v5265_v11, %s6281_s0  ;;  %2585 = vrot.lane.b32.xlu1 %v5246_v4, %s6283_s1 }
 0x31b   : > { %2529 = vrot.lane.b32.xlu0 %v5265_v11, %s6282_s28  ;;  %2109 = vrot.lane.b32.xlu1 %v5265_v11, %s6273_s6 }
 0x31f   : > { %2103 = vrot.lane.b32.xlu0 %v5284_v62, %s6273_s6  ;;  %2177 = vrot.lane.b32.xlu1 %v5265_v11, %s6275_s29 }
 0x323   : > { %2171 = vrot.lane.b32.xlu0 %v5284_v62, %s6275_s29  ;;  %2305 = vrot.lane.b32.xlu1 %v5265_v11, %s6278_s8 }
 0x327   : > { %2299 = vrot.lane.b32.xlu0 %v5284_v62, %s6278_s8  ;;  %2401 = vrot.lane.b32.xlu1 %v5265_v11, %s6279_s4 }
 0x32b   : > { %2395 = vrot.lane.b32.xlu0 %v5284_v62, %s6279_s4  ;;  %2235 = vrot.lane.b32.xlu1 %v5284_v62, %s6277_s2 }
 0x32f   : > { %2587 = vrot.lane.b32.xlu0 %v5284_v62, %s6283_s1  ;;  %2459 = vrot.lane.b32.xlu1 %v5284_v62, %s6281_s0 }
 0x333   : > { %2111 = vrot.lane.b32.xlu0 %v5318_v53, %s6273_s6  ;;  %2523 = vrot.lane.b32.xlu1 %v5284_v62, %s6282_s28 }
 0x337   : > { %2179 = vrot.lane.b32.xlu0 %v5318_v53, %s6275_s29  ;;  %2243 = vrot.lane.b32.xlu1 %v5318_v53, %s6277_s2 }
 0x33b   : > { %2307 = vrot.lane.b32.xlu0 %v5318_v53, %s6278_s8  ;;  %2593 = vrot.lane.b32.xlu1 %v5265_v11, %s6283_s1 }
 0x33d   : > { %v2106_v22 = vpop.permute.xlu1 %2105  ;;  %v2100_v28 = vpop.permute.xlu0 %2099 }
 0x33f   : > { %2403 = vrot.lane.b32.xlu0 %v5318_v53, %s6279_s4  ;;  %2467 = vrot.lane.b32.xlu1 %v5318_v53, %s6281_s0 }
 0x341   : > { %v2174_v57 = vpop.permute.xlu1 %2173  ;;  %v2168_v58 = vpop.permute.xlu0 %2167 }
 0x343   : > { %2591 = vrot.lane.b32.xlu0 %v5203_v42, %s6283_s1  ;;  %2531 = vrot.lane.b32.xlu1 %v5318_v53, %s6282_s28 }
 0x345   : > { %v2232_v61 = vpop.permute.xlu1 %2231  ;;  %v2238_v55 = vpop.permute.xlu0 %2237 }
 0x347   : > { %2595 = vrot.lane.b32.xlu0 %v5318_v53, %s6283_s1  ;;  %2597 = vrot.lane.b32.xlu1 %v5205_v43, %s6283_s1 }
 0x349   : > { %v5350_v17 = vpop.permute.xlu1 %2301  ;;  %v5352_v27 = vpop.permute.xlu0 %2295 }
 0x34d   : > { %v5354_v6 = vpop.permute.xlu1 %2397  ;;  %v5356_v1 = vpop.permute.xlu0 %2391 }
 0x351   : > { %v5358_v3 = vpop.permute.xlu1 %2455  ;;  %v5360_v63 = vpop.permute.xlu0 %2461 }
 0x355   : > { %v5362_v16 = vpop.permute.xlu1 %2519  ;;  %v5364_v13 = vpop.permute.xlu0 %2525 }
 0x359   : > { %v5366_v53 = vpop.permute.xlu1 %2589  ;;  %v5368_v25 = vpop.permute.xlu0 %2583 }
 0x35a   : > { %6300 = vst [vmem:[#allocation35_spill] sm:$0xff] %v5366_v53  ;;  %6301 = vst [vmem:[#allocation36_spill] sm:$0xff] %v5368_v25 }
 0x35d   : > { %v2114_v62 = vpop.permute.xlu1 %2113  ;;  %v2108_v19 = vpop.permute.xlu0 %2107 }
 0x35e   : > { %v2118_v0 = vsel %vm827_vm6, %v2106_v22, %v2114_v62  ;;  %v2122_v59 = vsel %vm827_vm6, %v2114_v62, %v2106_v22  ;;  %v2115_v5 = vsel %vm827_vm6, %v2100_v28, %v2108_v19  ;;  %v2119_v45 = vsel %vm827_vm6, %v2108_v19, %v2100_v28 }
 0x35f   : > { %v2129_v11 = vsel %vm6221_vm13, %v2122_v59, 0.0  ;;  %v2130_v53 = vsel %vm6220_vm12, %v2118_v0, 0.0  ;;  %v2123_v25 = vsel %vm6221_vm13, %v2119_v45, 0.0  ;;  %v2124_v21 = vsel %vm6220_vm12, %v2115_v5, 0.0  ;;  %vm6308_vm13 = vmmov %vm6306_vm15 }
 0x360   : > { %v2157_v4 = vmul.f32 %v2149_v14, %v2129_v11  ;;  %v2158_v62 = vmul.f32 %v2149_v14, %v2130_v53  ;;  %v2151_v22 = vmul.f32 %v5139_v54, %v2123_v25  ;;  %v2152_v47 = vmul.f32 %v5139_v54, %v2124_v21 }
 0x361   : > { %v2182_v20 = vpop.permute.xlu1 %2181  ;;  %v2176_v19 = vpop.permute.xlu0 %2175  ;;  %vm6307_vm12 = vcmp.eq.s32.totalorder %v4760_v40, 1 }
 0x362   : > { %v2186_v59 = vsel %vm861_vm7, %v2174_v57, %v2182_v20  ;;  %v2190_v0 = vsel %vm861_vm7, %v2182_v20, %v2174_v57  ;;  %v2183_v45 = vsel %vm861_vm7, %v2168_v58, %v2176_v19  ;;  %v2187_v5 = vsel %vm861_vm7, %v2176_v19, %v2168_v58 }
 0x363   : > { %v2197_v14 = vsel %vm880_vm11, %v2190_v0, 0.0  ;;  %v2198_v53 = vsel %vm881_vm10, %v2186_v59, 0.0  ;;  %v2191_v54 = vsel %vm880_vm11, %v2187_v5, 0.0  ;;  %v2192_v21 = vsel %vm881_vm10, %v2183_v45, 0.0 }
 0x364   : > { %v2221_v57 = vmul.f32 %v5153_v24, %v2197_v14  ;;  %v2222_v20 = vmul.f32 %v5153_v24, %v2198_v53  ;;  %v2215_v25 = vmul.f32 %v5145_v60, %v2191_v54  ;;  %v2216_v58 = vmul.f32 %v5145_v60, %v2192_v21 }
 0x365   : > { %v2240_v11 = vpop.permute.xlu1 %2239  ;;  %v2246_v28 = vpop.permute.xlu0 %2245  ;;  %v2382_v19 = vmul.f32 %v5127_v48, %v5205_v43  ;;  %v2381_v59 = vmul.f32 %v5127_v48, %v5157_v9  ;;  %v2375_v0 = vmul.f32 %v5125_v2, %v5155_v8  ;;  %v2376_v45 = vmul.f32 %v5125_v2, %v5203_v42 }
 0x366   : > { %v2229_v5 = vadd.f32 %v2221_v57, %v2157_v4  ;;  %v2230_v24 = vadd.f32 %v2222_v20, %v2158_v62  ;;  %v2223_v14 = vadd.f32 %v2215_v25, %v2151_v22  ;;  %v2224_v53 = vadd.f32 %v2216_v58, %v2152_v47 }
 0x367   : > { %v2247_v60 = vsel %vm6302_vm9, %v2232_v61, %v2240_v11  ;;  %v2251_v54 = vsel %vm6303_vm8, %v2240_v11, %v2232_v61  ;;  %v2250_v43 = vsel %vm6304_vm4, %v2238_v55, %v2246_v28  ;;  %v2254_v48 = vsel %vm6305_vm14, %v2246_v28, %v2238_v55  ;;  %vm6309_vm9 = vmmov %vm6307_vm12 }
 0x368   : > { %v2255_v8 = vsel %vm6306_vm15, %v2251_v54, 0.0  ;;  %v2256_v2 = vsel %vm6307_vm12, %v2247_v60, 0.0  ;;  %v2261_v47 = vsel %vm6308_vm13, %v2254_v48, 0.0  ;;  %v2262_v9 = vsel %vm6309_vm9, %v2250_v43, 0.0 }
 0x369   : > { %v2279_v61 = vmul.f32 %v5119_v44, %v2255_v8  ;;  %v2280_v42 = vmul.f32 %v5119_v44, %v2256_v2  ;;  %v2285_v4 = vmul.f32 %v5121_v46, %v2261_v47  ;;  %v2286_v55 = vmul.f32 %v5121_v46, %v2262_v9  ;;  %v2310_v62 = vpop.permute.xlu1 %2309  ;;  %v2304_v22 = vpop.permute.xlu0 %2303 }
 0x36a   : > { %vm6310_vm14 = vcmp.lt.s32.totalorder %v4738_v31, 1  ;;  %vm6314_vm15 = vcmp.eq.s32.totalorder %v4827_v10, 1  ;;  %vm6316_vm9 = vcmp.lt.s32.totalorder %v4738_v31, 127 }
 0x36b   : > { %v2314_v21 = vsel %vm6310_vm14, %v5350_v17, %v2310_v62  ;;  %vm6311_vm12 = vmmov %vm6310_vm14  ;;  %v2287_v25 = vadd.f32 %v2279_v61, %v2223_v14  ;;  %v2288_v46 = vadd.f32 %v2280_v42, %v2224_v53  ;;  %v2293_v58 = vadd.f32 %v2285_v4, %v2229_v5 }
 0x36c   : > { %v2318_v57 = vsel %vm6311_vm12, %v2310_v62, %v5350_v17  ;;  %vm6312_vm13 = vmmov %vm6311_vm12  ;;  %v2294_v11 = vadd.f32 %v2286_v55, %v2230_v24  ;;  %v2326_v60 = vsel %vm4816_vm5, %v2314_v21, 0.0 }
 0x36d   : > { %v2311_v20 = vsel %vm6312_vm13, %v5352_v27, %v2304_v22  ;;  %vm6313_vm4 = vmmov %vm6311_vm12  ;;  %v2325_v28 = vsel %vm6314_vm15, %v2318_v57, 0.0  ;;  %v2406_v24 = vpop.permute.xlu1 %2405  ;;  %v2400_v53 = vpop.permute.xlu0 %2399 }
 0x36e   : > { %v2315_v44 = vsel %vm6313_vm4, %v2304_v22, %v5352_v27  ;;  %vm6315_vm8 = vmmov %vm6314_vm15  ;;  %v2320_v54 = vsel %vm4816_vm5, %v2311_v20, 0.0  ;;  %v2349_v43 = vmul.f32 %v5197_v39, %v2325_v28  ;;  %v2350_v27 = vmul.f32 %v5197_v39, %v2326_v60 }
 0x36f   : > { %v2319_v17 = vsel %vm6315_vm8, %v2315_v44, 0.0  ;;  %v2344_v5 = vmul.f32 %v5181_v30, %v2320_v54  ;;  %v2410_v48 = vsel %vm6316_vm9, %v5354_v6, %v2406_v24  ;;  %vm6317_vm14 = vmmov %vm6316_vm9  ;;  %vm6320_vm4 = vcmp.eq.s32.totalorder %v4916_v50, 1 }
 0x370   : > { %v2343_v14 = vmul.f32 %v5181_v30, %v2319_v17  ;;  %v2414_v8 = vsel %vm6317_vm14, %v2406_v24, %v5354_v6  ;;  %vm6318_vm12 = vmmov %vm6316_vm9  ;;  %v2357_v47 = vadd.f32 %v2349_v43, %v2293_v58  ;;  %v2358_v30 = vadd.f32 %v2350_v27, %v2294_v11 }
 0x371   : > { %v2407_v2 = vsel %vm6318_vm12, %v5356_v1, %v2400_v53  ;;  %vm6319_vm13 = vmmov %vm6316_vm9  ;;  %v2352_v61 = vadd.f32 %v2344_v5, %v2288_v46  ;;  %v2421_v42 = vsel %vm1425_vm0, %v2410_v48, 0.0  ;;  %v2422_v4 = vsel %vm4869_vm2, %v2414_v8, 0.0  ;;  %v2464_v57 = vpop.permute.xlu1 %2463  ;;  %v2470_v20 = vpop.permute.xlu0 %2469 }
 0x372   : > { %v2411_v39 = vsel %vm6319_vm13, %v2400_v53, %v5356_v1  ;;  %v2351_v9 = vadd.f32 %v2343_v14, %v2287_v25  ;;  %v2415_v6 = vsel %vm1425_vm0, %v2407_v2, 0.0  ;;  %v2389_v62 = vadd.f32 %v2381_v59, %v2357_v47  ;;  %vm6322_vm8 = vmmov %vm6320_vm4 }
 0x373   : > { %v2416_v55 = vsel %vm4869_vm2, %v2411_v39, 0.0  ;;  %v2390_v22 = vadd.f32 %v2382_v19, %v2358_v30  ;;  %v2445_v1 = vmul.f32 %v5239_v29, %v2421_v42  ;;  %v2446_v21 = vmul.f32 %v5239_v29, %v2422_v4 }
 0x374   : > { %v2383_v44 = vadd.f32 %v2375_v0, %v2351_v9  ;;  %v2384_v25 = vadd.f32 %v2376_v45, %v2352_v61  ;;  %v2439_v46 = vmul.f32 %v5223_v26, %v2415_v6  ;;  %v2440_v58 = vmul.f32 %v5223_v26, %v2416_v55 }
 0x375   : > { %v2453_v11 = vadd.f32 %v2445_v1, %v2389_v62  ;;  %v2454_v28 = vadd.f32 %v2446_v21, %v2390_v22  ;;  %v2471_v60 = vsel %vm1526_vm3, %v5358_v3, %v2464_v57  ;;  %v2475_v19 = vsel %vm1526_vm3, %v2464_v57, %v5358_v3  ;;  %v2528_v43 = vpop.permute.xlu1 %2527  ;;  %v2534_v27 = vpop.permute.xlu0 %2533 }
 0x376   : > { %v2447_v59 = vadd.f32 %v2439_v46, %v2383_v44  ;;  %v2448_v29 = vadd.f32 %v2440_v58, %v2384_v25  ;;  %v2479_v0 = vsel %vm6320_vm4, %v2471_v60, 0.0  ;;  %vm6321_vm15 = vcmp.eq.s32.totalorder %v4885_v41, 1 }
 0x377   : > { %v2480_v45 = vsel %vm6321_vm15, %v2475_v19, 0.0  ;;  %v2503_v26 = vmul.f32 %v5131_v49, %v2479_v0  ;;  %v2474_v54 = vsel %vm1526_vm3, %v5360_v63, %v2470_v20  ;;  %v2478_v3 = vsel %vm1526_vm3, %v2470_v20, %v5360_v63  ;;  %vm6323_vm9 = vmmov %vm6321_vm15 }
 0x378   : > { %v2504_v17 = vmul.f32 %v5131_v49, %v2480_v45  ;;  %v2485_v14 = vsel %vm6322_vm8, %v2474_v54, 0.0  ;;  %v2486_v5 = vsel %vm6323_vm9, %v2478_v3, 0.0  ;;  %v2535_v49 = vsel %vm1648_vm1, %v5362_v16, %v2528_v43 }
 0x379   : > { %v2539_v24 = vsel %vm1648_vm1, %v2528_v43, %v5362_v16  ;;  %v2511_v53 = vadd.f32 %v2503_v26, %v2447_v59  ;;  %v2509_v63 = vmul.f32 %v5133_v51, %v2485_v14  ;;  %v2510_v8 = vmul.f32 %v5133_v51, %v2486_v5  ;;  %v2102_v42 = vpop.permute.xlu1 %2101  ;;  %v2234_v4 = vpop.permute.xlu0 %2233 }
 0x37a   : > { %v2512_v48 = vadd.f32 %v2504_v17, %v2448_v29  ;;  %vm6324_vm14 = vcmp.eq.s32.totalorder %v4949_v18, 1  ;;  %vm6325_vm12 = vcmp.eq.s32.totalorder %v4922_v52, 1  ;;  %v2538_v47 = vsel %vm1648_vm1, %v5364_v13, %v2534_v27 }
 0x37b   : > { %v2543_v2 = vsel %vm6324_vm14, %v2535_v49, 0.0  ;;  %v2544_v39 = vsel %vm6325_vm12, %v2539_v24, 0.0  ;;  %v2542_v16 = vsel %vm1648_vm1, %v2534_v27, %v5364_v13  ;;  %v2517_v30 = vadd.f32 %v2509_v63, %v2453_v11  ;;  %vm6326_vm13 = vmmov %vm6324_vm14 }
 0x37c   : > { %v2518_v9 = vadd.f32 %v2510_v8, %v2454_v28  ;;  %v2567_v61 = vmul.f32 %v5267_v15, %v2543_v2  ;;  %v2568_v51 = vmul.f32 %v5267_v15, %v2544_v39  ;;  %v2549_v6 = vsel %vm6326_vm13, %v2538_v47, 0.0  ;;  %vm6327_vm4 = vmmov %vm6325_vm12 }
 0x37d   : > { %v2550_v55 = vsel %vm6327_vm4, %v2542_v16, 0.0  ;;  %v2573_v13 = vmul.f32 %v5286_v23, %v2549_v6  ;;  %v2170_v15 = vpop.permute.xlu1 %2169  ;;  %v2458_v20 = vpop.permute.xlu0 %2457  ;;  %vm6328_vm15 = vcmp.eq.s32.totalorder %v4751_v38, 1  ;;  %vm6329_vm8 = vcmp.eq.s32.totalorder %v4747_v34, 1 }
 0x37e   : > { %v5530_v62 = vadd.f32 %v2567_v61, %v2511_v53  ;;  %v5532_v22 = vadd.f32 %v2568_v51, %v2512_v48  ;;  %v2574_v1 = vmul.f32 %v5286_v23, %v2550_v55  ;;  %vm6330_vm9 = vcmp.lt.s32.totalorder %v4738_v31, 15  ;;  %v6337_v51 = vld [vmem:[#allocation16_spill] sm:$0xff] }
 0x37f   : > { %v5536_v21 = vadd.f32 %v2573_v13, %v2517_v30  ;;  %vm6331_vm14 = vmmov %vm6330_vm9  ;;  %vm6332_vm12 = vcmp.lt.s32.totalorder %v4738_v31, 1  ;;  %vm6334_vm4 = vcmp.eq.s32.totalorder %v4792_v56, 1  ;;  %v6338_v13 = vld [vmem:[#allocation9_spill] sm:$0xff] }
 0x380   : > { %v5538_v57 = vadd.f32 %v2574_v1, %v2518_v9  ;;  %vm6333_vm13 = vmmov %vm6332_vm12 }
 0x381   : > { %v2298_v44 = vpop.permute.xlu1 %2297  ;;  %v2522_v25 = vpop.permute.xlu0 %2521 }
 0x385   : > { %v2394_v46 = vpop.permute.xlu1 %2393  ;;  %v2242_v58 = vpop.permute.xlu0 %2241 }
 0x386   : > { %v2248_v27 = vsel %vm6330_vm9, %v2234_v4, %v2242_v58  ;;  %v2252_v14 = vsel %vm6331_vm14, %v2242_v58, %v2234_v4  ;;  %vm6339_vm9 = vcmp.lt.s32.totalorder %v4738_v31, 127 }
 0x387   : > { %v2257_v39 = vsel %vm6334_vm4, %v2252_v14, 0.0  ;;  %vm6340_vm14 = vmmov %vm6339_vm9  ;;  %vm6348_vm4 = vcmp.eq.s32.totalorder %v4949_v18, 1 }
 0x389   : > { %v5540_v11 = vpop.permute.xlu1 %2585  ;;  %v2466_v28 = vpop.permute.xlu0 %2465 }
 0x38d   : > { %v2110_v60 = vpop.permute.xlu1 %2109  ;;  %v2530_v19 = vpop.permute.xlu0 %2529 }
 0x38e   : > { %v2116_v59 = vsel %vm827_vm6, %v2102_v42, %v2110_v60  ;;  %v2120_v23 = vsel %vm827_vm6, %v2110_v60, %v2102_v42  ;;  %v2281_v42 = vmul.f32 %v6337_v51, %v2257_v39 }
 0x38f   : > { %v2125_v3 = vsel %vm6328_vm15, %v2120_v23, 0.0  ;;  %v2126_v43 = vsel %vm6329_vm8, %v2116_v59, 0.0  ;;  %vm6335_vm15 = vcmp.eq.s32.totalorder %v4760_v40, 1  ;;  %vm6336_vm8 = vcmp.eq.s32.totalorder %v4827_v10, 1 }
 0x390   : > { %v2153_v48 = vmul.f32 %v5308_v12, %v2125_v3  ;;  %v2154_v63 = vmul.f32 %v5308_v12, %v2126_v43  ;;  %v2258_v47 = vsel %vm6335_vm15, %v2248_v27, 0.0  ;;  %v2472_v23 = vsel %vm1526_vm3, %v2458_v20, %v2466_v28  ;;  %v6341_v27 = vld [vmem:[#allocation22_spill] sm:$0xff] }
 0x391   : > { %v2178_v29 = vpop.permute.xlu1 %2177  ;;  %v2104_v0 = vpop.permute.xlu0 %2103  ;;  %v2282_v4 = vmul.f32 %v6337_v51, %v2258_v47  ;;  %vm6349_vm15 = vcmp.eq.s32.totalorder %v4922_v52, 1 }
 0x392   : > { %v2184_v45 = vsel %vm861_vm7, %v2170_v15, %v2178_v29  ;;  %v2188_v26 = vsel %vm861_vm7, %v2178_v29, %v2170_v15  ;;  %v2476_v29 = vsel %vm1526_vm3, %v2466_v28, %v2458_v20 }
 0x393   : > { %v2193_v17 = vsel %vm880_vm11, %v2188_v26, 0.0  ;;  %v2194_v54 = vsel %vm881_vm10, %v2184_v45, 0.0 }
 0x394   : > { %v2217_v5 = vmul.f32 %v5117_v36, %v2193_v17  ;;  %v2218_v49 = vmul.f32 %v5117_v36, %v2194_v54 }
 0x395   : > { %v2306_v24 = vpop.permute.xlu1 %2305  ;;  %v2172_v53 = vpop.permute.xlu0 %2171 }
 0x396   : > { %v2312_v8 = vsel %vm6332_vm12, %v2298_v44, %v2306_v24  ;;  %v2316_v2 = vsel %vm6333_vm13, %v2306_v24, %v2298_v44  ;;  %v2225_v16 = vadd.f32 %v2217_v5, %v2153_v48  ;;  %v2226_v36 = vadd.f32 %v2218_v49, %v2154_v63  ;;  %v6343_v5 = vld [vmem:[#allocation25_spill] sm:$0xff] }
 0x397   : > { %v2321_v12 = vsel %vm6336_vm8, %v2316_v2, 0.0  ;;  %v2322_v61 = vsel %vm4816_vm5, %v2312_v8, 0.0  ;;  %vm6344_vm12 = vcmp.eq.s32.totalorder %v4916_v50, 1  ;;  %vm6345_vm13 = vcmp.eq.s32.totalorder %v4885_v41, 1  ;;  %v6346_v2 = vld [vmem:[#allocation10_spill] sm:$0xff] }
 0x398   : > { %v2289_v6 = vadd.f32 %v2281_v42, %v2225_v16  ;;  %v2290_v55 = vadd.f32 %v2282_v4, %v2226_v36  ;;  %v2345_v1 = vmul.f32 %v6338_v13, %v2321_v12  ;;  %v2346_v15 = vmul.f32 %v6338_v13, %v2322_v61  ;;  %v6347_v61 = vld [vmem:[#allocation23_spill] sm:$0xff] }
 0x399   : > { %v2402_v30 = vpop.permute.xlu1 %2401  ;;  %v5574_v9 = vpop.permute.xlu0 %2299  ;;  %v2481_v20 = vsel %vm6344_vm12, %v2472_v23, 0.0  ;;  %v2482_v28 = vsel %vm6345_vm13, %v2476_v29, 0.0  ;;  %v2536_v24 = vsel %vm1648_vm1, %v2522_v25, %v2530_v19  ;;  %v2540_v48 = vsel %vm1648_vm1, %v2530_v19, %v2522_v25 }
 0x39a   : > { %v2408_v60 = vsel %vm6339_vm9, %v2394_v46, %v2402_v30  ;;  %v2412_v59 = vsel %vm6340_vm14, %v2402_v30, %v2394_v46  ;;  %v2353_v45 = vadd.f32 %v2345_v1, %v2289_v6  ;;  %v2354_v26 = vadd.f32 %v2346_v15, %v2290_v55  ;;  %v6342_v46 = vld [vmem:[#allocation19_spill] sm:$0xff] }
 0x39b   : > { %v2417_v3 = vsel %vm1425_vm0, %v2408_v60, 0.0  ;;  %v2418_v43 = vsel %vm4869_vm2, %v2412_v59, 0.0  ;;  %v2377_v14 = vmul.f32 %v6342_v46, %v6341_v27  ;;  %v2378_v49 = vmul.f32 %v6342_v46, %v6343_v5  ;;  %v6357_v46 = vld [vmem:[#allocation15_spill] sm:$0xff] }
 0x39c   : > { %v2441_v39 = vmul.f32 %v6346_v2, %v2417_v3  ;;  %v2442_v47 = vmul.f32 %v6346_v2, %v2418_v43  ;;  %v2505_v51 = vmul.f32 %v6347_v61, %v2481_v20  ;;  %v2506_v42 = vmul.f32 %v6347_v61, %v2482_v28  ;;  %v6356_v43 = vld [vmem:[#allocation13_spill] sm:$0xff]  ;;  %v6363_v61 = vld [vmem:[#allocation31_spill] sm:$0xff] }
 0x39d   : > { %v2236_v44 = vpop.permute.xlu1 %2235  ;;  %v5584_v58 = vpop.permute.xlu0 %2395  ;;  %v2385_v63 = vadd.f32 %v2377_v14, %v2353_v45  ;;  %v2386_v8 = vadd.f32 %v2378_v49, %v2354_v26  ;;  %v2545_v25 = vsel %vm6348_vm4, %v2536_v24, 0.0  ;;  %v2546_v19 = vsel %vm6349_vm15, %v2540_v48, 0.0  ;;  %v6358_v20 = vld [vmem:[#allocation17_spill] sm:$0xff] }
 0x39e   : > { %vm6350_vm8 = vcmp.eq.s32.totalorder %v4751_v38, 1  ;;  %vm6351_vm9 = vcmp.eq.s32.totalorder %v4747_v34, 1  ;;  %vm6352_vm14 = vcmp.lt.s32.totalorder %v4738_v31, 15  ;;  %vm6354_vm13 = vcmp.eq.s32.totalorder %v4792_v56, 1 }
 0x39f   : > { %v2449_v4 = vadd.f32 %v2441_v39, %v2385_v63  ;;  %v2450_v6 = vadd.f32 %v2442_v47, %v2386_v8  ;;  %vm6353_vm12 = vmmov %vm6352_vm14  ;;  %vm6355_vm4 = vcmp.eq.s32.totalorder %v4760_v40, 1  ;;  %vm6359_vm15 = vcmp.lt.s32.totalorder %v4738_v31, 111 }
 0x3a1   : > { %v5594_v17 = vpop.permute.xlu1 %2459  ;;  %v5596_v54 = vpop.permute.xlu0 %2587  ;;  %v2513_v5 = vadd.f32 %v2505_v51, %v2449_v4  ;;  %v2514_v49 = vadd.f32 %v2506_v42, %v2450_v6  ;;  %v6366_v6 = vld [vmem:[#allocation11_spill] sm:$0xff] }
 0x3a5   : > { %v5616_v16 = vpop.permute.xlu1 %2523  ;;  %v2112_v36 = vpop.permute.xlu0 %2111 }
 0x3a6   : > { %v2117_v30 = vsel %vm827_vm6, %v2104_v0, %v2112_v36  ;;  %v2121_v12 = vsel %vm827_vm6, %v2112_v36, %v2104_v0  ;;  %v6361_v36 = vld [vmem:[#allocation27_spill] sm:$0xff] }
 0x3a7   : > { %v2127_v55 = vsel %vm6350_vm8, %v2121_v12, 0.0  ;;  %v2128_v13 = vsel %vm6351_vm9, %v2117_v30, 0.0  ;;  %vm6360_vm8 = vmmov %vm6359_vm15  ;;  %v6362_v30 = vld [vmem:[#allocation20_spill] sm:$0xff]  ;;  %vm6364_vm9 = vcmp.lt.s32.totalorder %v4738_v31, 1 }
 0x3a8   : > { %v2156_v27 = vmul.f32 %v6356_v43, %v2128_v13  ;;  %v2379_v12 = vmul.f32 %v6362_v30, %v6361_v36  ;;  %v2380_v51 = vmul.f32 %v6362_v30, %v6363_v61  ;;  %v2570_v13 = vmul.f32 %v6366_v6, %v2546_v19  ;;  %v6379_v61 = vld [vmem:[#allocation21_spill] sm:$0xff] }
 0x3a9   : > { %v2244_v1 = vpop.permute.xlu1 %2243  ;;  %v2180_v0 = vpop.permute.xlu0 %2179 }
 0x3aa   : > { %v2249_v15 = vsel %vm6352_vm14, %v2236_v44, %v2244_v1  ;;  %v2253_v60 = vsel %vm6353_vm12, %v2244_v1, %v2236_v44  ;;  %v2185_v59 = vsel %vm861_vm7, %v2172_v53, %v2180_v0  ;;  %v2189_v23 = vsel %vm861_vm7, %v2180_v0, %v2172_v53  ;;  %vm6365_vm14 = vmmov %vm6364_vm9  ;;  %v6367_v0 = vld [vmem:[#allocation4_spill] sm:$0xff] }
 0x3ab   : > { %v2259_v29 = vsel %vm6354_vm13, %v2253_v60, 0.0  ;;  %v2260_v45 = vsel %vm6355_vm4, %v2249_v15, 0.0  ;;  %v2195_v26 = vsel %vm880_vm11, %v2189_v23, 0.0  ;;  %v2196_v3 = vsel %vm881_vm10, %v2185_v59, 0.0  ;;  %v6369_v60 = vld [vmem:[#allocation3_spill] sm:$0xff] }
 0x3ac   : > { %v2155_v44 = vmul.f32 %v6356_v43, %v2127_v55  ;;  %v2219_v14 = vmul.f32 %v6357_v46, %v2195_v26  ;;  %v2220_v53 = vmul.f32 %v6357_v46, %v2196_v3  ;;  %v2283_v28 = vmul.f32 %v6358_v20, %v2259_v29  ;;  %v6372_v3 = vld [vmem:[#allocation18_spill] sm:$0xff] }
 0x3ad   : > { %v2284_v24 = vmul.f32 %v6358_v20, %v2260_v45  ;;  %v2594_v48 = vpop.permute.xlu1 %2593  ;;  %v2308_v63 = vpop.permute.xlu0 %2307  ;;  %v2569_v55 = vmul.f32 %v6366_v6, %v2545_v25  ;;  %vm6368_vm12 = vcmp.eq.s32.totalorder %v6367_v0, 1  ;;  %vm6370_vm13 = vcmp.eq.s32.totalorder %v6369_v60, 1 }
 0x3ae   : > { %v2227_v8 = vadd.f32 %v2219_v14, %v2155_v44  ;;  %v2228_v2 = vadd.f32 %v2220_v53, %v2156_v27  ;;  %v2600_v39 = vsel %vm6359_vm15, %v5540_v11, %v2594_v48  ;;  %v2604_v47 = vsel %vm6360_vm8, %v2594_v48, %v5540_v11  ;;  %v6375_v53 = vld [vmem:[#allocation28_spill] sm:$0xff] }
 0x3af   : > { %v2313_v42 = vsel %vm6364_vm9, %v5574_v9, %v2308_v63  ;;  %v2317_v4 = vsel %vm6365_vm14, %v2308_v63, %v5574_v9  ;;  %v2609_v15 = vsel %vm6368_vm12, %v2600_v39, 0.0  ;;  %v2610_v59 = vsel %vm6370_vm13, %v2604_v47, 0.0 }
 0x3b0   : > { %v2291_v1 = vadd.f32 %v2283_v28, %v2227_v8  ;;  %v2292_v11 = vadd.f32 %v2284_v24, %v2228_v2  ;;  %vm6371_vm4 = vcmp.eq.s32.totalorder %v4827_v10, 1  ;;  %v2324_v29 = vsel %vm4816_vm5, %v2313_v42, 0.0  ;;  %v6378_v2 = vld [vmem:[#allocation24_spill] sm:$0xff] }
 0x3b1   : > { %v2323_v23 = vsel %vm6371_vm4, %v2317_v4, 0.0  ;;  %v2468_v45 = vpop.permute.xlu1 %2467  ;;  %v2404_v9 = vpop.permute.xlu0 %2403  ;;  %v2577_v26 = vadd.f32 %v2569_v55, %v2513_v5  ;;  %v2578_v25 = vadd.f32 %v2570_v13, %v2514_v49  ;;  %v2348_v43 = vmul.f32 %v6372_v3, %v2324_v29 }
 0x3b2   : > { %v2347_v19 = vmul.f32 %v6372_v3, %v2323_v23  ;;  %v2473_v44 = vsel %vm1526_vm3, %v5594_v17, %v2468_v45  ;;  %v2477_v27 = vsel %vm1526_vm3, %v2468_v45, %v5594_v17  ;;  %vm6373_vm15 = vcmp.lt.s32.totalorder %v4738_v31, 127  ;;  %v6385_v23 = vld [vmem:[#allocation26_spill] sm:$0xff] }
 0x3b3   : > { %v2409_v46 = vsel %vm6373_vm15, %v5584_v58, %v2404_v9  ;;  %vm6374_vm8 = vmmov %vm6373_vm15  ;;  %v2633_v5 = vmul.f32 %v6375_v53, %v2609_v15  ;;  %v2634_v49 = vmul.f32 %v6375_v53, %v2610_v59  ;;  %v2356_v28 = vadd.f32 %v2348_v43, %v2292_v11  ;;  %v6388_v43 = vld [vmem:[#allocation35_spill] sm:$0xff]  ;;  %v6391_v53 = vld [vmem:[#allocation12_spill] sm:$0xff] }
 0x3b4   : > { %v2413_v14 = vsel %vm6374_vm8, %v2404_v9, %v5584_v58  ;;  %v2355_v20 = vadd.f32 %v2347_v19, %v2291_v1  ;;  %vm6376_vm9 = vcmp.eq.s32.totalorder %v4916_v50, 1  ;;  %vm6377_vm14 = vcmp.eq.s32.totalorder %v4885_v41, 1 }
 0x3b5   : > { %v2483_v24 = vsel %vm6376_vm9, %v2473_v44, 0.0  ;;  %v2484_v17 = vsel %vm6377_vm14, %v2477_v27, 0.0  ;;  %v2419_v48 = vsel %vm1425_vm0, %v2409_v46, 0.0  ;;  %v2420_v63 = vsel %vm4869_vm2, %v2413_v14, 0.0  ;;  %v2532_v8 = vpop.permute.xlu1 %2531  ;;  %v2592_v58 = vpop.permute.xlu0 %2591 }
 0x3b6   : > { %v2507_v39 = vmul.f32 %v6378_v2, %v2483_v24  ;;  %v2508_v47 = vmul.f32 %v6378_v2, %v2484_v17  ;;  %v2387_v36 = vadd.f32 %v2379_v12, %v2355_v20  ;;  %v2388_v30 = vadd.f32 %v2380_v51, %v2356_v28  ;;  %v6382_v12 = vld [vmem:[#allocation36_spill] sm:$0xff] }
 0x3b7   : > { %v2443_v42 = vmul.f32 %v6379_v61, %v2419_v48  ;;  %v2444_v4 = vmul.f32 %v6379_v61, %v2420_v63  ;;  %v2537_v6 = vsel %vm1648_vm1, %v5616_v16, %v2532_v8  ;;  %v2541_v55 = vsel %vm1648_vm1, %v2532_v8, %v5616_v16 }
 0x3b8   : > { %vm6380_vm12 = vcmp.eq.s32.totalorder %v4949_v18, 1  ;;  %vm6381_vm13 = vcmp.eq.s32.totalorder %v4922_v52, 1  ;;  %vm6383_vm4 = vcmp.lt.s32.totalorder %v4738_v31, 111  ;;  %vm6386_vm8 = vcmp.eq.s32.totalorder %v6367_v0, 1 }
 0x3b9   : > { %v2547_v13 = vsel %vm6380_vm12, %v2537_v6, 0.0  ;;  %v2548_v1 = vsel %vm6381_vm13, %v2541_v55, 0.0  ;;  %v2599_v51 = vsel %vm6383_vm4, %v6382_v12, %v2592_v58  ;;  %vm6384_vm15 = vmmov %vm6383_vm4  ;;  %v2451_v15 = vadd.f32 %v2443_v42, %v2387_v36  ;;  %v2598_v45 = vpop.permute.xlu1 %2597  ;;  %v2596_v9 = vpop.permute.xlu0 %2595  ;;  %v6399_v55 = vld [vmem:[#allocation29_spill] sm:$0xff] }
 0x3ba   : > { %v2603_v11 = vsel %vm6384_vm15, %v2592_v58, %v6382_v12  ;;  %v2452_v59 = vadd.f32 %v2444_v4, %v2388_v30  ;;  %v2571_v29 = vmul.f32 %v6385_v23, %v2547_v13  ;;  %v2572_v16 = vmul.f32 %v6385_v23, %v2548_v1  ;;  %vm6389_vm14 = vmmov %vm6383_vm4  ;;  %v6400_v1 = vld [vmem:[#allocation33_spill] sm:$0xff] }
 0x3bb   : > { %v2607_v3 = vsel %vm6386_vm8, %v2599_v51, 0.0  ;;  %vm6387_vm9 = vcmp.eq.s32.totalorder %v6369_v60, 1  ;;  %v2602_v44 = vsel %vm6389_vm14, %v6388_v43, %v2598_v45  ;;  %vm6390_vm12 = vmmov %vm6383_vm4  ;;  %v2515_v46 = vadd.f32 %v2507_v39, %v2451_v15 }
 0x3bc   : > { %v2608_v19 = vsel %vm6387_vm9, %v2603_v11, 0.0  ;;  %v2606_v27 = vsel %vm6390_vm12, %v2598_v45, %v6388_v43  ;;  %v2516_v14 = vadd.f32 %v2508_v47, %v2452_v59  ;;  %v2631_v20 = vmul.f32 %v6391_v53, %v2607_v3  ;;  %vm6392_vm13 = vmmov %vm6386_vm8  ;;  %v6396_v47 = vld [vmem:[#allocation14_spill] sm:$0xff] }
 0x3bd   : > { %v2632_v28 = vmul.f32 %v6391_v53, %v2608_v19  ;;  %v2613_v24 = vsel %vm6392_vm13, %v2602_v44, 0.0  ;;  %vm6393_vm4 = vmmov %vm6387_vm9  ;;  %v2641_v8 = vadd.f32 %v2633_v5, %v2577_v26  ;;  %v2642_v58 = vadd.f32 %v2634_v49, %v2578_v25  ;;  %v6401_v11 = vld [vmem:[#allocation34_spill] sm:$0xff]  ;;  %v778_v44 = vld [vmem:[%s6404_s10] sm:$0xff] }
 0x3be   : > { %v2614_v17 = vsel %vm6393_vm4, %v2606_v27, 0.0  ;;  %vm6394_vm15 = vmmov %vm6390_vm12  ;;  %v2579_v2 = vadd.f32 %v2571_v29, %v2515_v46  ;;  %v2580_v39 = vadd.f32 %v2572_v16, %v2516_v14  ;;  %v2637_v36 = vmul.f32 %v6396_v47, %v2613_v24  ;;  %v6402_v59 = vld [vmem:[#allocation30_spill] sm:$0xff]  ;;  %v6403_v29 = vld [vmem:[#allocation32_spill] sm:$0xff] }
 0x3bf   : > { %v2601_v48 = vsel %vm6394_vm15, %v5596_v54, %v2596_v9  ;;  %vm6395_vm8 = vmmov %vm6390_vm12  ;;  %v2638_v30 = vmul.f32 %v6396_v47, %v2614_v17  ;;  %v2639_v4 = vadd.f32 %v2631_v20, %v5530_v62  ;;  %v2640_v6 = vadd.f32 %v2632_v28, %v5532_v22  ;;  %v779_v46 = vld [vmem:[%s6404_s10 + $0x8] sm:$0xff] }
 0x3c0   : > { %v2605_v63 = vsel %vm6395_vm8, %v2596_v9, %v5596_v54  ;;  %vm6397_vm9 = vmmov %vm6392_vm13  ;;  %v2645_v25 = vadd.f32 %v2637_v36, %v5536_v21  ;;  %v2669_v12 = vadd.f32 %v6400_v1, %v2641_v8  ;;  %v2670_v51 = vadd.f32 %v6400_v1, %v2642_v58  ;;  %v784_v36 = vld [vmem:[%s6130_s13] sm:$0xff]  ;;  %v799_v1 = vld [vmem:[%s6135_s18 + $0x18] sm:$0xff] }
 0x3c1   : > { %v2611_v61 = vsel %vm6397_vm9, %v2601_v48, 0.0  ;;  %vm6398_vm14 = vmmov %vm6393_vm4  ;;  %v2646_v5 = vadd.f32 %v2638_v30, %v5538_v57  ;;  %v2667_v22 = vadd.f32 %v6402_v59, %v2639_v4  ;;  %v2668_v23 = vadd.f32 %v6402_v59, %v2640_v6  ;;  %v780_v48 = vld [vmem:[%s6408_s11] sm:$0xff]  ;;  %v787_v6 = vld [vmem:[%s6131_s14 + $0x8] sm:$0xff] }
 0x3c2   : > { %v2612_v42 = vsel %vm6398_vm14, %v2605_v63, 0.0  ;;  %v2635_v54 = vmul.f32 %v6399_v55, %v2611_v61  ;;  %v2673_v15 = vadd.f32 %v6401_v11, %v2645_v25  ;;  %vm6405_vm12 = vcmask 130048   ;;  %v786_v61 = vld [vmem:[%s6131_s14] sm:$0xff]  ;;  %v791_v25 = vld [vmem:[%s6133_s16 + $0x8] sm:$0xff] }
 0x3c3   : > { %v2636_v26 = vmul.f32 %v6399_v55, %v2612_v42  ;;  %v2674_v62 = vadd.f32 %v6401_v11, %v2646_v5  ;;  %v6406_v27 = vmov 0.0   ;;  %vm6407_vm13 = vmmov %vm6405_vm12  ;;  %v785_v42 = vld [vmem:[%s6130_s13 + $0x8] sm:$0xff]  ;;  %v788_v4 = vld [vmem:[%s6132_s15] sm:$0xff] }
 0x3c4   : > { %v2643_v49 = vadd.f32 %v2635_v54, %v2579_v2  ;;  %v5770_v57 = vmul.f32 %v2673_v15, %v2669_v12  ;;  %v781_v2 = vld [vmem:[%s6408_s11 + $0x8] sm:$0xff]  ;;  %v790_v55 = vld [vmem:[%s6133_s16] sm:$0xff]  ;;  %v798_v5 = vld [vmem:[%s6135_s18 + $0x10] sm:$0xff] }
 0x3c5   : > { %v2644_v13 = vadd.f32 %v2636_v26, %v2580_v39  ;;  %v5768_v45 = vmul.f32 %v2674_v62, %v2670_v51  ;;  %v789_v54 = vld [vmem:[%s6132_s15 + $0x8] sm:$0xff]  ;;  %v796_v26 = vld [vmem:[%s6135_s18] sm:$0xff]  ;;  %vm6409_vm4 = vmmov %vm6405_vm12 }
 0x3c6   : > { %v2671_v16 = vadd.f32 %v6403_v29, %v2643_v49  ;;  %v797_v49 = vld [vmem:[%s6135_s18 + $0x8] sm:$0xff]  ;;  %v804_v12 = vld [vmem:[%s6138_s21] sm:$0xff]  ;;  %vm6410_vm15 = vmmov %vm6409_vm4 }
 0x3c7   : > { %v2672_v21 = vadd.f32 %v6403_v29, %v2644_v13  ;;  %v802_v13 = vld [vmem:[%s6137_s20] sm:$0xff]  ;;  %v803_v51 = vld [vmem:[%s6137_s20 + $0x8] sm:$0xff]  ;;  %vm6415_vm8 = vmmov %vm6409_vm4 }
 0x3c8   : > { %v5774_v3 = vmul.f32 %v2671_v16, %v2667_v22  ;;  %v805_v11 = vld [vmem:[%s6138_s21 + $0x8] sm:$0xff]  ;;  %vm6416_vm9 = vmmov %vm6409_vm4 }
 0x3c9   : > { %v5772_v9 = vmul.f32 %v2672_v21, %v2668_v23  ;;  %vm6417_vm14 = vmmov %vm6409_vm4 }
 0x3ca   : > { %v4197_v43 = vpack.c.bf16 %v5770_v57, %v5774_v3 }
 0x3cb   : > { %v4195_v19 = vpack.c.bf16 %v5768_v45, %v5772_v9 }
 0x3cd   : > { %4196 = vmatprep.subr.bf16.mxu1 %v4195_v19  ;;  %v782_v19 = vld [vmem:[%s6129_s12] sm:$0xff] }
 0x3ce   : > { %4198 = vmatpush1.bf16.msra.mxu1 %v4197_v43 }
 0x3d1   : > { %4136 = vmatmul.mubr.msk.f32.vlgmr.msra.gmra.mrb[2].mxu1 %vm6405_vm12, %v778_v44  ;;  %vm6418_vm12 = vmmov %vm6409_vm4 }
 0x3d2   : > { %2755 = vmatprep.mubr.f32.mxu1 %v6406_v27 }
 0x3d5   : > { %4137 = vmatmul.mubr.msk.f32.gmra.mrb[4].mxu1 %vm6407_vm13, %v779_v46  ;;  %vm6419_vm13 = vmmov %vm6409_vm4 }
 0x3d6   : > { %2867 = vmatprep.mubr.f32.mxu1 %v6406_v27 }
 0x4a4   : > { %v2751_v14 = vpop.f32.mrb[2].mxu1 }
 0x4a5   : > { %v2753_v53 = vpop.f32.mrb[3].mxu1 }
 0x4a6   : > { %v2762_v20 = vadd.f32 %v2753_v53, %v2751_v14 }
 0x4a8   : > { %2763 = vadd.xlane.f32.xlu0 %v2762_v20  ;;  %v2757_v28 = vpop.f32.mrb[4].mxu1 }
 0x4a9   : > { %v2759_v24 = vpop.f32.mrb[5].mxu1 }
 0x4aa   : > { %v2765_v17 = vadd.f32 %v2759_v24, %v2757_v28 }
 0x4ac   : > { %2766 = vadd.xlane.f32.xlu1 %v2765_v17 }
 0x535   : > { %v2764_v63 = vpop.xlane.xlu0 %2763 }
 0x536   : > { %v2769_v8 = vmul.f32 0.00390625, %v2764_v63 }
 0x538   : > { %v2771_v58 = vadd.f32 %v2769_v8, %v780_v48 }
 0x539   : > { %v2767_v39 = vpop.xlane.xlu1 %2766 }
 0x53a   : > { %v2770_v47 = vmul.f32 0.00390625, %v2767_v39  ;;  %2775 = vperm.xlu0 %4357, %v2771_v58  }
 0x53c   : > { %v2772_v30 = vadd.f32 %v2770_v47, %v781_v2  ;;  %v6411_v2 = vld [vmem:[#allocation5_spill] sm:$0xff]  ;;  %v6412_v47 = vld [vmem:[#allocation6_spill] sm:$0xff] }
 0x53e   : > { %2789 = vperm.xlu0 %4357, %v784_v36   ;;  %2780 = vperm.xlu1 %4358, %v2772_v30   ;;  %v6413_v30 = vld [vmem:[#allocation7_spill] sm:$0xff] }
 0x542   : > { %2882 = vperm.xlu0 %4357, %v786_v61   ;;  %2794 = vperm.xlu1 %4358, %v785_v42   ;;  %v6414_v42 = vld [vmem:[#allocation8_spill] sm:$0xff] }
 0x546   : > { %2948 = vperm.xlu0 %4357, %v788_v4   ;;  %2887 = vperm.xlu1 %4358, %v787_v6  }
 0x54a   : > { %2962 = vperm.xlu0 %4357, %v790_v55   ;;  %2953 = vperm.xlu1 %4358, %v789_v54  }
 0x54e   : > { %2976 = vperm.xlu0 %4357, %v796_v26   ;;  %2967 = vperm.xlu1 %4358, %v791_v25  }
 0x552   : > { %2986 = vperm.xlu0 %4357, %v798_v5   ;;  %2981 = vperm.xlu1 %4358, %v797_v49  }
 0x556   : > { %3101 = vperm.xlu0 %4357, %v802_v13   ;;  %2991 = vperm.xlu1 %4358, %v799_v1  }
 0x55a   : > { %3194 = vperm.xlu0 %4357, %v804_v12   ;;  %3106 = vperm.xlu1 %4358, %v803_v51  }
 0x55e   : > { %3199 = vperm.xlu1 %4358, %v805_v11  }
 0x5b9   : > { %v2776_v15 = vpop.permute.xlu0 %2775 }
 0x5ba   : > { %v2783_v59 = vmul.f32 %v2776_v15, %v5774_v3  ;;  %v2784_v22 = vmul.f32 %v2776_v15, %v5772_v9  ;;  %v783_v9 = vld [vmem:[%s6129_s12 + $0x8] sm:$0xff] }
 0x5bd   : > { %v2781_v62 = vpop.permute.xlu1 %2780 }
 0x5be   : > { %v2785_v23 = vmul.f32 %v2781_v62, %v5770_v57  ;;  %v2786_v29 = vmul.f32 %v2781_v62, %v5768_v45  ;;  %v2790_v45 = vpop.permute.xlu0 %2789 }
 0x5c0   : > { %v4199_v16 = vpack.c.bf16 %v2786_v29, %v2784_v22  ;;  %v4201_v21 = vpack.c.bf16 %v2785_v23, %v2783_v59 }
 0x5c1   : > { %v2795_v57 = vpop.permute.xlu1 %2794 }
 0x5c2   : > { %4200 = vmatprep.subr.bf16.mxu1 %v4199_v16  ;;  %v2883_v14 = vpop.permute.xlu0 %2882 }
 0x5c3   : > { %4202 = vmatpush1.bf16.msra.mxu1 %v4201_v21 }
 0x5c5   : > { %v2888_v17 = vpop.permute.xlu1 %2887 }
 0x5c6   : > { %4138 = vmatmul.mubr.msk.f32.vlgmr.msra.gmra.mrb[6].mxu1 %vm6409_vm4, %v782_v19 }
 0x5c7   : > { %2873 = vmatprep.mubr.f32.mxu1 %v6406_v27 }
 0x5ca   : > { %4139 = vmatmul.mubr.msk.f32.gmra.mrb[8].mxu1 %vm6410_vm15, %v783_v9  ;;  %vm4212_vm15 = vmpackc.low %vm881_vm10, %vm881_vm10 }
 0x5cb   : > { %3070 = vmatprep.mubr.f32.mxu1 %v6406_v27 }
 0x699   : > { %v2869_v3 = vpop.f32.mrb[6].mxu1 }
 0x69a   : > { %v2870_v43 = vadd.f32 %v2869_v3, %v2790_v45  ;;  %v2871_v44 = vpop.f32.mrb[7].mxu1 }
 0x69b   : > { %v2872_v46 = vadd.f32 %v2871_v44, %v2790_v45 }
 0x69c   : > { %v2890_v20 = vmul.f32 %v2883_v14, %v2870_v43 }
 0x69d   : > { %v2875_v53 = vpop.f32.mrb[8].mxu1  ;;  %v2891_v48 = vmul.f32 %v2883_v14, %v2872_v46 }
 0x69e   : > { %v2876_v28 = vadd.f32 %v2875_v53, %v2795_v57  ;;  %v2877_v24 = vpop.f32.mrb[9].mxu1  ;;  %v5859_v39 = vadd.f32 %v2890_v20, %v6411_v2 }
 0x69f   : > { %v2878_v63 = vadd.f32 %v2877_v24, %v2795_v57  ;;  %v5865_v61 = vadd.f32 %v2891_v48, %v6413_v30 }
 0x6a0   : > { %v2892_v8 = vmul.f32 %v2888_v17, %v2876_v28 }
 0x6a1   : > { %v2893_v58 = vmul.f32 %v2888_v17, %v2878_v63 }
 0x6a2   : > { %v5862_v36 = vadd.f32 %v2892_v8, %v6412_v47 }
 0x6a3   : > { %v5868_v4 = vadd.f32 %v2893_v58, %v6414_v42 }
 0x6a4   : > { %v2898_v6 = vadd.f32 %v5862_v36, %v5859_v39 }
 0x6a5   : > { %v2905_v55 = vadd.f32 %v5868_v4, %v5865_v61 }
 0x6a6   : > { %v2899_v54 = vrot.slane %v2898_v6, 4 }
 0x6a7   : > { %v2906_v26 = vrot.slane %v2905_v55, 4 }
 0x6a8   : > { %v2900_v25 = vadd.f32 %v2899_v54, %v2898_v6  ;;  %v2949_v6 = vpop.permute.xlu0 %2948 }
 0x6a9   : > { %v2907_v5 = vadd.f32 %v2906_v26, %v2905_v55  ;;  %v2954_v55 = vpop.permute.xlu1 %2953 }
 0x6aa   : > { %v2901_v49 = vrot.slane %v2900_v25, 2 }
 0x6ab   : > { %v2908_v13 = vrot.slane %v2907_v5, 2 }
 0x6ac   : > { %v2902_v1 = vadd.f32 %v2901_v49, %v2900_v25 }
 0x6ad   : > { %v2909_v12 = vadd.f32 %v2908_v13, %v2907_v5 }
 0x6ae   : > { %v2903_v51 = vrot.slane %v2902_v1, 1 }
 0x6af   : > { %v2910_v11 = vrot.slane %v2909_v12, 1 }
 0x6b0   : > { %v2904_v15 = vadd.f32 %v2903_v51, %v2902_v1  ;;  %v2963_v51 = vpop.permute.xlu0 %2962 }
 0x6b1   : > { %v2911_v62 = vadd.f32 %v2910_v11, %v2909_v12  ;;  %v2968_v11 = vpop.permute.xlu1 %2967 }
 0x6b2   : > { %v2912_v59 = vmul.f32 0.0625, %v2904_v15 }
 0x6b3   : > { %v2913_v22 = vmul.f32 0.0625, %v2911_v62 }
 0x6b4   : > { %v2914_v23 = vsub.f32 %v5859_v39, %v2912_v59  ;;  %v2916_v29 = vsub.f32 %v5862_v36, %v2912_v59 }
 0x6b5   : > { %v2917_v16 = vsub.f32 %v5868_v4, %v2913_v22  ;;  %v2915_v21 = vsub.f32 %v5865_v61, %v2913_v22 }
 0x6b6   : > { %v2918_v19 = vmul.f32 %v2914_v23, %v2914_v23  ;;  %v2920_v9 = vmul.f32 %v2916_v29, %v2916_v29 }
 0x6b7   : > { %v2921_v45 = vmul.f32 %v2917_v16, %v2917_v16  ;;  %v2919_v57 = vmul.f32 %v2915_v21, %v2915_v21 }
 0x6b8   : > { %v2922_v3 = vadd.f32 %v2920_v9, %v2918_v19 }
 0x6b9   : > { %v2929_v43 = vadd.f32 %v2921_v45, %v2919_v57 }
 0x6ba   : > { %v2923_v44 = vrot.slane %v2922_v3, 4 }
 0x6bb   : > { %v2930_v46 = vrot.slane %v2929_v43, 4 }
 0x6bc   : > { %v2924_v14 = vadd.f32 %v2923_v44, %v2922_v3  ;;  %v2977_v44 = vpop.permute.xlu0 %2976 }
 0x6bd   : > { %v2931_v53 = vadd.f32 %v2930_v46, %v2929_v43 }
 0x6be   : > { %v2925_v20 = vrot.slane %v2924_v14, 2 }
 0x6bf   : > { %v2932_v28 = vrot.slane %v2931_v53, 2 }
 0x6c0   : > { %v2926_v24 = vadd.f32 %v2925_v20, %v2924_v14  ;;  %v2987_v20 = vpop.permute.xlu0 %2986 }
 0x6c1   : > { %v2933_v17 = vadd.f32 %v2932_v28, %v2931_v53  ;;  %v2982_v53 = vpop.permute.xlu1 %2981 }
 0x6c2   : > { %v2927_v48 = vrot.slane %v2926_v24, 1 }
 0x6c3   : > { %v2934_v63 = vrot.slane %v2933_v17, 1 }
 0x6c4   : > { %v2928_v8 = vadd.f32 %v2927_v48, %v2926_v24 }
 0x6c5   : > { %v2935_v58 = vadd.f32 %v2934_v63, %v2933_v17 }
 0x6c6   : > { %v2936_v2 = vmul.f32 0.0625, %v2928_v8 }
 0x6c7   : > { %v2937_v47 = vmul.f32 0.0625, %v2935_v58 }
 0x6c8   : > { %v2938_v30 = vadd.f32 1e-06, %v2936_v2  ;;  %v2992_v2 = vpop.permute.xlu1 %2991 }
 0x6c9   : > { %v2939_v42 = vadd.f32 1e-06, %v2937_v47 }
 0x6ca   : > { %4444 = vrsqrt.f32 %v2938_v30 }
 0x6cb   : > { %4446 = vrsqrt.f32 %v2939_v42 }
 0x6d4   : > { %v4445_v54 = vpop.eup %4444 }
 0x6d5   : > { %v4447_v26 = vpop.eup %4446  ;;  %v2944_v25 = vmul.f32 %v4445_v54, %v2916_v29  ;;  %v2942_v5 = vmul.f32 %v4445_v54, %v2914_v23  ;;  %v792_v23 = vld [vmem:[%s6134_s17] sm:$0xff]  ;;  %v793_v29 = vld [vmem:[%s6134_s17 + $0x8] sm:$0xff] }
 0x6d6   : > { %v2943_v49 = vmul.f32 %v4447_v26, %v2915_v21  ;;  %v2945_v13 = vmul.f32 %v4447_v26, %v2917_v16  ;;  %v794_v16 = vld [vmem:[%s6134_s17 + $0x10] sm:$0xff]  ;;  %v795_v21 = vld [vmem:[%s6134_s17 + $0x18] sm:$0xff] }
 0x6d7   : > { %v2956_v1 = vmul.f32 %v2949_v6, %v2942_v5  ;;  %v2958_v12 = vmul.f32 %v2954_v55, %v2944_v25 }
 0x6d8   : > { %v2957_v15 = vmul.f32 %v2949_v6, %v2943_v49  ;;  %v2959_v62 = vmul.f32 %v2954_v55, %v2945_v13 }
 0x6d9   : > { %v2970_v59 = vadd.f32 %v2963_v51, %v2956_v1  ;;  %v2972_v22 = vadd.f32 %v2968_v11, %v2958_v12  ;;  %v800_v1 = vld [vmem:[%s6136_s19] sm:$0xff]  ;;  %v801_v12 = vld [vmem:[%s6136_s19 + $0x8] sm:$0xff] }
 0x6da   : > { %v2971_v19 = vadd.f32 %v2963_v51, %v2957_v15  ;;  %v2973_v9 = vadd.f32 %v2968_v11, %v2959_v62  ;;  %v3102_v51 = vpop.permute.xlu0 %3101  ;;  %v3107_v11 = vpop.permute.xlu1 %3106 }
 0x6db   : > { %v4205_v57 = vpack.c.bf16 %v2972_v22, %v2970_v59 }
 0x6dc   : > { %v4203_v45 = vpack.c.bf16 %v2973_v9, %v2971_v19 }
 0x6de   : > { %4204 = vmatprep.subr.bf16.mxu1 %v4203_v45  ;;  %v3195_v19 = vpop.permute.xlu0 %3194 }
 0x6df   : > { %4206 = vmatpush1.bf16.msra.mxu1 %v4205_v57 }
 0x6e2   : > { %4140 = vmatmul.mubr.msk.f32.vlgmr.msra.gmra.mrb[10].mxu1 %vm6415_vm8, %v792_v23  ;;  %vm4215_vm8 = vmpackc.low %vm880_vm11, %vm880_vm11  ;;  %vm6421_vm11 = vcmp.eq.s32.totalorder %v4751_v38, 1 }
 0x6e3   : > { %3076 = vmatprep.mubr.f32.mxu1 %v6406_v27 }
 0x6e6   : > { %4141 = vmatmul.mubr.msk.f32.gmra.mrb[12].mxu1 %vm6416_vm9, %v793_v29  ;;  %v3200_v29 = vpop.permute.xlu1 %3199  ;;  %vm4221_vm9 = vmpackc.low %vm6421_vm11, %vm6421_vm11  ;;  %vm6430_vm11 = vcmp.eq.s32.totalorder %v4792_v56, 1  ;;  %v808_v56 = vld [vmem:[%s6139_s22 + $0x8] sm:$0x7] }
 0x6e7   : > { %3082 = vmatprep.mubr.f32.mxu1 %v6406_v27 }
 0x6ea   : > { %4142 = vmatmul.mubr.msk.f32.gmra.mrb[14].mxu1 %vm6417_vm14, %v794_v16  ;;  %vm6423_vm14 = vcmp.lt.s32.totalorder %v4738_v31, 15 }
 0x6eb   : > { %3088 = vmatprep.mubr.f32.mxu1 %v6406_v27 }
 0x6ee   : > { %4143 = vmatmul.mubr.msk.f32.gmra.mrb[16].mxu1 %vm6418_vm12, %v795_v21  ;;  %vm6424_vm12 = vmmov %vm6423_vm14 }
 0x6ef   : > { %3179 = vmatprep.mubr.f32.mxu1 %v6406_v27 }
 0x7b5   : > { %v3072_v3 = vpop.f32.mrb[10].mxu1 }
 0x7b6   : > { %v3074_v43 = vpop.f32.mrb[11].mxu1  ;;  %v3073_v24 = vadd.f32 %v3072_v3, %v2977_v44 }
 0x7b7   : > { %v3075_v63 = vadd.f32 %v3074_v43, %v2977_v44 }
 0x7b9   : > { %v3078_v46 = vpop.f32.mrb[12].mxu1 }
 0x7ba   : > { %v3080_v14 = vpop.f32.mrb[13].mxu1  ;;  %v3079_v42 = vadd.f32 %v3078_v46, %v2982_v53 }
 0x7bb   : > { %v3081_v54 = vadd.f32 %v3080_v14, %v2982_v53 }
 0x7bd   : > { %v3084_v28 = vpop.f32.mrb[14].mxu1 }
 0x7be   : > { %v3085_v17 = vadd.f32 %v3084_v28, %v2987_v20  ;;  %v3086_v48 = vpop.f32.mrb[15].mxu1 }
 0x7bf   : > { %v3087_v8 = vadd.f32 %v3086_v48, %v2987_v20 }
 0x7c0   : > { %v3095_v58 = vmul.f32 %v3085_v17, %v3073_v24 }
 0x7c1   : > { %v3096_v47 = vmul.f32 %v3087_v8, %v3075_v63  ;;  %v3090_v30 = vpop.f32.mrb[16].mxu1 }
 0x7c2   : > { %v3091_v6 = vadd.f32 %v3090_v30, %v2992_v2  ;;  %v3092_v55 = vpop.f32.mrb[17].mxu1 }
 0x7c3   : > { %v3093_v26 = vadd.f32 %v3092_v55, %v2992_v2 }
 0x7c4   : > { %v3097_v25 = vmul.f32 %v3091_v6, %v3079_v42 }
 0x7c5   : > { %v3098_v5 = vmul.f32 %v3093_v26, %v3081_v54 }
 0x7c6   : > { %v4209_v49 = vpack.c.bf16 %v3097_v25, %v3095_v58 }
 0x7c7   : > { %v4207_v13 = vpack.c.bf16 %v3098_v5, %v3096_v47 }
 0x7c9   : > { %4208 = vmatprep.subr.bf16.mxu1 %v4207_v13 }
 0x7ca   : > { %4210 = vmatpush1.bf16.msra.mxu1 %v4209_v49 }
 0x7cd   : > { %4144 = vmatmul.mubr.msk.f32.vlgmr.msra.gmra.mrb[18].mxu1 %vm6419_vm13, %v800_v1  ;;  %vm6425_vm13 = vcmp.eq.s32.totalorder %v4760_v40, 1 }
 0x7ce   : > { %3185 = vmatprep.mubr.f32.mxu1 %v6406_v27 }
 0x7d1   : > { %4145 = vmatmul.mubr.msk.f32.gmra.mrb[20].mxu1 %vm6409_vm4, %v801_v12 }
 0x7d2   : > { %3309 = vmatprep.mubr.f32.mxu1 %v6406_v27 }
 0x8a0   : > { %v3181_v15 = vpop.f32.mrb[18].mxu1 }
 0x8a1   : > { %v3182_v62 = vadd.f32 %v3181_v15, %v3102_v51  ;;  %v3183_v59 = vpop.f32.mrb[19].mxu1 }
 0x8a2   : > { %v3184_v22 = vadd.f32 %v3183_v59, %v3102_v51 }
 0x8a3   : > { %v3202_v45 = vmul.f32 %v3195_v19, %v3182_v62 }
 0x8a4   : > { %v3187_v9 = vpop.f32.mrb[20].mxu1  ;;  %v3203_v16 = vmul.f32 %v3195_v19, %v3184_v22 }
 0x8a5   : > { %v3188_v57 = vadd.f32 %v3187_v9, %v3107_v11  ;;  %v3189_v23 = vpop.f32.mrb[21].mxu1  ;;  %v5909_v44 = vadd.f32 %v3202_v45, %v5859_v39 }
 0x8a6   : > { %v3190_v21 = vadd.f32 %v3189_v23, %v3107_v11  ;;  %v5915_v14 = vadd.f32 %v3203_v16, %v5865_v61  ;;  %v815_v61 = vld [vmem:[%s6140_s23] sm:$0x7] }
 0x8a7   : > { %v3204_v3 = vmul.f32 %v3200_v29, %v3188_v57 }
 0x8a8   : > { %v3205_v43 = vmul.f32 %v3200_v29, %v3190_v21 }
 0x8a9   : > { %v5912_v46 = vadd.f32 %v3204_v3, %v5862_v36 }
 0x8aa   : > { %v5918_v53 = vadd.f32 %v3205_v43, %v5868_v4 }
 0x8ab   : > { %v4359_v20 = vpack.i.bf16 %v5912_v46, %v5909_v44  ;;  %v4237_v36 = vpack.c.bf16 %v5912_v46, %v5909_v44  ;;  %v810_v44 = vld [vmem:[%s6139_s22 + $0x10] sm:$0x7] }
 0x8ac   : > { %v4364_v28 = vpack.i.bf16 %v5918_v53, %v5915_v14  ;;  %v4235_v39 = vpack.c.bf16 %v5918_v53, %v5915_v14 }
 0x8ad   : > { %4360 = vrot.lane.b32.xlu0 %v4359_v20, %s6275_s29 }
 0x8ae   : > { %4365 = vrot.lane.b32.xlu1 %v4364_v28, %s6275_s29 }
 0x8b1   : > { %4370 = vrot.lane.b32.xlu0 %v4359_v20, %s6273_s6 }
 0x8b2   : > { %4375 = vrot.lane.b32.xlu1 %v4364_v28, %s6273_s6 }
 0x8b5   : > { %4380 = vrot.lane.b32.xlu0 %v4359_v20, %s6277_s2 }
 0x8b6   : > { %4385 = vrot.lane.b32.xlu1 %v4364_v28, %s6277_s2 }
 0x8b9   : > { %4390 = vrot.lane.b32.xlu0 %v4359_v20, %s6278_s8 }
 0x8ba   : > { %4395 = vrot.lane.b32.xlu1 %v4364_v28, %s6278_s8 }
 0x8bd   : > { %4400 = vrot.lane.b32.xlu0 %v4359_v20, %s6279_s4 }
 0x8be   : > { %4405 = vrot.lane.b32.xlu1 %v4364_v28, %s6279_s4  ;;  %s6457_s4 = sld [smem:[#allocation49_spill]] }
 0x8c1   : > { %4410 = vrot.lane.b32.xlu0 %v4359_v20, %s6281_s0 }
 0x8c2   : > { %4415 = vrot.lane.b32.xlu1 %v4364_v28, %s6281_s0 }
 0x8c5   : > { %4420 = vrot.lane.b32.xlu0 %v4359_v20, %s6282_s28 }
 0x8c6   : > { %4425 = vrot.lane.b32.xlu1 %v4364_v28, %s6282_s28 }
 0x8c9   : > { %4430 = vrot.lane.b32.xlu0 %v4359_v20, %s6283_s1 }
 0x8ca   : > { %4435 = vrot.lane.b32.xlu1 %v4364_v28, %s6283_s1  ;;  %s6456_s1 = sshll.u32 %s6460_s26, 3 }
 0x8cb   : > { %s737_s0 = scalar_lea.vmem %s6457_s4, %s6456_s1 }
 0x8cd   : > { %4020 = vperm.xlu0 %4357, %v815_v61   ;;  %v806_v61 = vld [vmem:[%s6139_s22] sm:$0x7] }
 0x91f   : > { %v4361_v4 = vpop.permute.xlu0 %4360 }
 0x920   : > { %v4363_v24 = vunpack.i.h.bf16 %v4361_v4  ;;  %v4362_v17 = vunpack.i.l.bf16 %v4361_v4  ;;  %v4366_v48 = vpop.permute.xlu1 %4365 }
 0x921   : > { %v4368_v63 = vunpack.i.h.bf16 %v4366_v48  ;;  %v4367_v8 = vunpack.i.l.bf16 %v4366_v48 }
 0x923   : > { %v3234_v58 = vsel %vm861_vm7, %v4362_v17, %v4367_v8  ;;  %v3235_v2 = vsel %vm861_vm7, %v4363_v24, %v4368_v63  ;;  %v3236_v47 = vsel %vm861_vm7, %v4367_v8, %v4362_v17  ;;  %v3237_v30 = vsel %vm861_vm7, %v4368_v63, %v4363_v24  ;;  %v4371_v42 = vpop.permute.xlu0 %4370 }
 0x924   : > { %v4211_v6 = vpack.c.bf16 %v3235_v2, %v3234_v58  ;;  %v4214_v55 = vpack.c.bf16 %v3237_v30, %v3236_v47  ;;  %v4373_v54 = vunpack.i.h.bf16 %v4371_v42  ;;  %v4372_v26 = vunpack.i.l.bf16 %v4371_v42  ;;  %v4376_v25 = vpop.permute.xlu1 %4375 }
 0x925   : > { %v4378_v5 = vunpack.i.h.bf16 %v4376_v25  ;;  %v4377_v49 = vunpack.i.l.bf16 %v4376_v25  ;;  %vm6420_vm7 = vcmp.eq.s32.totalorder %v4747_v34, 1 }
 0x926   : > { %4213 = vmatprep.subr.msk.bf16.mxu1 %vm4212_vm15, %v4211_v6  ;;  %vm4218_vm10 = vmpackc.low %vm6420_vm7, %vm6420_vm7  ;;  %vm6428_vm7 = vcmp.lt.s32.totalorder %v4738_v31, 1  ;;  %v809_v6 = vld [vmem:[%s6139_s22 + $0xc] sm:$0x7] }
 0x927   : > { %v3218_v13 = vsel %vm827_vm6, %v4372_v26, %v4377_v49  ;;  %v3219_v32 = vsel %vm827_vm6, %v4373_v54, %v4378_v5  ;;  %v3220_v1 = vsel %vm827_vm6, %v4377_v49, %v4372_v26  ;;  %v3221_v12 = vsel %vm827_vm6, %v4378_v5, %v4373_v54  ;;  %v4381_v51 = vpop.permute.xlu0 %4380  ;;  %4216 = vmatpush1.bf16.msk.msra.mxu1 %vm4215_vm8, %v4214_v55  ;;  %vm6422_vm6 = vmmov %vm6409_vm4 }
 0x928   : > { %v4217_v11 = vpack.c.bf16 %v3219_v32, %v3218_v13  ;;  %v4220_v15 = vpack.c.bf16 %v3221_v12, %v3220_v1  ;;  %v4383_v62 = vunpack.i.h.bf16 %v4381_v51  ;;  %v4382_v59 = vunpack.i.l.bf16 %v4381_v51  ;;  %v4386_v22 = vpop.permute.xlu1 %4385  ;;  %vm4224_vm4 = vmpackc.low %vm6425_vm13, %vm6425_vm13 }
 0x929   : > { %v4388_v19 = vunpack.i.h.bf16 %v4386_v22  ;;  %v4387_v9 = vunpack.i.l.bf16 %v4386_v22  ;;  %vm6426_vm15 = vmmov %vm6424_vm12 }
 0x92a   : > { %4150 = vmatmul.mubr.msk.f32.vlgmr.msra.gmra.mrb[22].mxu1 %vm6422_vm6, %v807_v33  ;;  %4219 = vmatprep.subr.msk.bf16.mxu1 %vm4218_vm10, %v4217_v11  ;;  %vm6427_vm8 = vmmov %vm6424_vm12 }
 0x92b   : > { %v3398_v45 = vsel %vm6423_vm14, %v4382_v59, %v4387_v9  ;;  %v3399_v34 = vsel %vm6424_vm12, %v4383_v62, %v4388_v19  ;;  %v4391_v57 = vpop.permute.xlu0 %4390  ;;  %4222 = vmatpush1.bf16.msk.msra.mxu1 %vm4221_vm9, %v4220_v15  ;;  %3383 = vmatprep.mubr.f32.mxu1 %v6406_v27  ;;  %v3400_v43 = vsel %vm6426_vm15, %v4387_v9, %v4382_v59  ;;  %vm6429_vm10 = vmmov %vm6428_vm7  ;;  %vm6431_vm14 = vcmask 130048   ;;  %v811_v59 = vld [vmem:[%s6139_s22 + $0x14] sm:$0x7] }
 0x92c   : > { %v4223_v38 = vpack.c.bf16 %v3399_v34, %v3398_v45  ;;  %v4393_v23 = vunpack.i.h.bf16 %v4391_v57  ;;  %v4392_v29 = vunpack.i.l.bf16 %v4391_v57  ;;  %v4396_v16 = vpop.permute.xlu1 %4395  ;;  %v3401_v20 = vsel %vm6427_vm8, %v4388_v19, %v4383_v62  ;;  %vm4227_vm9 = vmpackc.low %vm6430_vm11, %vm6430_vm11 }
 0x92d   : > { %v4398_v21 = vunpack.i.h.bf16 %v4396_v16  ;;  %v4397_v3 = vunpack.i.l.bf16 %v4396_v16  ;;  %v4226_v24 = vpack.c.bf16 %v3401_v20, %v3400_v43  ;;  %vm4230_vm6 = vmpackc.low %vm4816_vm5, %vm4816_vm5  ;;  %vm6434_vm5 = vcmp.eq.s32.totalorder %v4827_v10, 1 }
 0x92e   : > { %4225 = vmatprep.subr.msk.bf16.mxu1 %vm4224_vm4, %v4223_v38  ;;  %vm6432_vm12 = vmmov %vm6428_vm7  ;;  %vm6436_vm8 = vcmp.lt.s32.totalorder %v4738_v31, 127 }
 0x92f   : > { %v3490_v40 = vsel %vm6428_vm7, %v4392_v29, %v4397_v3  ;;  %v3491_v28 = vsel %vm6429_vm10, %v4393_v23, %v4398_v21  ;;  %v3492_v17 = vsel %vm6432_vm12, %v4397_v3, %v4392_v29  ;;  %vm6433_vm13 = vmmov %vm6428_vm7  ;;  %v4401_v63 = vpop.permute.xlu0 %4400 }
 0x930   : > { %v4229_v4 = vpack.c.bf16 %v3491_v28, %v3490_v40  ;;  %v3493_v48 = vsel %vm6433_vm13, %v4398_v21, %v4393_v23  ;;  %v4406_v7 = vpop.permute.xlu1 %4405  ;;  %vm4233_vm4 = vmpackc.low %vm6434_vm5, %vm6434_vm5  ;;  %v4403_v58 = vunpack.i.h.bf16 %v4401_v63  ;;  %v4402_v2 = vunpack.i.l.bf16 %v4401_v63  ;;  %v812_v21 = vld [vmem:[%s6139_s22 + $0x18] sm:$0x7]  ;;  %v814_v28 = vld [vmem:[%s6139_s22 + $0x20] sm:$0x7] }
 0x931   : > { %v4232_v8 = vpack.c.bf16 %v3493_v48, %v3492_v17  ;;  %vm6435_vm15 = vmmov %vm6431_vm14  ;;  %v4408_v47 = vunpack.i.h.bf16 %v4406_v7  ;;  %v4407_v30 = vunpack.i.l.bf16 %v4406_v7 }
 0x932   : > { %4155 = vmatmul.mubr.msk.f32.vlgmr.msra.gmra.mrb[22].mxu1 %vm6431_vm14, %v806_v61  ;;  %vm6437_vm7 = vmmov %vm6436_vm8 }
 0x933   : > { %4228 = vmatpush1.bf16.msk.msra.mxu1 %vm4227_vm9, %v4226_v24  ;;  %3473 = vmatprep.mubr.f32.mxu1 %v6406_v27  ;;  %v3660_v42 = vsel %vm6436_vm8, %v4407_v30, %v4402_v2  ;;  %v3661_v10 = vsel %vm6437_vm7, %v4408_v47, %v4403_v58  ;;  %v4411_v55 = vpop.permute.xlu0 %4410  ;;  %vm4240_vm10 = vmpackc.low %vm4869_vm2, %vm4869_vm2  ;;  %vm6446_vm8 = vcmp.lt.s32.totalorder %v4738_v31, 111 }
 0x934   : > { %4231 = vmatprep.subr.msk.bf16.mxu1 %vm4230_vm6, %v4229_v4  ;;  %v4416_v54 = vpop.permute.xlu1 %4415  ;;  %v4239_v14 = vpack.c.bf16 %v3661_v10, %v3660_v42  ;;  %vm6438_vm11 = vmmov %vm6431_vm14  ;;  %v4413_v53 = vunpack.i.h.bf16 %v4411_v55  ;;  %vm6441_vm14 = vcmp.eq.s32.totalorder %v4885_v41, 1 }
 0x935   : > { %v4418_v26 = vunpack.i.h.bf16 %v4416_v54  ;;  %v4417_v25 = vunpack.i.l.bf16 %v4416_v54  ;;  %vm6439_vm9 = vmmov %vm6437_vm7 }
 0x936   : > { %v3658_v5 = vsel %vm6439_vm9, %v4402_v2, %v4407_v30  ;;  %vm6440_vm6 = vmmov %vm6437_vm7  ;;  %vm6449_vm9 = vcmp.eq.s32.totalorder %v6369_v60, 1  ;;  %v813_v60 = vld [vmem:[%s6139_s22 + $0x1c] sm:$0x7] }
 0x937   : > { %v3659_v35 = vsel %vm6440_vm6, %v4403_v58, %v4408_v47  ;;  %v3753_v13 = vsel %vm1526_vm3, %v4418_v26, %v4413_v53  ;;  %v4421_v46 = vpop.permute.xlu0 %4420  ;;  %vm4243_vm2 = vmpackc.low %vm1425_vm0, %vm1425_vm0  ;;  %v3751_v15 = vsel %vm1526_vm3, %v4413_v53, %v4418_v26  ;;  %vm6443_vm0 = vcmp.eq.s32.totalorder %v4916_v50, 1 }
 0x938   : > { %v4242_v32 = vpack.c.bf16 %v3659_v35, %v3658_v5  ;;  %vm4246_vm12 = vmpackc.low %vm6441_vm14, %vm6441_vm14  ;;  %v4423_v12 = vunpack.i.h.bf16 %v4421_v46  ;;  %v4422_v51 = vunpack.i.l.bf16 %v4421_v46 }
 0x939   : > { %vm6442_vm13 = vmmov %vm6438_vm11 }
 0x93a   : > { %4160 = vmatmul.mubr.msk.f32.vlgmr.msra.gmra.mrb[22].mxu1 %vm6435_vm15, %v808_v56  ;;  %vm4249_vm5 = vmpackc.low %vm6443_vm0, %vm6443_vm0 }
 0x93b   : > { %4234 = vmatpush1.bf16.msk.msra.mxu1 %vm4233_vm4, %v4232_v8  ;;  %3565 = vmatprep.mubr.f32.mxu1 %v6406_v27  ;;  %v4431_v22 = vpop.permute.xlu0 %4430  ;;  %vm6444_vm4 = vcmp.eq.s32.totalorder %v4922_v52, 1  ;;  %vm6445_vm15 = vmmov %vm6438_vm11 }
 0x93c   : > { %4236 = vmatprep.subr.bf16.mxu1 %v4235_v39  ;;  %v4412_v39 = vunpack.i.l.bf16 %v4411_v55  ;;  %v4433_v34 = vunpack.i.h.bf16 %v4431_v22  ;;  %v4432_v57 = vunpack.i.l.bf16 %v4431_v22  ;;  %vm6447_vm7 = vmmov %vm6446_vm8 }
 0x93d   : > { %vm4258_vm6 = vmpackc.low %vm6449_vm9, %vm6449_vm9 }
 0x93e   : > { %v3752_v49 = vsel %vm1526_vm3, %v4417_v25, %v4412_v39  ;;  %v3750_v37 = vsel %vm1526_vm3, %v4412_v39, %v4417_v25  ;;  %vm4252_vm3 = vmpackc.low %vm6444_vm4, %vm6444_vm4 }
 0x93f   : > { %v4245_v1 = vpack.c.bf16 %v3753_v13, %v3752_v49  ;;  %v4248_v9 = vpack.c.bf16 %v3751_v15, %v3750_v37 }
 0x942   : > { %4165 = vmatmul.mubr.msk.f32.vlgmr.msra.gmra.mrb[22].mxu1 %vm6438_vm11, %v809_v6 }
 0x943   : > { %4238 = vmatpush1.bf16.msra.mxu1 %v4237_v36  ;;  %3641 = vmatprep.mubr.f32.mxu1 %v6406_v27  ;;  %v4426_v36 = vpop.permute.xlu1 %4425 }
 0x944   : > { %4241 = vmatprep.subr.msk.bf16.mxu1 %vm4240_vm10, %v4239_v14  ;;  %v4428_v33 = vunpack.i.h.bf16 %v4426_v36  ;;  %v4427_v11 = vunpack.i.l.bf16 %v4426_v36  ;;  %vm6448_vm10 = vcmp.eq.s32.totalorder %v4949_v18, 1 }
 0x945   : > { %vm4255_vm11 = vmpackc.low %vm6448_vm10, %vm6448_vm10 }
 0x946   : > { %v3844_v41 = vsel %vm1648_vm1, %v4427_v11, %v4422_v51  ;;  %v3845_v62 = vsel %vm1648_vm1, %v4428_v33, %v4423_v12  ;;  %v3842_v50 = vsel %vm1648_vm1, %v4422_v51, %v4427_v11  ;;  %v3843_v29 = vsel %vm1648_vm1, %v4423_v12, %v4428_v33  ;;  %vm6450_vm1 = vmmov %vm6442_vm13 }
 0x947   : > { %v4436_v19 = vpop.permute.xlu1 %4435  ;;  %v4251_v45 = vpack.c.bf16 %v3845_v62, %v3844_v41  ;;  %v4254_v3 = vpack.c.bf16 %v3843_v29, %v3842_v50  ;;  %vm6454_vm0 = vmmov %vm6450_vm1 }
 0x948   : > { %v4438_v38 = vunpack.i.h.bf16 %v4436_v19  ;;  %v4437_v23 = vunpack.i.l.bf16 %v4436_v19 }
 0x94a   : > { %4166 = vmatmul.mubr.msk.f32.vlgmr.msra.gmra.mrb[22].mxu1 %vm6442_vm13, %v810_v44  ;;  %v3936_v52 = vsel %vm6446_vm8, %v4437_v23, %v4432_v57  ;;  %v3937_v16 = vsel %vm6447_vm7, %v4438_v38, %v4433_v34 }
 0x94b   : > { %4244 = vmatpush1.bf16.msk.msra.mxu1 %vm4243_vm2, %v4242_v32  ;;  %3733 = vmatprep.mubr.f32.mxu1 %v6406_v27  ;;  %v4257_v43 = vpack.c.bf16 %v3937_v16, %v3936_v52  ;;  %vm6451_vm2 = vmmov %vm6447_vm7 }
 0x94c   : > { %4247 = vmatprep.subr.msk.bf16.mxu1 %vm4246_vm12, %v4245_v1  ;;  %v3934_v20 = vsel %vm6451_vm2, %v4432_v57, %v4437_v23  ;;  %vm6452_vm14 = vmmov %vm6451_vm2  ;;  %vm6453_vm12 = vcmp.eq.s32.totalorder %v6367_v0, 1  ;;  %v4021_v31 = vpop.permute.xlu0 %4020 }
 0x94d   : > { %v3935_v18 = vsel %vm6452_vm14, %v4433_v34, %v4438_v38  ;;  %vm4261_vm13 = vmpackc.low %vm6453_vm12, %vm6453_vm12 }
 0x94e   : > { %v4260_v40 = vpack.c.bf16 %v3935_v18, %v3934_v20 }
 0x952   : > { %4171 = vmatmul.mubr.msk.f32.vlgmr.msra.gmra.mrb[22].mxu1 %vm6445_vm15, %v811_v59 }
 0x953   : > { %4250 = vmatpush1.bf16.msk.msra.mxu1 %vm4249_vm5, %v4248_v9  ;;  %3825 = vmatprep.mubr.f32.mxu1 %v6406_v27  ;;  %vm6455_vm5 = vmmov %vm6454_vm0 }
 0x954   : > { %4253 = vmatprep.subr.msk.bf16.mxu1 %vm4252_vm3, %v4251_v45 }
 0x95a   : > { %4176 = vmatmul.mubr.msk.f32.vlgmr.msra.gmra.mrb[22].mxu1 %vm6450_vm1, %v812_v21 }
 0x95b   : > { %4256 = vmatpush1.bf16.msk.msra.mxu1 %vm4255_vm11, %v4254_v3  ;;  %3917 = vmatprep.mubr.f32.mxu1 %v6406_v27 }
 0x95c   : > { %4259 = vmatprep.subr.msk.bf16.mxu1 %vm4258_vm6, %v4257_v43 }
 0x962   : > { %4181 = vmatmul.mubr.msk.f32.vlgmr.msra.gmra.mrb[22].mxu1 %vm6454_vm0, %v813_v60 }
 0x963   : > { %4262 = vmatpush1.bf16.msk.msra.mxu1 %vm4261_vm13, %v4260_v40  ;;  %4009 = vmatprep.mubr.f32.mxu1 %v6406_v27 }
 0x96a   : > { %4186 = vmatmul.mubr.msk.f32.vlgmr.msra.gmra.mrb[22].mxu1 %vm6455_vm5, %v814_v28 }
 0xa3d   : > { %v4011_v61 = vpop.f32.mrb[22].mxu1 }
 0xa3e   : > { %v4023_v4 = vadd.f32 %v4021_v31, %v4011_v61  ;;  %v4013_v24 = vpop.f32.mrb[23].mxu1 }
 0xa3f   : > { %v4024_v17 = vadd.f32 %v4021_v31, %v4013_v24 }
 0xa41   : > { %v4027_v0 = vcombine.low %v4023_v4, %v4024_v17 }
 0xa43   : > { %4029 = vst [vmem:[%s737_s0] sm:$0x77] %v4027_v0 }
 0xa44 PF: > { %s6458_s28 = sld [smem:[#allocation2_spill]] }
 0xa4a   : > { %s34_s5 = sadd.s32 1, %s6458_s28  }
 0xa4b   : > { %p31_p4 = scmp.ge.s32.totalorder %s34_s5, 4  }
 0xa4d   :  { %33 = sbr.rel (!%p31_p4) target bundleno = 14 (0xe), region = 146 }

</bundles_post_ra>
